<compile_context>
chip_gen: v6e
topology: v6e:2x2x1
jax: 0.10.0
libtpu: 0.0.40
codegen_flags: <defaults>
</compile_context>

<pallas_src>
import functools

import numpy as np
import jax
import jax.numpy as jnp
from jax import lax
from jax.experimental import pallas as pl
from jax.experimental.pallas import tpu as pltpu

EPS32 = float(np.finfo(np.float32).eps)
BN_EPS = 1e-5
LANE = 128

CONFIG = {
    'ref_ch': 0,
    'sigma_start': [8.0, 16.0],          # -> output_num = 2
    'degree_resolution': 30,             # -> azi_size = 12
    'max_spk': 2,
    'CRN': {
        'input_audio_channel': 4,        # -> 2*(4-1) = 6 IRTF channels
        'CNN': {'layer_num': 3, 'kernel_size': 3, 'filter': 8,
                'max_pool': {'kernel_size': (2, 1), 'stride': (2, 1)}},
        'GRU': {'input_size': 16, 'hidden_size': 32, 'batch_first': True},
    },
}


def _elu(x):
    return jnp.where(x > 0, x, jnp.exp(jnp.minimum(x, 0.0)) - 1.0)


def _round_up(n, m):
    return ((n + m - 1) // m) * m


# ----------------------------------------------------------------------------
# Wrapper-side weight preprocessing (constant-folded under jit).
# ----------------------------------------------------------------------------
def _prep_conv_layer(layer, freq):
    """Conv2d(3x3, causal pad (1,2)) + bias + eval-BN folded into 3 frequency-
    Toeplitz matmuls (one per time tap, BN scale folded into rows) + a shift
    column.  Output rows are pre-permuted so MaxPool2d((2,1)) reduces to a max
    of the top/bottom row halves."""
    w = jnp.asarray(layer['w'], jnp.float32)          # (Cout, Cin, 3, 3)
    cout = w.shape[0]
    scale = layer['gamma'] * lax.rsqrt(layer['var'] + BN_EPS)
    shift = layer['beta'] + scale * (layer['b'] - layer['mean'])
    scale_rows = jnp.repeat(scale, freq)[:, None]
    shift_rows = jnp.repeat(shift, freq)[:, None]
    eyes = [jnp.eye(freq, k=kf - 1, dtype=jnp.float32) for kf in range(3)]
    idx = np.arange(cout * freq).reshape(cout, freq)
    perm = np.concatenate([idx[:, 0::2].reshape(-1), idx[:, 1::2].reshape(-1)])
    taps = []
    for kt in range(3):                               # kt indexes input time t-2+kt
        m = sum(jnp.kron(w[:, :, kf, kt], eyes[kf]) for kf in range(3))
        taps.append((m * scale_rows)[perm])           # BN scale folded into weights
    return taps, shift_rows[perm]


def _prep_head(head, azi, a_pad):
    """1x1 conv + eval-BN head: fold the BN scale into w1; pad the final conv
    to a_pad output rows so stores are full (8,128) tiles."""
    scale = head['gamma'] * lax.rsqrt(head['var'] + BN_EPS)
    w1 = head['w1'] * scale[:, None]
    sh1 = (head['beta'] + scale * (head['b1'] - head['mean']))[:, None]
    w2 = jnp.zeros((a_pad, head['w2'].shape[1]), jnp.float32).at[:azi].set(head['w2'])
    b2 = jnp.zeros((a_pad, 1), jnp.float32).at[:azi, 0].set(head['b2'])
    return w1, sh1, w2, b2


def _pack_rows(mats, width):
    """Stack 2-D matrices into one (R, width) f32 slab (8-row aligned segments).

    Returns (slab, index) with index[i] = (row_start, rows, cols) of mats[i]."""
    chunks, index, row = [], [], 0
    for m in mats:
        m = jnp.asarray(m, jnp.float32)
        r, c = m.shape
        rp = _round_up(r, 8)
        buf = jnp.zeros((rp, width), jnp.float32).at[:r, :c].set(m)
        chunks.append(buf)
        index.append((row, r, c))
        row += rp
    return jnp.concatenate(chunks, axis=0), tuple(index)


# ----------------------------------------------------------------------------
# Fused forward kernel.  Activations are (feature_rows, TB_pad) slabs, columns
# ordered (t, b), real data at columns [P, P+T*B), causal zero pad at [0, P).
# ----------------------------------------------------------------------------
def _build_kernel(meta, w_index, v_index):
    B, T, C, F, H = meta['B'], meta['T'], meta['C'], meta['F'], meta['H']
    TB, TB_pad, P = meta['TB'], meta['TB_pad'], meta['P']
    A_pad, n_heads, n_layers = meta['A_pad'], meta['n_heads'], meta['n_layers']
    CF = C * F

    def kernel(ri_ref, w_ref, v_ref, out_ref, gi_ref, xh_ref):
        def wmat(i):
            r0, r, c = w_index[i]
            return w_ref[r0:r0 + r, 0:c]              # static ref slice -> load

        def vcol(i):
            r0, r, _ = v_index[i]
            return v_ref[r0:r0 + r, :]

        col = lax.broadcasted_iota(jnp.int32, (1, TB_pad), 1)
        valid = (col >= P) & (col < P + TB)

        # ---- IRTF feature: complex ratio w.r.t. clamped reference channel 0 ----
        ri = ri_ref[...]
        cre = jnp.maximum(ri[0:F], EPS32)
        cim = jnp.maximum(ri[CF:CF + F], EPS32)
        inv = pl.reciprocal(cre * cre + cim * cim, approx=False)
        reals, imags = [], []
        for ch in range(1, C):
            a = ri[ch * F:(ch + 1) * F]
            b = ri[CF + ch * F:CF + (ch + 1) * F]
            reals.append((a * cre + b * cim) * inv)
            imags.append((b * cre - a * cim) * inv)
        x = jnp.concatenate(reals + imags, axis=0)    # (2*(C-1)*F, TB_pad)

        # ---- 3 causal conv blocks: freq-Toeplitz MXU matmuls, time taps via roll
        for l in range(n_layers):
            w_t0 = wmat(3 * l + 0)                    # input time t-2
            w_t1 = wmat(3 * l + 1)                    # input time t-1
            w_t2 = wmat(3 * l + 2)                    # input time t
            sh = vcol(l)
            y = jnp.dot(w_t2, x, preferred_element_type=jnp.float32)
            y = y + jnp.dot(w_t1, pltpu.roll(x, B, 1),
                            preferred_element_type=jnp.float32)
            y = y + jnp.dot(w_t0, pltpu.roll(x, 2 * B, 1),
                            preferred_element_type=jnp.float32)
            y = _elu(y + sh)                          # folded conv-bias + BN shift
            half = y.shape[0] // 2
            y = jnp.maximum(y[:half], y[half:])       # MaxPool2d((2,1)), rows permuted
            x = jnp.where(valid, y, 0.0)              # restore causal zero pad

        # ---- GRU: hoisted input projection + scratch-backed recurrence ----
        i_wih = 3 * n_layers
        w_ih = wmat(i_wih)
        w_hh = wmat(i_wih + 1)
        b_ih = vcol(n_layers)
        b_hh = vcol(n_layers + 1)
        gi_ref[...] = jnp.dot(w_ih, x, preferred_element_type=jnp.float32) + b_ih
        xh_ref[...] = jnp.zeros((H, TB_pad), jnp.float32)

        def gru_step(t, h):
            start = P + t * B
            gi_t = gi_ref[:, pl.ds(start, B)]         # (3H, B)
            gh = jnp.dot(w_hh, h, preferred_element_type=jnp.float32) + b_hh
            r = jax.nn.sigmoid(gi_t[0:H] + gh[0:H])
            z = jax.nn.sigmoid(gi_t[H:2 * H] + gh[H:2 * H])
            n = jnp.tanh(gi_t[2 * H:3 * H] + r * gh[2 * H:3 * H])
            h_new = (1.0 - z) * n + z * h
            xh_ref[:, pl.ds(start, B)] = h_new
            return h_new

        lax.fori_loop(0, T, gru_step, jnp.zeros((H, B), jnp.float32),
                      unroll=min(T, 8))

        # ---- chained azimuth heads: 1x1 conv + BN + ELU, then 1x1 conv ----
        xh = xh_ref[...]
        i_h = i_wih + 2
        for nh in range(n_heads):
            w1 = wmat(i_h + 2 * nh)
            w2 = wmat(i_h + 2 * nh + 1)
            sh1 = vcol(n_layers + 2 + 2 * nh)
            b2 = vcol(n_layers + 2 + 2 * nh + 1)
            y = _elu(jnp.dot(w1, xh, preferred_element_type=jnp.float32) + sh1)
            res = jnp.dot(w2, y, preferred_element_type=jnp.float32) + b2
            out_ref[nh * A_pad:(nh + 1) * A_pad, :] = res
            xh = y                                    # next head eats the ELU output

    return kernel


# ----------------------------------------------------------------------------
# make_target (label-coding math; plain JAX glue, not part of the NN forward)
# ----------------------------------------------------------------------------
def make_target(vad_frame, each_azi, sigma, azi_size, degree_resolution):
    azi_target = jnp.floor(each_azi / (360 // azi_size)).astype(jnp.int32)
    azi_range = jnp.arange(azi_size, dtype=jnp.int32)[None, :]
    dist = azi_target[..., None] * degree_resolution - azi_range * degree_resolution
    dabs = jnp.abs(dist)
    dabs = jnp.stack([dabs, 360 - dabs], axis=0)
    d2 = jnp.min(dabs, axis=0) ** 2                                   # (B,spk,azi)
    sig = sigma.reshape(1, 1, -1)
    lab = jnp.exp(-d2[..., None].astype(jnp.float32) / (sig ** 2))[..., None]
    tgt = lab * vad_frame[:, :, None, None, :]                        # (B,spk,azi,n,T)
    tgt = jnp.max(tgt, axis=1)                                        # (B,azi,n,T)
    return jnp.transpose(tgt, (0, 2, 1, 3))                           # (B,n,azi,T)


# ----------------------------------------------------------------------------
# main_model forward
# ----------------------------------------------------------------------------
def main_model_forward(params, config, stft_real, stft_imag, vad_frame, each_azi):
    B, C, F, T = stft_real.shape
    azi_size = 360 // config['degree_resolution']
    n_heads = len(config['sigma_start'])
    n_layers = config['CRN']['CNN']['layer_num']
    H = config['CRN']['GRU']['hidden_size']
    sigma = jnp.asarray(config['sigma_start'], jnp.float32)

    TB = T * B
    P = 2 * B                                     # 2-frame causal zero history
    TB_pad = _round_up(TB + P, LANE)              # lane-dense column axis
    A_pad = _round_up(azi_size, 8)

    # ---- input slab (one DMA): (2*C*F, TB_pad), columns (t, b) at [P, P+TB) ----
    x4 = jnp.stack([stft_real, stft_imag], axis=0)            # (2,B,C,F,T)
    x4 = jnp.transpose(x4, (0, 2, 3, 4, 1)).reshape(2 * C * F, TB)
    ri_slab = jnp.zeros((2 * C * F, TB_pad), jnp.float32).at[:, P:P + TB].set(x4)

    # ---- packed weight / shift slabs (constant-folded under jit) ----
    w_mats, v_mats = [], []
    freq = F
    for layer in params['cnn']:
        taps, shift = _prep_conv_layer(layer, freq)
        w_mats += taps
        v_mats.append(shift)
        freq //= 2
    gru = params['gru']
    assert freq * params['cnn'][-1]['w'].shape[0] == gru['w_ih'].shape[1]
    w_mats += [gru['w_ih'], gru['w_hh']]
    v_mats += [gru['b_ih'][:, None], gru['b_hh'][:, None]]
    for head in params['heads']:
        w1, sh1, w2, b2 = _prep_head(head, azi_size, A_pad)
        w_mats += [w1, w2]
        v_mats += [sh1, b2]
    w_slab, w_index = _pack_rows(w_mats, LANE)
    v_slab, v_index = _pack_rows(v_mats, 1)

    meta = dict(B=B, T=T, C=C, F=F, H=H, TB=TB, TB_pad=TB_pad, P=P,
                A_pad=A_pad, n_heads=n_heads, n_layers=n_layers)
    kernel = _build_kernel(meta, w_index, v_index)

    # advisory cost estimate (lets XLA schedule the wrapper glue around the call)
    flops = 2 * TB_pad * sum(r * c for (_, r, c) in w_index) + 2 * T * B * 3 * H * H
    transcend = TB_pad * (F + sum(w_index[3 * l][1] for l in range(n_layers))
                          + n_heads * H) + 3 * H * B * T
    bytes_acc = 4 * (ri_slab.size + w_slab.size + v_slab.size
                     + n_heads * A_pad * TB_pad)

    out_k = pl.pallas_call(                      # single grid point, all-VMEM
        kernel,
        out_shape=jax.ShapeDtypeStruct((n_heads * A_pad, TB_pad), jnp.float32),
        in_specs=[pl.BlockSpec(memory_space=pltpu.MemorySpace.VMEM)] * 3,
        out_specs=pl.BlockSpec(memory_space=pltpu.MemorySpace.VMEM),
        scratch_shapes=[pltpu.VMEM((3 * H, TB_pad), jnp.float32),   # gi
                        pltpu.VMEM((H, TB_pad), jnp.float32)],       # GRU outputs
        compiler_params=pltpu.CompilerParams(vmem_limit_bytes=32 * 1024 * 1024),
        cost_estimate=pl.CostEstimate(flops=int(flops),
                                      transcendentals=int(transcend),
                                      bytes_accessed=int(bytes_acc)),
    )(ri_slab, w_slab, v_slab)

    # (n_heads*A_pad, TB_pad) -> (B, num, azi, T)  (tiny output glue)
    body = out_k[:, P:P + TB].reshape(n_heads, A_pad, T, B)[:, :azi_size]
    out = jnp.transpose(body, (3, 0, 1, 2))

    target = make_target(vad_frame, each_azi, sigma, azi_size,
                         config['degree_resolution'])
    return out, target, vad_frame


# ----------------------------------------------------------------------------
# Pure-JAX reference of the NN forward (HIGHEST precision) for self-checking.
# ----------------------------------------------------------------------------
def reference_forward(params, config, stft_r, stft_i):
    hp = lax.Precision.HIGHEST
    B, C, F, T = stft_r.shape
    cre = jnp.maximum(stft_r[:, 0], EPS32)
    cim = jnp.maximum(stft_i[:, 0], EPS32)
    den = cre * cre + cim * cim
    feats = [(stft_r[:, ch] * cre + stft_i[:, ch] * cim) / den for ch in range(1, C)]
    feats += [(stft_i[:, ch] * cre - stft_r[:, ch] * cim) / den for ch in range(1, C)]
    x = jnp.stack(feats, axis=1)                                    # (B,2(C-1),F,T)
    for layer in params['cnn']:
        y = lax.conv_general_dilated(x, layer['w'], window_strides=(1, 1),
                                     padding=((1, 1), (2, 2)),
                                     dimension_numbers=('NCHW', 'OIHW', 'NCHW'),
                                     precision=hp)
        y = y + layer['b'][None, :, None, None]
        scale = layer['gamma'] / jnp.sqrt(layer['var'] + BN_EPS)
        y = (y - layer['mean'][None, :, None, None]) * scale[None, :, None, None] \
            + layer['beta'][None, :, None, None]
        y = jax.nn.elu(y)[..., :T]                                  # causal truncate
        x = jnp.maximum(y[:, :, 0::2, :], y[:, :, 1::2, :])         # MaxPool2d((2,1))
    b_, c_, f_, t_ = x.shape
    seq = x.reshape(b_, c_ * f_, t_).transpose(0, 2, 1)             # (B,T,I)
    gru = params['gru']
    H = gru['w_hh'].shape[1]

    def step(h, xt):
        gi = jnp.einsum('bi,gi->bg', xt, gru['w_ih'], precision=hp) + gru['b_ih']
        gh = jnp.einsum('bh,gh->bg', h, gru['w_hh'], precision=hp) + gru['b_hh']
        r = jax.nn.sigmoid(gi[:, :H] + gh[:, :H])
        z = jax.nn.sigmoid(gi[:, H:2 * H] + gh[:, H:2 * H])
        n = jnp.tanh(gi[:, 2 * H:] + r * gh[:, 2 * H:])
        h = (1.0 - z) * n + z * h
        return h, h

    _, hs = lax.scan(step, jnp.zeros((b_, H), jnp.float32),
                     jnp.transpose(seq, (1, 0, 2)))
    cur = jnp.transpose(hs, (1, 2, 0))                              # (B,H,T)
    outs = []
    for head in params['heads']:
        y = jnp.einsum('oh,bht->bot', head['w1'], cur, precision=hp) \
            + head['b1'][None, :, None]
        scale = head['gamma'] / jnp.sqrt(head['var'] + BN_EPS)
        y = (y - head['mean'][None, :, None]) * scale[None, :, None] \
            + head['beta'][None, :, None]
        y = jax.nn.elu(y)
        res = jnp.einsum('oh,bht->bot', head['w2'], y, precision=hp) \
            + head['b2'][None, :, None]
        outs.append(res)
        cur = y
    return jnp.stack(outs, axis=1)                                  # (B,num,azi,T)


# ----------------------------------------------------------------------------
# Deterministic parameter init (shapes dictated by the module __init__)
# ----------------------------------------------------------------------------
def init_params(key, config):
    crn_cfg = config['CRN']
    cnn_cfg = crn_cfg['CNN']
    n_layers = cnn_cfg['layer_num']
    filt = cnn_cfg['filter']
    in_ch = 2 * (crn_cfg['input_audio_channel'] - 1)
    H = crn_cfg['GRU']['hidden_size']
    I = crn_cfg['GRU']['input_size']
    azi_size = 360 // config['degree_resolution']
    n_heads = len(config['sigma_start'])

    keys = iter(jax.random.split(key, 16 * (n_layers + n_heads) + 16))

    def nrm(shape, scale):
        return scale * jax.random.normal(next(keys), shape, jnp.float32)

    params = {'cnn': [], 'heads': []}
    cin = in_ch
    for _ in range(n_layers):
        params['cnn'].append(dict(
            w=nrm((filt, cin, 3, 3), 0.2), b=nrm((filt,), 0.1),
            gamma=1.0 + nrm((filt,), 0.1), beta=nrm((filt,), 0.1),
            mean=nrm((filt,), 0.1),
            var=1.0 + 0.5 * jax.nn.sigmoid(nrm((filt,), 1.0)),
        ))
        cin = filt
    params['gru'] = dict(
        w_ih=nrm((3 * H, I), 0.2), w_hh=nrm((3 * H, H), 0.2),
        b_ih=nrm((3 * H,), 0.1), b_hh=nrm((3 * H,), 0.1),
    )
    for _ in range(n_heads):
        params['heads'].append(dict(
            w1=nrm((H, H), 0.2), b1=nrm((H,), 0.1),
            gamma=1.0 + nrm((H,), 0.1), beta=nrm((H,), 0.1),
            mean=nrm((H,), 0.1),
            var=1.0 + 0.5 * jax.nn.sigmoid(nrm((H,), 1.0)),
            w2=nrm((azi_size, H), 0.2), b2=nrm((azi_size,), 0.1),
        ))
    return params


if __name__ == "__main__":
    key = jax.random.PRNGKey(0)
    k1, k2, k3, k4, kp = jax.random.split(key, 5)

    B, C, F, T = 2, CONFIG['CRN']['input_audio_channel'], 16, 8
    max_spk = CONFIG['max_spk']

    stft_r = jax.random.normal(k1, (B, C, F, T), jnp.float32)
    stft_i = jax.random.normal(k2, (B, C, F, T), jnp.float32)
    # Keep the reference channel well-conditioned so the eps-clamped IRTF
    # denominator stays O(1) and the numerical self-check below is stable.
    stft_r = stft_r.at[:, 0].set(jnp.abs(stft_r[:, 0]) + 0.5)
    stft_i = stft_i.at[:, 0].set(jnp.abs(stft_i[:, 0]) + 0.5)
    vad_frame = (jax.random.uniform(k3, (B, max_spk, T)) > 0.5).astype(jnp.float32)
    each_azi = jax.random.uniform(k4, (B, max_spk), jnp.float32, 0.0, 359.0)

    params = init_params(kp, CONFIG)

    fwd = jax.jit(functools.partial(main_model_forward, params, CONFIG))
    out, target, vad_out = fwd(stft_r, stft_i, vad_frame, each_azi)
    jax.block_until_ready((out, target, vad_out))

    n_heads = len(CONFIG['sigma_start'])
    azi_size = 360 // CONFIG['degree_resolution']
    assert out.shape == (B, n_heads, azi_size, T), out.shape
    assert target.shape == (B, n_heads, azi_size, T), target.shape
    assert vad_out.shape == (B, max_spk, T), vad_out.shape
    assert bool(jnp.all(jnp.isfinite(out))), "non-finite output"

    # correctness self-check against a pure-JAX HIGHEST-precision reference
    ref = jax.jit(functools.partial(reference_forward, params, CONFIG))(stft_r, stft_i)
    np.testing.assert_allclose(np.asarray(out), np.asarray(ref),
                               rtol=5e-2, atol=5e-2)
    print("KERNEL_OK")
</pallas_src>

<mosaic_0001>
module attributes {stable_mosaic.version = 11 : i64} {
  func.func @kernel(%arg0: memref<128x128xf32, #tpu.memory_space<vmem>>, %arg1: memref<960x128xf32, #tpu.memory_space<vmem>>, %arg2: memref<512x1xf32, #tpu.memory_space<vmem>>, %arg3: memref<32x128xf32, #tpu.memory_space<vmem>>, %arg4: memref<96x128xf32, #tpu.memory_space<vmem>>, %arg5: memref<32x128xf32, #tpu.memory_space<vmem>>) attributes {dimension_semantics = [], scalar_prefetch = 0 : i64, scratch_operands = 2 : i64, tpu.core_type = #tpu.core_type<tc>} {
    %0 = tpu.iota {dimensions = array<i32: 1>} : vector<1x128xi32>
    %c4_i32 = arith.constant 4 : i32
    %1 = vector.broadcast %c4_i32 : i32 to vector<1x128xi32>
    %2 = arith.cmpi sge, %0, %1 : vector<1x128xi32>
    %c20_i32 = arith.constant 20 : i32
    %3 = vector.broadcast %c20_i32 : i32 to vector<1x128xi32>
    %4 = arith.cmpi slt, %0, %3 : vector<1x128xi32>
    %5 = arith.andi %2, %4 : vector<1x128xi1>
    %c0 = arith.constant 0 : index
    %c0_0 = arith.constant 0 : index
    %6 = vector.load %arg0[%c0, %c0_0] : memref<128x128xf32, #tpu.memory_space<vmem>>, vector<128x128xf32>
    %7 = vector.extract_strided_slice %6 {offsets = [0, 0], sizes = [16, 128], strides = [1, 1]} : vector<128x128xf32> to vector<16x128xf32>
    %cst = arith.constant 1.1920929E-7 : f32
    %8 = vector.broadcast %cst : f32 to vector<16x128xf32>
    %9 = arith.maximumf %7, %8 : vector<16x128xf32>
    %10 = vector.extract_strided_slice %6 {offsets = [64, 0], sizes = [16, 128], strides = [1, 1]} : vector<128x128xf32> to vector<16x128xf32>
    %cst_1 = arith.constant 1.1920929E-7 : f32
    %11 = vector.broadcast %cst_1 : f32 to vector<16x128xf32>
    %12 = arith.maximumf %10, %11 : vector<16x128xf32>
    %13 = arith.mulf %9, %9 : vector<16x128xf32>
    %14 = arith.mulf %12, %12 : vector<16x128xf32>
    %15 = arith.addf %13, %14 : vector<16x128xf32>
    %16 = tpu.reciprocal %15 : vector<16x128xf32> -> vector<16x128xf32>
    %17 = vector.extract_strided_slice %6 {offsets = [16, 0], sizes = [16, 128], strides = [1, 1]} : vector<128x128xf32> to vector<16x128xf32>
    %18 = vector.extract_strided_slice %6 {offsets = [80, 0], sizes = [16, 128], strides = [1, 1]} : vector<128x128xf32> to vector<16x128xf32>
    %19 = arith.mulf %17, %9 : vector<16x128xf32>
    %20 = arith.mulf %18, %12 : vector<16x128xf32>
    %21 = arith.addf %19, %20 : vector<16x128xf32>
    %22 = arith.mulf %21, %16 : vector<16x128xf32>
    %23 = arith.mulf %18, %9 : vector<16x128xf32>
    %24 = arith.mulf %17, %12 : vector<16x128xf32>
    %25 = arith.subf %23, %24 : vector<16x128xf32>
    %26 = arith.mulf %25, %16 : vector<16x128xf32>
    %27 = vector.extract_strided_slice %6 {offsets = [32, 0], sizes = [16, 128], strides = [1, 1]} : vector<128x128xf32> to vector<16x128xf32>
    %28 = vector.extract_strided_slice %6 {offsets = [96, 0], sizes = [16, 128], strides = [1, 1]} : vector<128x128xf32> to vector<16x128xf32>
    %29 = arith.mulf %27, %9 : vector<16x128xf32>
    %30 = arith.mulf %28, %12 : vector<16x128xf32>
    %31 = arith.addf %29, %30 : vector<16x128xf32>
    %32 = arith.mulf %31, %16 : vector<16x128xf32>
    %33 = arith.mulf %28, %9 : vector<16x128xf32>
    %34 = arith.mulf %27, %12 : vector<16x128xf32>
    %35 = arith.subf %33, %34 : vector<16x128xf32>
    %36 = arith.mulf %35, %16 : vector<16x128xf32>
    %37 = vector.extract_strided_slice %6 {offsets = [48, 0], sizes = [16, 128], strides = [1, 1]} : vector<128x128xf32> to vector<16x128xf32>
    %38 = vector.extract_strided_slice %6 {offsets = [112, 0], sizes = [16, 128], strides = [1, 1]} : vector<128x128xf32> to vector<16x128xf32>
    %39 = arith.mulf %37, %9 : vector<16x128xf32>
    %40 = arith.mulf %38, %12 : vector<16x128xf32>
    %41 = arith.addf %39, %40 : vector<16x128xf32>
    %42 = arith.mulf %41, %16 : vector<16x128xf32>
    %43 = arith.mulf %38, %9 : vector<16x128xf32>
    %44 = arith.mulf %37, %12 : vector<16x128xf32>
    %45 = arith.subf %43, %44 : vector<16x128xf32>
    %46 = arith.mulf %45, %16 : vector<16x128xf32>
    %47 = tpu.concatenate %22, %32, %42, %26, %36, %46 in 0 : vector<16x128xf32>, vector<16x128xf32>, vector<16x128xf32>, vector<16x128xf32>, vector<16x128xf32>, vector<16x128xf32> -> vector<96x128xf32>
    %c0_2 = arith.constant 0 : index
    %c0_3 = arith.constant 0 : index
    %48 = vector.load %arg1[%c0_2, %c0_3] : memref<960x128xf32, #tpu.memory_space<vmem>>, vector<128x96xf32>
    %c128 = arith.constant 128 : index
    %c0_4 = arith.constant 0 : index
    %49 = vector.load %arg1[%c128, %c0_4] : memref<960x128xf32, #tpu.memory_space<vmem>>, vector<128x96xf32>
    %c256 = arith.constant 256 : index
    %c0_5 = arith.constant 0 : index
    %50 = vector.load %arg1[%c256, %c0_5] : memref<960x128xf32, #tpu.memory_space<vmem>>, vector<128x96xf32>
    %c0_6 = arith.constant 0 : index
    %c0_7 = arith.constant 0 : index
    %51 = vector.load %arg2[%c0_6, %c0_7] : memref<512x1xf32, #tpu.memory_space<vmem>>, vector<128x1xf32>
    %cst_8 = arith.constant dense<0.000000e+00> : vector<128x128xf32>
    %52 = tpu.matmul %50, %47, %cst_8 {dimension_numbers = #tpu.dot_dimension_numbers<[1], [0], [0], [1], [0, 0, 1, 1], [], []>} : vector<128x96xf32>, vector<96x128xf32>, vector<128x128xf32> -> vector<128x128xf32>
    %c2_i32 = arith.constant 2 : i32
    %53 = tpu.dynamic_rotate %47 by %c2_i32 dim 1 : vector<96x128xf32>, i32 -> vector<96x128xf32>
    %cst_9 = arith.constant dense<0.000000e+00> : vector<128x128xf32>
    %54 = tpu.matmul %49, %53, %cst_9 {dimension_numbers = #tpu.dot_dimension_numbers<[1], [0], [0], [1], [0, 0, 1, 1], [], []>} : vector<128x96xf32>, vector<96x128xf32>, vector<128x128xf32> -> vector<128x128xf32>
    %55 = arith.addf %52, %54 : vector<128x128xf32>
    %c4_i32_10 = arith.constant 4 : i32
    %56 = tpu.dynamic_rotate %47 by %c4_i32_10 dim 1 : vector<96x128xf32>, i32 -> vector<96x128xf32>
    %cst_11 = arith.constant dense<0.000000e+00> : vector<128x128xf32>
    %57 = tpu.matmul %48, %56, %cst_11 {dimension_numbers = #tpu.dot_dimension_numbers<[1], [0], [0], [1], [0, 0, 1, 1], [], []>} : vector<128x96xf32>, vector<96x128xf32>, vector<128x128xf32> -> vector<128x128xf32>
    %58 = arith.addf %55, %57 : vector<128x128xf32>
    %59 = vector.broadcast %51 : vector<128x1xf32> to vector<128x128xf32>
    %60 = arith.addf %58, %59 : vector<128x128xf32>
    %cst_12 = arith.constant 0.000000e+00 : f32
    %61 = vector.broadcast %cst_12 : f32 to vector<128x128xf32>
    %62 = arith.cmpf ogt, %60, %61 : vector<128x128xf32>
    %cst_13 = arith.constant 0.000000e+00 : f32
    %63 = vector.broadcast %cst_13 : f32 to vector<128x128xf32>
    %64 = arith.minimumf %60, %63 : vector<128x128xf32>
    %65 = math.exp %64 : vector<128x128xf32>
    %cst_14 = arith.constant 1.000000e+00 : f32
    %66 = vector.broadcast %cst_14 : f32 to vector<128x128xf32>
    %67 = arith.subf %65, %66 : vector<128x128xf32>
    %68 = arith.select %62, %60, %67 : vector<128x128xi1>, vector<128x128xf32>
    %69 = vector.extract_strided_slice %68 {offsets = [0, 0], sizes = [64, 128], strides = [1, 1]} : vector<128x128xf32> to vector<64x128xf32>
    %70 = vector.extract_strided_slice %68 {offsets = [64, 0], sizes = [64, 128], strides = [1, 1]} : vector<128x128xf32> to vector<64x128xf32>
    %71 = arith.maximumf %69, %70 : vector<64x128xf32>
    %cst_15 = arith.constant 0.000000e+00 : f32
    %72 = vector.shape_cast %5 : vector<1x128xi1> to vector<1x128xi1>
    %73 = vector.broadcast %72 : vector<1x128xi1> to vector<64x128xi1>
    %74 = vector.broadcast %cst_15 : f32 to vector<64x128xf32>
    %75 = arith.select %73, %71, %74 : vector<64x128xi1>, vector<64x128xf32>
    %c384 = arith.constant 384 : index
    %c0_16 = arith.constant 0 : index
    %76 = vector.load %arg1[%c384, %c0_16] : memref<960x128xf32, #tpu.memory_space<vmem>>, vector<64x64xf32>
    %c448 = arith.constant 448 : index
    %c0_17 = arith.constant 0 : index
    %77 = vector.load %arg1[%c448, %c0_17] : memref<960x128xf32, #tpu.memory_space<vmem>>, vector<64x64xf32>
    %c512 = arith.constant 512 : index
    %c0_18 = arith.constant 0 : index
    %78 = vector.load %arg1[%c512, %c0_18] : memref<960x128xf32, #tpu.memory_space<vmem>>, vector<64x64xf32>
    %c128_19 = arith.constant 128 : index
    %c0_20 = arith.constant 0 : index
    %79 = vector.load %arg2[%c128_19, %c0_20] : memref<512x1xf32, #tpu.memory_space<vmem>>, vector<64x1xf32>
    %cst_21 = arith.constant dense<0.000000e+00> : vector<64x128xf32>
    %80 = tpu.matmul %78, %75, %cst_21 {dimension_numbers = #tpu.dot_dimension_numbers<[1], [0], [0], [1], [0, 0, 1, 1], [], []>} : vector<64x64xf32>, vector<64x128xf32>, vector<64x128xf32> -> vector<64x128xf32>
    %c2_i32_22 = arith.constant 2 : i32
    %81 = tpu.dynamic_rotate %75 by %c2_i32_22 dim 1 : vector<64x128xf32>, i32 -> vector<64x128xf32>
    %cst_23 = arith.constant dense<0.000000e+00> : vector<64x128xf32>
    %82 = tpu.matmul %77, %81, %cst_23 {dimension_numbers = #tpu.dot_dimension_numbers<[1], [0], [0], [1], [0, 0, 1, 1], [], []>} : vector<64x64xf32>, vector<64x128xf32>, vector<64x128xf32> -> vector<64x128xf32>
    %83 = arith.addf %80, %82 : vector<64x128xf32>
    %c4_i32_24 = arith.constant 4 : i32
    %84 = tpu.dynamic_rotate %75 by %c4_i32_24 dim 1 : vector<64x128xf32>, i32 -> vector<64x128xf32>
    %cst_25 = arith.constant dense<0.000000e+00> : vector<64x128xf32>
    %85 = tpu.matmul %76, %84, %cst_25 {dimension_numbers = #tpu.dot_dimension_numbers<[1], [0], [0], [1], [0, 0, 1, 1], [], []>} : vector<64x64xf32>, vector<64x128xf32>, vector<64x128xf32> -> vector<64x128xf32>
    %86 = arith.addf %83, %85 : vector<64x128xf32>
    %87 = vector.broadcast %79 : vector<64x1xf32> to vector<64x128xf32>
    %88 = arith.addf %86, %87 : vector<64x128xf32>
    %cst_26 = arith.constant 0.000000e+00 : f32
    %89 = vector.broadcast %cst_26 : f32 to vector<64x128xf32>
    %90 = arith.cmpf ogt, %88, %89 : vector<64x128xf32>
    %cst_27 = arith.constant 0.000000e+00 : f32
    %91 = vector.broadcast %cst_27 : f32 to vector<64x128xf32>
    %92 = arith.minimumf %88, %91 : vector<64x128xf32>
    %93 = math.exp %92 : vector<64x128xf32>
    %cst_28 = arith.constant 1.000000e+00 : f32
    %94 = vector.broadcast %cst_28 : f32 to vector<64x128xf32>
    %95 = arith.subf %93, %94 : vector<64x128xf32>
    %96 = arith.select %90, %88, %95 : vector<64x128xi1>, vector<64x128xf32>
    %97 = vector.extract_strided_slice %96 {offsets = [0, 0], sizes = [32, 128], strides = [1, 1]} : vector<64x128xf32> to vector<32x128xf32>
    %98 = vector.extract_strided_slice %96 {offsets = [32, 0], sizes = [32, 128], strides = [1, 1]} : vector<64x128xf32> to vector<32x128xf32>
    %99 = arith.maximumf %97, %98 : vector<32x128xf32>
    %cst_29 = arith.constant 0.000000e+00 : f32
    %100 = vector.shape_cast %5 : vector<1x128xi1> to vector<1x128xi1>
    %101 = vector.broadcast %100 : vector<1x128xi1> to vector<32x128xi1>
    %102 = vector.broadcast %cst_29 : f32 to vector<32x128xf32>
    %103 = arith.select %101, %99, %102 : vector<32x128xi1>, vector<32x128xf32>
    %c576 = arith.constant 576 : index
    %c0_30 = arith.constant 0 : index
    %104 = vector.load %arg1[%c576, %c0_30] : memref<960x128xf32, #tpu.memory_space<vmem>>, vector<32x32xf32>
    %c608 = arith.constant 608 : index
    %c0_31 = arith.constant 0 : index
    %105 = vector.load %arg1[%c608, %c0_31] : memref<960x128xf32, #tpu.memory_space<vmem>>, vector<32x32xf32>
    %c640 = arith.constant 640 : index
    %c0_32 = arith.constant 0 : index
    %106 = vector.load %arg1[%c640, %c0_32] : memref<960x128xf32, #tpu.memory_space<vmem>>, vector<32x32xf32>
    %c192 = arith.constant 192 : index
    %c0_33 = arith.constant 0 : index
    %107 = vector.load %arg2[%c192, %c0_33] : memref<512x1xf32, #tpu.memory_space<vmem>>, vector<32x1xf32>
    %cst_34 = arith.constant dense<0.000000e+00> : vector<32x128xf32>
    %108 = tpu.matmul %106, %103, %cst_34 {dimension_numbers = #tpu.dot_dimension_numbers<[1], [0], [0], [1], [0, 0, 1, 1], [], []>} : vector<32x32xf32>, vector<32x128xf32>, vector<32x128xf32> -> vector<32x128xf32>
    %c2_i32_35 = arith.constant 2 : i32
    %109 = tpu.dynamic_rotate %103 by %c2_i32_35 dim 1 : vector<32x128xf32>, i32 -> vector<32x128xf32>
    %cst_36 = arith.constant dense<0.000000e+00> : vector<32x128xf32>
    %110 = tpu.matmul %105, %109, %cst_36 {dimension_numbers = #tpu.dot_dimension_numbers<[1], [0], [0], [1], [0, 0, 1, 1], [], []>} : vector<32x32xf32>, vector<32x128xf32>, vector<32x128xf32> -> vector<32x128xf32>
    %111 = arith.addf %108, %110 : vector<32x128xf32>
    %c4_i32_37 = arith.constant 4 : i32
    %112 = tpu.dynamic_rotate %103 by %c4_i32_37 dim 1 : vector<32x128xf32>, i32 -> vector<32x128xf32>
    %cst_38 = arith.constant dense<0.000000e+00> : vector<32x128xf32>
    %113 = tpu.matmul %104, %112, %cst_38 {dimension_numbers = #tpu.dot_dimension_numbers<[1], [0], [0], [1], [0, 0, 1, 1], [], []>} : vector<32x32xf32>, vector<32x128xf32>, vector<32x128xf32> -> vector<32x128xf32>
    %114 = arith.addf %111, %113 : vector<32x128xf32>
    %115 = vector.broadcast %107 : vector<32x1xf32> to vector<32x128xf32>
    %116 = arith.addf %114, %115 : vector<32x128xf32>
    %cst_39 = arith.constant 0.000000e+00 : f32
    %117 = vector.broadcast %cst_39 : f32 to vector<32x128xf32>
    %118 = arith.cmpf ogt, %116, %117 : vector<32x128xf32>
    %cst_40 = arith.constant 0.000000e+00 : f32
    %119 = vector.broadcast %cst_40 : f32 to vector<32x128xf32>
    %120 = arith.minimumf %116, %119 : vector<32x128xf32>
    %121 = math.exp %120 : vector<32x128xf32>
    %cst_41 = arith.constant 1.000000e+00 : f32
    %122 = vector.broadcast %cst_41 : f32 to vector<32x128xf32>
    %123 = arith.subf %121, %122 : vector<32x128xf32>
    %124 = arith.select %118, %116, %123 : vector<32x128xi1>, vector<32x128xf32>
    %125 = vector.extract_strided_slice %124 {offsets = [0, 0], sizes = [16, 128], strides = [1, 1]} : vector<32x128xf32> to vector<16x128xf32>
    %126 = vector.extract_strided_slice %124 {offsets = [16, 0], sizes = [16, 128], strides = [1, 1]} : vector<32x128xf32> to vector<16x128xf32>
    %127 = arith.maximumf %125, %126 : vector<16x128xf32>
    %cst_42 = arith.constant 0.000000e+00 : f32
    %128 = vector.shape_cast %5 : vector<1x128xi1> to vector<1x128xi1>
    %129 = vector.broadcast %128 : vector<1x128xi1> to vector<16x128xi1>
    %130 = vector.broadcast %cst_42 : f32 to vector<16x128xf32>
    %131 = arith.select %129, %127, %130 : vector<16x128xi1>, vector<16x128xf32>
    %c672 = arith.constant 672 : index
    %c0_43 = arith.constant 0 : index
    %132 = vector.load %arg1[%c672, %c0_43] : memref<960x128xf32, #tpu.memory_space<vmem>>, vector<96x16xf32>
    %c768 = arith.constant 768 : index
    %c0_44 = arith.constant 0 : index
    %133 = vector.load %arg1[%c768, %c0_44] : memref<960x128xf32, #tpu.memory_space<vmem>>, vector<96x32xf32>
    %c224 = arith.constant 224 : index
    %c0_45 = arith.constant 0 : index
    %134 = vector.load %arg2[%c224, %c0_45] : memref<512x1xf32, #tpu.memory_space<vmem>>, vector<96x1xf32>
    %c320 = arith.constant 320 : index
    %c0_46 = arith.constant 0 : index
    %135 = vector.load %arg2[%c320, %c0_46] : memref<512x1xf32, #tpu.memory_space<vmem>>, vector<96x1xf32>
    %cst_47 = arith.constant dense<0.000000e+00> : vector<96x128xf32>
    %136 = tpu.matmul %132, %131, %cst_47 {dimension_numbers = #tpu.dot_dimension_numbers<[1], [0], [0], [1], [0, 0, 1, 1], [], []>} : vector<96x16xf32>, vector<16x128xf32>, vector<96x128xf32> -> vector<96x128xf32>
    %137 = vector.broadcast %134 : vector<96x1xf32> to vector<96x128xf32>
    %138 = arith.addf %136, %137 : vector<96x128xf32>
    %c0_48 = arith.constant 0 : index
    %c0_49 = arith.constant 0 : index
    %139 = vector.load %arg4[%c0_48, %c0_49] : memref<96x128xf32, #tpu.memory_space<vmem>>, vector<96x128xf32>
    tpu.vector_store %arg4[%c0_48, %c0_49], %138 {strides = array<i32>} : memref<96x128xf32, #tpu.memory_space<vmem>>, vector<96x128xf32>,
    %cst_50 = arith.constant 0.000000e+00 : f32
    %140 = vector.broadcast %cst_50 : f32 to vector<32x128xf32>
    %c0_51 = arith.constant 0 : index
    %c0_52 = arith.constant 0 : index
    %141 = vector.load %arg5[%c0_51, %c0_52] : memref<32x128xf32, #tpu.memory_space<vmem>>, vector<32x128xf32>
    tpu.vector_store %arg5[%c0_51, %c0_52], %140 {strides = array<i32>} : memref<32x128xf32, #tpu.memory_space<vmem>>, vector<32x128xf32>,
    %cst_53 = arith.constant 0.000000e+00 : f32
    %142 = vector.broadcast %cst_53 : f32 to vector<32x2xf32>
    %c0_i32 = arith.constant 0 : i32
    %c2_i32_54 = arith.constant 2 : i32
    %143 = arith.muli %c0_i32, %c2_i32_54 : i32
    %c4_i32_55 = arith.constant 4 : i32
    %144 = arith.addi %c4_i32_55, %143 : i32
    %c0_56 = arith.constant 0 : index
    %145 = arith.index_cast %144 : i32 to index
    %146 = vector.load %arg4[%c0_56, %145] : memref<96x128xf32, #tpu.memory_space<vmem>>, vector<96x2xf32>
    %cst_57 = arith.constant dense<0.000000e+00> : vector<96x2xf32>
    %147 = tpu.matmul %133, %142, %cst_57 {dimension_numbers = #tpu.dot_dimension_numbers<[1], [0], [0], [1], [0, 0, 1, 1], [], []>} : vector<96x32xf32>, vector<32x2xf32>, vector<96x2xf32> -> vector<96x2xf32>
    %148 = vector.broadcast %135 : vector<96x1xf32> to vector<96x2xf32>
    %149 = arith.addf %147, %148 : vector<96x2xf32>
    %150 = vector.extract_strided_slice %146 {offsets = [0, 0], sizes = [32, 2], strides = [1, 1]} : vector<96x2xf32> to vector<32x2xf32>
    %151 = vector.extract_strided_slice %149 {offsets = [0, 0], sizes = [32, 2], strides = [1, 1]} : vector<96x2xf32> to vector<32x2xf32>
    %152 = arith.addf %150, %151 : vector<32x2xf32>
    %153 = arith.negf %152 : vector<32x2xf32>
    %154 = math.exp %153 : vector<32x2xf32>
    %cst_58 = arith.constant 1.000000e+00 : f32
    %155 = vector.broadcast %cst_58 : f32 to vector<32x2xf32>
    %156 = arith.addf %155, %154 : vector<32x2xf32>
    %157 = arith.divf %155, %156 : vector<32x2xf32>
    %158 = vector.extract_strided_slice %146 {offsets = [32, 0], sizes = [32, 2], strides = [1, 1]} : vector<96x2xf32> to vector<32x2xf32>
    %159 = vector.extract_strided_slice %149 {offsets = [32, 0], sizes = [32, 2], strides = [1, 1]} : vector<96x2xf32> to vector<32x2xf32>
    %160 = arith.addf %158, %159 : vector<32x2xf32>
    %161 = arith.negf %160 : vector<32x2xf32>
    %162 = math.exp %161 : vector<32x2xf32>
    %cst_59 = arith.constant 1.000000e+00 : f32
    %163 = vector.broadcast %cst_59 : f32 to vector<32x2xf32>
    %164 = arith.addf %163, %162 : vector<32x2xf32>
    %165 = arith.divf %163, %164 : vector<32x2xf32>
    %166 = vector.extract_strided_slice %146 {offsets = [64, 0], sizes = [32, 2], strides = [1, 1]} : vector<96x2xf32> to vector<32x2xf32>
    %167 = vector.extract_strided_slice %149 {offsets = [64, 0], sizes = [32, 2], strides = [1, 1]} : vector<96x2xf32> to vector<32x2xf32>
    %168 = arith.mulf %157, %167 : vector<32x2xf32>
    %169 = arith.addf %166, %168 : vector<32x2xf32>
    %170 = math.tanh %169 : vector<32x2xf32>
    %cst_60 = arith.constant 1.000000e+00 : f32
    %171 = vector.broadcast %cst_60 : f32 to vector<32x2xf32>
    %172 = arith.subf %171, %165 : vector<32x2xf32>
    %173 = arith.mulf %172, %170 : vector<32x2xf32>
    %174 = arith.mulf %165, %142 : vector<32x2xf32>
    %175 = arith.addf %173, %174 : vector<32x2xf32>
    %c0_61 = arith.constant 0 : index
    %176 = arith.index_cast %144 : i32 to index
    %177 = vector.load %arg5[%c0_61, %176] : memref<32x128xf32, #tpu.memory_space<vmem>>, vector<32x2xf32>
    tpu.vector_store %arg5[%c0_61, %176], %175 {strides = array<i32>} : memref<32x128xf32, #tpu.memory_space<vmem>>, vector<32x2xf32>,
    %c1_i32 = arith.constant 1 : i32
    %c2_i32_62 = arith.constant 2 : i32
    %178 = arith.muli %c1_i32, %c2_i32_62 : i32
    %c4_i32_63 = arith.constant 4 : i32
    %179 = arith.addi %c4_i32_63, %178 : i32
    %c0_64 = arith.constant 0 : index
    %180 = arith.index_cast %179 : i32 to index
    %181 = vector.load %arg4[%c0_64, %180] : memref<96x128xf32, #tpu.memory_space<vmem>>, vector<96x2xf32>
    %cst_65 = arith.constant dense<0.000000e+00> : vector<96x2xf32>
    %182 = tpu.matmul %133, %175, %cst_65 {dimension_numbers = #tpu.dot_dimension_numbers<[1], [0], [0], [1], [0, 0, 1, 1], [], []>} : vector<96x32xf32>, vector<32x2xf32>, vector<96x2xf32> -> vector<96x2xf32>
    %183 = vector.broadcast %135 : vector<96x1xf32> to vector<96x2xf32>
    %184 = arith.addf %182, %183 : vector<96x2xf32>
    %185 = vector.extract_strided_slice %181 {offsets = [0, 0], sizes = [32, 2], strides = [1, 1]} : vector<96x2xf32> to vector<32x2xf32>
    %186 = vector.extract_strided_slice %184 {offsets = [0, 0], sizes = [32, 2], strides = [1, 1]} : vector<96x2xf32> to vector<32x2xf32>
    %187 = arith.addf %185, %186 : vector<32x2xf32>
    %188 = arith.negf %187 : vector<32x2xf32>
    %189 = math.exp %188 : vector<32x2xf32>
    %cst_66 = arith.constant 1.000000e+00 : f32
    %190 = vector.broadcast %cst_66 : f32 to vector<32x2xf32>
    %191 = arith.addf %190, %189 : vector<32x2xf32>
    %192 = arith.divf %190, %191 : vector<32x2xf32>
    %193 = vector.extract_strided_slice %181 {offsets = [32, 0], sizes = [32, 2], strides = [1, 1]} : vector<96x2xf32> to vector<32x2xf32>
    %194 = vector.extract_strided_slice %184 {offsets = [32, 0], sizes = [32, 2], strides = [1, 1]} : vector<96x2xf32> to vector<32x2xf32>
    %195 = arith.addf %193, %194 : vector<32x2xf32>
    %196 = arith.negf %195 : vector<32x2xf32>
    %197 = math.exp %196 : vector<32x2xf32>
    %cst_67 = arith.constant 1.000000e+00 : f32
    %198 = vector.broadcast %cst_67 : f32 to vector<32x2xf32>
    %199 = arith.addf %198, %197 : vector<32x2xf32>
    %200 = arith.divf %198, %199 : vector<32x2xf32>
    %201 = vector.extract_strided_slice %181 {offsets = [64, 0], sizes = [32, 2], strides = [1, 1]} : vector<96x2xf32> to vector<32x2xf32>
    %202 = vector.extract_strided_slice %184 {offsets = [64, 0], sizes = [32, 2], strides = [1, 1]} : vector<96x2xf32> to vector<32x2xf32>
    %203 = arith.mulf %192, %202 : vector<32x2xf32>
    %204 = arith.addf %201, %203 : vector<32x2xf32>
    %205 = math.tanh %204 : vector<32x2xf32>
    %cst_68 = arith.constant 1.000000e+00 : f32
    %206 = vector.broadcast %cst_68 : f32 to vector<32x2xf32>
    %207 = arith.subf %206, %200 : vector<32x2xf32>
    %208 = arith.mulf %207, %205 : vector<32x2xf32>
    %209 = arith.mulf %200, %175 : vector<32x2xf32>
    %210 = arith.addf %208, %209 : vector<32x2xf32>
    %c0_69 = arith.constant 0 : index
    %211 = arith.index_cast %179 : i32 to index
    %212 = vector.load %arg5[%c0_69, %211] : memref<32x128xf32, #tpu.memory_space<vmem>>, vector<32x2xf32>
    tpu.vector_store %arg5[%c0_69, %211], %210 {strides = array<i32>} : memref<32x128xf32, #tpu.memory_space<vmem>>, vector<32x2xf32>,
    %c2_i32_70 = arith.constant 2 : i32
    %c2_i32_71 = arith.constant 2 : i32
    %213 = arith.muli %c2_i32_70, %c2_i32_71 : i32
    %c4_i32_72 = arith.constant 4 : i32
    %214 = arith.addi %c4_i32_72, %213 : i32
    %c0_73 = arith.constant 0 : index
    %215 = arith.index_cast %214 : i32 to index
    %216 = vector.load %arg4[%c0_73, %215] : memref<96x128xf32, #tpu.memory_space<vmem>>, vector<96x2xf32>
    %cst_74 = arith.constant dense<0.000000e+00> : vector<96x2xf32>
    %217 = tpu.matmul %133, %210, %cst_74 {dimension_numbers = #tpu.dot_dimension_numbers<[1], [0], [0], [1], [0, 0, 1, 1], [], []>} : vector<96x32xf32>, vector<32x2xf32>, vector<96x2xf32> -> vector<96x2xf32>
    %218 = vector.broadcast %135 : vector<96x1xf32> to vector<96x2xf32>
    %219 = arith.addf %217, %218 : vector<96x2xf32>
    %220 = vector.extract_strided_slice %216 {offsets = [0, 0], sizes = [32, 2], strides = [1, 1]} : vector<96x2xf32> to vector<32x2xf32>
    %221 = vector.extract_strided_slice %219 {offsets = [0, 0], sizes = [32, 2], strides = [1, 1]} : vector<96x2xf32> to vector<32x2xf32>
    %222 = arith.addf %220, %221 : vector<32x2xf32>
    %223 = arith.negf %222 : vector<32x2xf32>
    %224 = math.exp %223 : vector<32x2xf32>
    %cst_75 = arith.constant 1.000000e+00 : f32
    %225 = vector.broadcast %cst_75 : f32 to vector<32x2xf32>
    %226 = arith.addf %225, %224 : vector<32x2xf32>
    %227 = arith.divf %225, %226 : vector<32x2xf32>
    %228 = vector.extract_strided_slice %216 {offsets = [32, 0], sizes = [32, 2], strides = [1, 1]} : vector<96x2xf32> to vector<32x2xf32>
    %229 = vector.extract_strided_slice %219 {offsets = [32, 0], sizes = [32, 2], strides = [1, 1]} : vector<96x2xf32> to vector<32x2xf32>
    %230 = arith.addf %228, %229 : vector<32x2xf32>
    %231 = arith.negf %230 : vector<32x2xf32>
    %232 = math.exp %231 : vector<32x2xf32>
    %cst_76 = arith.constant 1.000000e+00 : f32
    %233 = vector.broadcast %cst_76 : f32 to vector<32x2xf32>
    %234 = arith.addf %233, %232 : vector<32x2xf32>
    %235 = arith.divf %233, %234 : vector<32x2xf32>
    %236 = vector.extract_strided_slice %216 {offsets = [64, 0], sizes = [32, 2], strides = [1, 1]} : vector<96x2xf32> to vector<32x2xf32>
    %237 = vector.extract_strided_slice %219 {offsets = [64, 0], sizes = [32, 2], strides = [1, 1]} : vector<96x2xf32> to vector<32x2xf32>
    %238 = arith.mulf %227, %237 : vector<32x2xf32>
    %239 = arith.addf %236, %238 : vector<32x2xf32>
    %240 = math.tanh %239 : vector<32x2xf32>
    %cst_77 = arith.constant 1.000000e+00 : f32
    %241 = vector.broadcast %cst_77 : f32 to vector<32x2xf32>
    %242 = arith.subf %241, %235 : vector<32x2xf32>
    %243 = arith.mulf %242, %240 : vector<32x2xf32>
    %244 = arith.mulf %235, %210 : vector<32x2xf32>
    %245 = arith.addf %243, %244 : vector<32x2xf32>
    %c0_78 = arith.constant 0 : index
    %246 = arith.index_cast %214 : i32 to index
    %247 = vector.load %arg5[%c0_78, %246] : memref<32x128xf32, #tpu.memory_space<vmem>>, vector<32x2xf32>
    tpu.vector_store %arg5[%c0_78, %246], %245 {strides = array<i32>} : memref<32x128xf32, #tpu.memory_space<vmem>>, vector<32x2xf32>,
    %c3_i32 = arith.constant 3 : i32
    %c2_i32_79 = arith.constant 2 : i32
    %248 = arith.muli %c3_i32, %c2_i32_79 : i32
    %c4_i32_80 = arith.constant 4 : i32
    %249 = arith.addi %c4_i32_80, %248 : i32
    %c0_81 = arith.constant 0 : index
    %250 = arith.index_cast %249 : i32 to index
    %251 = vector.load %arg4[%c0_81, %250] : memref<96x128xf32, #tpu.memory_space<vmem>>, vector<96x2xf32>
    %cst_82 = arith.constant dense<0.000000e+00> : vector<96x2xf32>
    %252 = tpu.matmul %133, %245, %cst_82 {dimension_numbers = #tpu.dot_dimension_numbers<[1], [0], [0], [1], [0, 0, 1, 1], [], []>} : vector<96x32xf32>, vector<32x2xf32>, vector<96x2xf32> -> vector<96x2xf32>
    %253 = vector.broadcast %135 : vector<96x1xf32> to vector<96x2xf32>
    %254 = arith.addf %252, %253 : vector<96x2xf32>
    %255 = vector.extract_strided_slice %251 {offsets = [0, 0], sizes = [32, 2], strides = [1, 1]} : vector<96x2xf32> to vector<32x2xf32>
    %256 = vector.extract_strided_slice %254 {offsets = [0, 0], sizes = [32, 2], strides = [1, 1]} : vector<96x2xf32> to vector<32x2xf32>
    %257 = arith.addf %255, %256 : vector<32x2xf32>
    %258 = arith.negf %257 : vector<32x2xf32>
    %259 = math.exp %258 : vector<32x2xf32>
    %cst_83 = arith.constant 1.000000e+00 : f32
    %260 = vector.broadcast %cst_83 : f32 to vector<32x2xf32>
    %261 = arith.addf %260, %259 : vector<32x2xf32>
    %262 = arith.divf %260, %261 : vector<32x2xf32>
    %263 = vector.extract_strided_slice %251 {offsets = [32, 0], sizes = [32, 2], strides = [1, 1]} : vector<96x2xf32> to vector<32x2xf32>
    %264 = vector.extract_strided_slice %254 {offsets = [32, 0], sizes = [32, 2], strides = [1, 1]} : vector<96x2xf32> to vector<32x2xf32>
    %265 = arith.addf %263, %264 : vector<32x2xf32>
    %266 = arith.negf %265 : vector<32x2xf32>
    %267 = math.exp %266 : vector<32x2xf32>
    %cst_84 = arith.constant 1.000000e+00 : f32
    %268 = vector.broadcast %cst_84 : f32 to vector<32x2xf32>
    %269 = arith.addf %268, %267 : vector<32x2xf32>
    %270 = arith.divf %268, %269 : vector<32x2xf32>
    %271 = vector.extract_strided_slice %251 {offsets = [64, 0], sizes = [32, 2], strides = [1, 1]} : vector<96x2xf32> to vector<32x2xf32>
    %272 = vector.extract_strided_slice %254 {offsets = [64, 0], sizes = [32, 2], strides = [1, 1]} : vector<96x2xf32> to vector<32x2xf32>
    %273 = arith.mulf %262, %272 : vector<32x2xf32>
    %274 = arith.addf %271, %273 : vector<32x2xf32>
    %275 = math.tanh %274 : vector<32x2xf32>
    %cst_85 = arith.constant 1.000000e+00 : f32
    %276 = vector.broadcast %cst_85 : f32 to vector<32x2xf32>
    %277 = arith.subf %276, %270 : vector<32x2xf32>
    %278 = arith.mulf %277, %275 : vector<32x2xf32>
    %279 = arith.mulf %270, %245 : vector<32x2xf32>
    %280 = arith.addf %278, %279 : vector<32x2xf32>
    %c0_86 = arith.constant 0 : index
    %281 = arith.index_cast %249 : i32 to index
    %282 = vector.load %arg5[%c0_86, %281] : memref<32x128xf32, #tpu.memory_space<vmem>>, vector<32x2xf32>
    tpu.vector_store %arg5[%c0_86, %281], %280 {strides = array<i32>} : memref<32x128xf32, #tpu.memory_space<vmem>>, vector<32x2xf32>,
    %c4_i32_87 = arith.constant 4 : i32
    %c2_i32_88 = arith.constant 2 : i32
    %283 = arith.muli %c4_i32_87, %c2_i32_88 : i32
    %c4_i32_89 = arith.constant 4 : i32
    %284 = arith.addi %c4_i32_89, %283 : i32
    %c0_90 = arith.constant 0 : index
    %285 = arith.index_cast %284 : i32 to index
    %286 = vector.load %arg4[%c0_90, %285] : memref<96x128xf32, #tpu.memory_space<vmem>>, vector<96x2xf32>
    %cst_91 = arith.constant dense<0.000000e+00> : vector<96x2xf32>
    %287 = tpu.matmul %133, %280, %cst_91 {dimension_numbers = #tpu.dot_dimension_numbers<[1], [0], [0], [1], [0, 0, 1, 1], [], []>} : vector<96x32xf32>, vector<32x2xf32>, vector<96x2xf32> -> vector<96x2xf32>
    %288 = vector.broadcast %135 : vector<96x1xf32> to vector<96x2xf32>
    %289 = arith.addf %287, %288 : vector<96x2xf32>
    %290 = vector.extract_strided_slice %286 {offsets = [0, 0], sizes = [32, 2], strides = [1, 1]} : vector<96x2xf32> to vector<32x2xf32>
    %291 = vector.extract_strided_slice %289 {offsets = [0, 0], sizes = [32, 2], strides = [1, 1]} : vector<96x2xf32> to vector<32x2xf32>
    %292 = arith.addf %290, %291 : vector<32x2xf32>
    %293 = arith.negf %292 : vector<32x2xf32>
    %294 = math.exp %293 : vector<32x2xf32>
    %cst_92 = arith.constant 1.000000e+00 : f32
    %295 = vector.broadcast %cst_92 : f32 to vector<32x2xf32>
    %296 = arith.addf %295, %294 : vector<32x2xf32>
    %297 = arith.divf %295, %296 : vector<32x2xf32>
    %298 = vector.extract_strided_slice %286 {offsets = [32, 0], sizes = [32, 2], strides = [1, 1]} : vector<96x2xf32> to vector<32x2xf32>
    %299 = vector.extract_strided_slice %289 {offsets = [32, 0], sizes = [32, 2], strides = [1, 1]} : vector<96x2xf32> to vector<32x2xf32>
    %300 = arith.addf %298, %299 : vector<32x2xf32>
    %301 = arith.negf %300 : vector<32x2xf32>
    %302 = math.exp %301 : vector<32x2xf32>
    %cst_93 = arith.constant 1.000000e+00 : f32
    %303 = vector.broadcast %cst_93 : f32 to vector<32x2xf32>
    %304 = arith.addf %303, %302 : vector<32x2xf32>
    %305 = arith.divf %303, %304 : vector<32x2xf32>
    %306 = vector.extract_strided_slice %286 {offsets = [64, 0], sizes = [32, 2], strides = [1, 1]} : vector<96x2xf32> to vector<32x2xf32>
    %307 = vector.extract_strided_slice %289 {offsets = [64, 0], sizes = [32, 2], strides = [1, 1]} : vector<96x2xf32> to vector<32x2xf32>
    %308 = arith.mulf %297, %307 : vector<32x2xf32>
    %309 = arith.addf %306, %308 : vector<32x2xf32>
    %310 = math.tanh %309 : vector<32x2xf32>
    %cst_94 = arith.constant 1.000000e+00 : f32
    %311 = vector.broadcast %cst_94 : f32 to vector<32x2xf32>
    %312 = arith.subf %311, %305 : vector<32x2xf32>
    %313 = arith.mulf %312, %310 : vector<32x2xf32>
    %314 = arith.mulf %305, %280 : vector<32x2xf32>
    %315 = arith.addf %313, %314 : vector<32x2xf32>
    %c0_95 = arith.constant 0 : index
    %316 = arith.index_cast %284 : i32 to index
    %317 = vector.load %arg5[%c0_95, %316] : memref<32x128xf32, #tpu.memory_space<vmem>>, vector<32x2xf32>
    tpu.vector_store %arg5[%c0_95, %316], %315 {strides = array<i32>} : memref<32x128xf32, #tpu.memory_space<vmem>>, vector<32x2xf32>,
    %c5_i32 = arith.constant 5 : i32
    %c2_i32_96 = arith.constant 2 : i32
    %318 = arith.muli %c5_i32, %c2_i32_96 : i32
    %c4_i32_97 = arith.constant 4 : i32
    %319 = arith.addi %c4_i32_97, %318 : i32
    %c0_98 = arith.constant 0 : index
    %320 = arith.index_cast %319 : i32 to index
    %321 = vector.load %arg4[%c0_98, %320] : memref<96x128xf32, #tpu.memory_space<vmem>>, vector<96x2xf32>
    %cst_99 = arith.constant dense<0.000000e+00> : vector<96x2xf32>
    %322 = tpu.matmul %133, %315, %cst_99 {dimension_numbers = #tpu.dot_dimension_numbers<[1], [0], [0], [1], [0, 0, 1, 1], [], []>} : vector<96x32xf32>, vector<32x2xf32>, vector<96x2xf32> -> vector<96x2xf32>
    %323 = vector.broadcast %135 : vector<96x1xf32> to vector<96x2xf32>
    %324 = arith.addf %322, %323 : vector<96x2xf32>
    %325 = vector.extract_strided_slice %321 {offsets = [0, 0], sizes = [32, 2], strides = [1, 1]} : vector<96x2xf32> to vector<32x2xf32>
    %326 = vector.extract_strided_slice %324 {offsets = [0, 0], sizes = [32, 2], strides = [1, 1]} : vector<96x2xf32> to vector<32x2xf32>
    %327 = arith.addf %325, %326 : vector<32x2xf32>
    %328 = arith.negf %327 : vector<32x2xf32>
    %329 = math.exp %328 : vector<32x2xf32>
    %cst_100 = arith.constant 1.000000e+00 : f32
    %330 = vector.broadcast %cst_100 : f32 to vector<32x2xf32>
    %331 = arith.addf %330, %329 : vector<32x2xf32>
    %332 = arith.divf %330, %331 : vector<32x2xf32>
    %333 = vector.extract_strided_slice %321 {offsets = [32, 0], sizes = [32, 2], strides = [1, 1]} : vector<96x2xf32> to vector<32x2xf32>
    %334 = vector.extract_strided_slice %324 {offsets = [32, 0], sizes = [32, 2], strides = [1, 1]} : vector<96x2xf32> to vector<32x2xf32>
    %335 = arith.addf %333, %334 : vector<32x2xf32>
    %336 = arith.negf %335 : vector<32x2xf32>
    %337 = math.exp %336 : vector<32x2xf32>
    %cst_101 = arith.constant 1.000000e+00 : f32
    %338 = vector.broadcast %cst_101 : f32 to vector<32x2xf32>
    %339 = arith.addf %338, %337 : vector<32x2xf32>
    %340 = arith.divf %338, %339 : vector<32x2xf32>
    %341 = vector.extract_strided_slice %321 {offsets = [64, 0], sizes = [32, 2], strides = [1, 1]} : vector<96x2xf32> to vector<32x2xf32>
    %342 = vector.extract_strided_slice %324 {offsets = [64, 0], sizes = [32, 2], strides = [1, 1]} : vector<96x2xf32> to vector<32x2xf32>
    %343 = arith.mulf %332, %342 : vector<32x2xf32>
    %344 = arith.addf %341, %343 : vector<32x2xf32>
    %345 = math.tanh %344 : vector<32x2xf32>
    %cst_102 = arith.constant 1.000000e+00 : f32
    %346 = vector.broadcast %cst_102 : f32 to vector<32x2xf32>
    %347 = arith.subf %346, %340 : vector<32x2xf32>
    %348 = arith.mulf %347, %345 : vector<32x2xf32>
    %349 = arith.mulf %340, %315 : vector<32x2xf32>
    %350 = arith.addf %348, %349 : vector<32x2xf32>
    %c0_103 = arith.constant 0 : index
    %351 = arith.index_cast %319 : i32 to index
    %352 = vector.load %arg5[%c0_103, %351] : memref<32x128xf32, #tpu.memory_space<vmem>>, vector<32x2xf32>
    tpu.vector_store %arg5[%c0_103, %351], %350 {strides = array<i32>} : memref<32x128xf32, #tpu.memory_space<vmem>>, vector<32x2xf32>,
    %c6_i32 = arith.constant 6 : i32
    %c2_i32_104 = arith.constant 2 : i32
    %353 = arith.muli %c6_i32, %c2_i32_104 : i32
    %c4_i32_105 = arith.constant 4 : i32
    %354 = arith.addi %c4_i32_105, %353 : i32
    %c0_106 = arith.constant 0 : index
    %355 = arith.index_cast %354 : i32 to index
    %356 = vector.load %arg4[%c0_106, %355] : memref<96x128xf32, #tpu.memory_space<vmem>>, vector<96x2xf32>
    %cst_107 = arith.constant dense<0.000000e+00> : vector<96x2xf32>
    %357 = tpu.matmul %133, %350, %cst_107 {dimension_numbers = #tpu.dot_dimension_numbers<[1], [0], [0], [1], [0, 0, 1, 1], [], []>} : vector<96x32xf32>, vector<32x2xf32>, vector<96x2xf32> -> vector<96x2xf32>
    %358 = vector.broadcast %135 : vector<96x1xf32> to vector<96x2xf32>
    %359 = arith.addf %357, %358 : vector<96x2xf32>
    %360 = vector.extract_strided_slice %356 {offsets = [0, 0], sizes = [32, 2], strides = [1, 1]} : vector<96x2xf32> to vector<32x2xf32>
    %361 = vector.extract_strided_slice %359 {offsets = [0, 0], sizes = [32, 2], strides = [1, 1]} : vector<96x2xf32> to vector<32x2xf32>
    %362 = arith.addf %360, %361 : vector<32x2xf32>
    %363 = arith.negf %362 : vector<32x2xf32>
    %364 = math.exp %363 : vector<32x2xf32>
    %cst_108 = arith.constant 1.000000e+00 : f32
    %365 = vector.broadcast %cst_108 : f32 to vector<32x2xf32>
    %366 = arith.addf %365, %364 : vector<32x2xf32>
    %367 = arith.divf %365, %366 : vector<32x2xf32>
    %368 = vector.extract_strided_slice %356 {offsets = [32, 0], sizes = [32, 2], strides = [1, 1]} : vector<96x2xf32> to vector<32x2xf32>
    %369 = vector.extract_strided_slice %359 {offsets = [32, 0], sizes = [32, 2], strides = [1, 1]} : vector<96x2xf32> to vector<32x2xf32>
    %370 = arith.addf %368, %369 : vector<32x2xf32>
    %371 = arith.negf %370 : vector<32x2xf32>
    %372 = math.exp %371 : vector<32x2xf32>
    %cst_109 = arith.constant 1.000000e+00 : f32
    %373 = vector.broadcast %cst_109 : f32 to vector<32x2xf32>
    %374 = arith.addf %373, %372 : vector<32x2xf32>
    %375 = arith.divf %373, %374 : vector<32x2xf32>
    %376 = vector.extract_strided_slice %356 {offsets = [64, 0], sizes = [32, 2], strides = [1, 1]} : vector<96x2xf32> to vector<32x2xf32>
    %377 = vector.extract_strided_slice %359 {offsets = [64, 0], sizes = [32, 2], strides = [1, 1]} : vector<96x2xf32> to vector<32x2xf32>
    %378 = arith.mulf %367, %377 : vector<32x2xf32>
    %379 = arith.addf %376, %378 : vector<32x2xf32>
    %380 = math.tanh %379 : vector<32x2xf32>
    %cst_110 = arith.constant 1.000000e+00 : f32
    %381 = vector.broadcast %cst_110 : f32 to vector<32x2xf32>
    %382 = arith.subf %381, %375 : vector<32x2xf32>
    %383 = arith.mulf %382, %380 : vector<32x2xf32>
    %384 = arith.mulf %375, %350 : vector<32x2xf32>
    %385 = arith.addf %383, %384 : vector<32x2xf32>
    %c0_111 = arith.constant 0 : index
    %386 = arith.index_cast %354 : i32 to index
    %387 = vector.load %arg5[%c0_111, %386] : memref<32x128xf32, #tpu.memory_space<vmem>>, vector<32x2xf32>
    tpu.vector_store %arg5[%c0_111, %386], %385 {strides = array<i32>} : memref<32x128xf32, #tpu.memory_space<vmem>>, vector<32x2xf32>,
    %c7_i32 = arith.constant 7 : i32
    %c2_i32_112 = arith.constant 2 : i32
    %388 = arith.muli %c7_i32, %c2_i32_112 : i32
    %c4_i32_113 = arith.constant 4 : i32
    %389 = arith.addi %c4_i32_113, %388 : i32
    %c0_114 = arith.constant 0 : index
    %390 = arith.index_cast %389 : i32 to index
    %391 = vector.load %arg4[%c0_114, %390] : memref<96x128xf32, #tpu.memory_space<vmem>>, vector<96x2xf32>
    %cst_115 = arith.constant dense<0.000000e+00> : vector<96x2xf32>
    %392 = tpu.matmul %133, %385, %cst_115 {dimension_numbers = #tpu.dot_dimension_numbers<[1], [0], [0], [1], [0, 0, 1, 1], [], []>} : vector<96x32xf32>, vector<32x2xf32>, vector<96x2xf32> -> vector<96x2xf32>
    %393 = vector.broadcast %135 : vector<96x1xf32> to vector<96x2xf32>
    %394 = arith.addf %392, %393 : vector<96x2xf32>
    %395 = vector.extract_strided_slice %391 {offsets = [0, 0], sizes = [32, 2], strides = [1, 1]} : vector<96x2xf32> to vector<32x2xf32>
    %396 = vector.extract_strided_slice %394 {offsets = [0, 0], sizes = [32, 2], strides = [1, 1]} : vector<96x2xf32> to vector<32x2xf32>
    %397 = arith.addf %395, %396 : vector<32x2xf32>
    %398 = arith.negf %397 : vector<32x2xf32>
    %399 = math.exp %398 : vector<32x2xf32>
    %cst_116 = arith.constant 1.000000e+00 : f32
    %400 = vector.broadcast %cst_116 : f32 to vector<32x2xf32>
    %401 = arith.addf %400, %399 : vector<32x2xf32>
    %402 = arith.divf %400, %401 : vector<32x2xf32>
    %403 = vector.extract_strided_slice %391 {offsets = [32, 0], sizes = [32, 2], strides = [1, 1]} : vector<96x2xf32> to vector<32x2xf32>
    %404 = vector.extract_strided_slice %394 {offsets = [32, 0], sizes = [32, 2], strides = [1, 1]} : vector<96x2xf32> to vector<32x2xf32>
    %405 = arith.addf %403, %404 : vector<32x2xf32>
    %406 = arith.negf %405 : vector<32x2xf32>
    %407 = math.exp %406 : vector<32x2xf32>
    %cst_117 = arith.constant 1.000000e+00 : f32
    %408 = vector.broadcast %cst_117 : f32 to vector<32x2xf32>
    %409 = arith.addf %408, %407 : vector<32x2xf32>
    %410 = arith.divf %408, %409 : vector<32x2xf32>
    %411 = vector.extract_strided_slice %391 {offsets = [64, 0], sizes = [32, 2], strides = [1, 1]} : vector<96x2xf32> to vector<32x2xf32>
    %412 = vector.extract_strided_slice %394 {offsets = [64, 0], sizes = [32, 2], strides = [1, 1]} : vector<96x2xf32> to vector<32x2xf32>
    %413 = arith.mulf %402, %412 : vector<32x2xf32>
    %414 = arith.addf %411, %413 : vector<32x2xf32>
    %415 = math.tanh %414 : vector<32x2xf32>
    %cst_118 = arith.constant 1.000000e+00 : f32
    %416 = vector.broadcast %cst_118 : f32 to vector<32x2xf32>
    %417 = arith.subf %416, %410 : vector<32x2xf32>
    %418 = arith.mulf %417, %415 : vector<32x2xf32>
    %419 = arith.mulf %410, %385 : vector<32x2xf32>
    %420 = arith.addf %418, %419 : vector<32x2xf32>
    %c0_119 = arith.constant 0 : index
    %421 = arith.index_cast %389 : i32 to index
    %422 = vector.load %arg5[%c0_119, %421] : memref<32x128xf32, #tpu.memory_space<vmem>>, vector<32x2xf32>
    tpu.vector_store %arg5[%c0_119, %421], %420 {strides = array<i32>} : memref<32x128xf32, #tpu.memory_space<vmem>>, vector<32x2xf32>,
    %c8_i32 = arith.constant 8 : i32
    %c0_120 = arith.constant 0 : index
    %c0_121 = arith.constant 0 : index
    %423 = vector.load %arg5[%c0_120, %c0_121] : memref<32x128xf32, #tpu.memory_space<vmem>>, vector<32x128xf32>
    %c864 = arith.constant 864 : index
    %c0_122 = arith.constant 0 : index
    %424 = vector.load %arg1[%c864, %c0_122] : memref<960x128xf32, #tpu.memory_space<vmem>>, vector<32x32xf32>
    %c896 = arith.constant 896 : index
    %c0_123 = arith.constant 0 : index
    %425 = vector.load %arg1[%c896, %c0_123] : memref<960x128xf32, #tpu.memory_space<vmem>>, vector<16x32xf32>
    %c416 = arith.constant 416 : index
    %c0_124 = arith.constant 0 : index
    %426 = vector.load %arg2[%c416, %c0_124] : memref<512x1xf32, #tpu.memory_space<vmem>>, vector<32x1xf32>
    %c448_125 = arith.constant 448 : index
    %c0_126 = arith.constant 0 : index
    %427 = vector.load %arg2[%c448_125, %c0_126] : memref<512x1xf32, #tpu.memory_space<vmem>>, vector<16x1xf32>
    %cst_127 = arith.constant dense<0.000000e+00> : vector<32x128xf32>
    %428 = tpu.matmul %424, %423, %cst_127 {dimension_numbers = #tpu.dot_dimension_numbers<[1], [0], [0], [1], [0, 0, 1, 1], [], []>} : vector<32x32xf32>, vector<32x128xf32>, vector<32x128xf32> -> vector<32x128xf32>
    %429 = vector.broadcast %426 : vector<32x1xf32> to vector<32x128xf32>
    %430 = arith.addf %428, %429 : vector<32x128xf32>
    %cst_128 = arith.constant 0.000000e+00 : f32
    %431 = vector.broadcast %cst_128 : f32 to vector<32x128xf32>
    %432 = arith.cmpf ogt, %430, %431 : vector<32x128xf32>
    %cst_129 = arith.constant 0.000000e+00 : f32
    %433 = vector.broadcast %cst_129 : f32 to vector<32x128xf32>
    %434 = arith.minimumf %430, %433 : vector<32x128xf32>
    %435 = math.exp %434 : vector<32x128xf32>
    %cst_130 = arith.constant 1.000000e+00 : f32
    %436 = vector.broadcast %cst_130 : f32 to vector<32x128xf32>
    %437 = arith.subf %435, %436 : vector<32x128xf32>
    %438 = arith.select %432, %430, %437 : vector<32x128xi1>, vector<32x128xf32>
    %cst_131 = arith.constant dense<0.000000e+00> : vector<16x128xf32>
    %439 = tpu.matmul %425, %438, %cst_131 {dimension_numbers = #tpu.dot_dimension_numbers<[1], [0], [0], [1], [0, 0, 1, 1], [], []>} : vector<16x32xf32>, vector<32x128xf32>, vector<16x128xf32> -> vector<16x128xf32>
    %440 = vector.broadcast %427 : vector<16x1xf32> to vector<16x128xf32>
    %441 = arith.addf %439, %440 : vector<16x128xf32>
    %c0_132 = arith.constant 0 : index
    %c0_133 = arith.constant 0 : index
    %442 = vector.load %arg3[%c0_132, %c0_133] : memref<32x128xf32, #tpu.memory_space<vmem>>, vector<16x128xf32>
    tpu.vector_store %arg3[%c0_132, %c0_133], %441 {strides = array<i32>} : memref<32x128xf32, #tpu.memory_space<vmem>>, vector<16x128xf32>,
    %c912 = arith.constant 912 : index
    %c0_134 = arith.constant 0 : index
    %443 = vector.load %arg1[%c912, %c0_134] : memref<960x128xf32, #tpu.memory_space<vmem>>, vector<32x32xf32>
    %c944 = arith.constant 944 : index
    %c0_135 = arith.constant 0 : index
    %444 = vector.load %arg1[%c944, %c0_135] : memref<960x128xf32, #tpu.memory_space<vmem>>, vector<16x32xf32>
    %c464 = arith.constant 464 : index
    %c0_136 = arith.constant 0 : index
    %445 = vector.load %arg2[%c464, %c0_136] : memref<512x1xf32, #tpu.memory_space<vmem>>, vector<32x1xf32>
    %c496 = arith.constant 496 : index
    %c0_137 = arith.constant 0 : index
    %446 = vector.load %arg2[%c496, %c0_137] : memref<512x1xf32, #tpu.memory_space<vmem>>, vector<16x1xf32>
    %cst_138 = arith.constant dense<0.000000e+00> : vector<32x128xf32>
    %447 = tpu.matmul %443, %438, %cst_138 {dimension_numbers = #tpu.dot_dimension_numbers<[1], [0], [0], [1], [0, 0, 1, 1], [], []>} : vector<32x32xf32>, vector<32x128xf32>, vector<32x128xf32> -> vector<32x128xf32>
    %448 = vector.broadcast %445 : vector<32x1xf32> to vector<32x128xf32>
    %449 = arith.addf %447, %448 : vector<32x128xf32>
    %cst_139 = arith.constant 0.000000e+00 : f32
    %450 = vector.broadcast %cst_139 : f32 to vector<32x128xf32>
    %451 = arith.cmpf ogt, %449, %450 : vector<32x128xf32>
    %cst_140 = arith.constant 0.000000e+00 : f32
    %452 = vector.broadcast %cst_140 : f32 to vector<32x128xf32>
    %453 = arith.minimumf %449, %452 : vector<32x128xf32>
    %454 = math.exp %453 : vector<32x128xf32>
    %cst_141 = arith.constant 1.000000e+00 : f32
    %455 = vector.broadcast %cst_141 : f32 to vector<32x128xf32>
    %456 = arith.subf %454, %455 : vector<32x128xf32>
    %457 = arith.select %451, %449, %456 : vector<32x128xi1>, vector<32x128xf32>
    %cst_142 = arith.constant dense<0.000000e+00> : vector<16x128xf32>
    %458 = tpu.matmul %444, %457, %cst_142 {dimension_numbers = #tpu.dot_dimension_numbers<[1], [0], [0], [1], [0, 0, 1, 1], [], []>} : vector<16x32xf32>, vector<32x128xf32>, vector<16x128xf32> -> vector<16x128xf32>
    %459 = vector.broadcast %446 : vector<16x1xf32> to vector<16x128xf32>
    %460 = arith.addf %458, %459 : vector<16x128xf32>
    %c16 = arith.constant 16 : index
    %c0_143 = arith.constant 0 : index
    %461 = vector.load %arg3[%c16, %c0_143] : memref<32x128xf32, #tpu.memory_space<vmem>>, vector<16x128xf32>
    tpu.vector_store %arg3[%c16, %c0_143], %460 {strides = array<i32>} : memref<32x128xf32, #tpu.memory_space<vmem>>, vector<16x128xf32>,
    return
  }
}

</mosaic_0001>

<bundles_post_ra>
// kernel: mul.96
= control target key start
LH: loop header
LB: loop body
LE: loop exit
PB: predicated region body
PF: predicated region fallthrough
CT: control target
= control target key end

     0   :  { %s69_s10 = smov 112   ;;  %s70_s11 = smov 80   ;;  %vm3_vm0 = vcmask 130048   ;;  %vm9_vm1 = vcmask 1048448   ;;  %vm15_vm2 = vcmask 917248   ;;  %vm21_vm3 = vcmask 786048   ;;  %s113_s0 = inlined_call_operand.vmem [shape: f32[8,16], index: 0, kind: input, shape index: {}]   ;;  %s114_s1 = inlined_call_operand.vmem [shape: f32[128], index: 1, kind: output, shape index: {}]  }
   0x1   :  { %v55_v0 = vld [vmem:[%s113_s0 + $0x7] sm:$0x1]   ;;  %v57_v1 = vld [vmem:[%s113_s0 + $0x5] sm:$0x1]   ;;  %v56_v2 = vld [vmem:[%s113_s0 + $0x6] sm:$0x1]  }
   0x2   :  { %7 = vrot.lane.b32.xlu0 %v55_v0, %s69_s10  ;;  %19 = vrot.lane.b32.xlu1 %v57_v1, %s70_s11  ;;  %v58_v3 = vld [vmem:[%s113_s0 + $0x4] sm:$0x1]   ;;  %v2_v4 = vld [vmem:[%s113_s0] sm:$0x1]   ;;  %s71_s18 = smov 96   ;;  %s72_s19 = smov 64  }
   0x3   :  { %4 = vst.msk [vmem:[#allocation0] sm:$0x1] %vm3_vm0, %v2_v4   ;;  %v59_v5 = vld [vmem:[%s113_s0 + $0x3] sm:$0x1]   ;;  %v60_v6 = vld [vmem:[%s113_s0 + $0x2] sm:$0x1]  }
   0x4   :  { %s73_s24 = smov 48   ;;  %s74_s25 = smov 32   ;;  %v61_v7 = vld [vmem:[%s113_s0 + $0x1] sm:$0x1]   ;;  %vm27_vm4 = vcmask 654848   ;;  %vm33_vm5 = vcmask 523648  }
   0x5   :  { %s75_s0 = smov 16   ;;  %vm39_vm6 = vcmask 392448   ;;  %vm45_vm7 = vcmask 261248  }
   0x6   :  { %13 = vrot.lane.b32.xlu0 %v56_v2, %s71_s18  ;;  %25 = vrot.lane.b32.xlu1 %v58_v3, %s72_s19 }
   0xa   :  { %31 = vrot.lane.b32.xlu0 %v59_v5, %s73_s24  ;;  %37 = vrot.lane.b32.xlu1 %v60_v6, %s74_s25 }
   0xe   :  { %43 = vrot.lane.b32.xlu0 %v61_v7, %s75_s0 }
  0x74   :  { %v8_v8 = vpop.permute.xlu0 %7   ;;  %v20_v9 = vpop.permute.xlu1 %19  }
  0x75   :  { %10 = vst.msk [vmem:[#allocation0] sm:$0x1] %vm9_vm1, %v8_v8  }
  0x78   :  { %v14_v10 = vpop.permute.xlu0 %13   ;;  %v26_v11 = vpop.permute.xlu1 %25  }
  0x79   :  { %16 = vst.msk [vmem:[#allocation0] sm:$0x1] %vm15_vm2, %v14_v10  }
  0x7a   :  { %22 = vst.msk [vmem:[#allocation0] sm:$0x1] %vm21_vm3, %v20_v9  }
  0x7b   :  { %28 = vst.msk [vmem:[#allocation0] sm:$0x1] %vm27_vm4, %v26_v11  }
  0x7c   :  { %v32_v12 = vpop.permute.xlu0 %31   ;;  %v38_v13 = vpop.permute.xlu1 %37  }
  0x7d   :  { %34 = vst.msk [vmem:[#allocation0] sm:$0x1] %vm33_vm5, %v32_v12  }
  0x7e   :  { %40 = vst.msk [vmem:[#allocation0] sm:$0x1] %vm39_vm6, %v38_v13  }
  0x80   :  { %v44_v14 = vpop.permute.xlu0 %43  }
  0x81   :  { %46 = vst.msk [vmem:[#allocation0] sm:$0x1] %vm45_vm7, %v44_v14  }
  0x88   :  { %v51_v15 = vld [vmem:[#allocation0] sm:$0x1] }
  0x89   :  { %54 = vst [vmem:[%s114_s1] sm:$0x1] %v51_v15 }

// kernel: mul.108
= control target key start
LH: loop header
LB: loop body
LE: loop exit
PB: predicated region body
PF: predicated region fallthrough
CT: control target
= control target key end

     0   :  { %s69_s10 = smov 56   ;;  %s70_s11 = smov 40   ;;  %vm3_vm0 = vcmask 64512   ;;  %vm9_vm1 = vcmask 523712   ;;  %vm15_vm2 = vcmask 458112   ;;  %vm21_vm3 = vcmask 392512   ;;  %s113_s0 = inlined_call_operand.vmem [shape: f32[8,8], index: 0, kind: input, shape index: {}]   ;;  %s114_s1 = inlined_call_operand.vmem [shape: f32[64], index: 1, kind: output, shape index: {}]  }
   0x1   :  { %v55_v0 = vld [vmem:[%s113_s0 + $0x7] sm:$0x1]   ;;  %v57_v1 = vld [vmem:[%s113_s0 + $0x5] sm:$0x1]   ;;  %v56_v2 = vld [vmem:[%s113_s0 + $0x6] sm:$0x1]  }
   0x2   :  { %7 = vrot.lane.b32.xlu0 %v55_v0, %s69_s10  ;;  %19 = vrot.lane.b32.xlu1 %v57_v1, %s70_s11  ;;  %v58_v3 = vld [vmem:[%s113_s0 + $0x4] sm:$0x1]   ;;  %v2_v4 = vld [vmem:[%s113_s0] sm:$0x1]   ;;  %s71_s18 = smov 48   ;;  %s72_s19 = smov 32  }
   0x3   :  { %4 = vst.msk [vmem:[#allocation0] sm:$0x1] %vm3_vm0, %v2_v4   ;;  %v59_v5 = vld [vmem:[%s113_s0 + $0x3] sm:$0x1]   ;;  %v60_v6 = vld [vmem:[%s113_s0 + $0x2] sm:$0x1]  }
   0x4   :  { %s73_s24 = smov 24   ;;  %s74_s25 = smov 16   ;;  %v61_v7 = vld [vmem:[%s113_s0 + $0x1] sm:$0x1]   ;;  %vm27_vm4 = vcmask 326912   ;;  %vm33_vm5 = vcmask 261312  }
   0x5   :  { %s75_s0 = smov 8   ;;  %vm39_vm6 = vcmask 195712   ;;  %vm45_vm7 = vcmask 130112  }
   0x6   :  { %13 = vrot.lane.b32.xlu0 %v56_v2, %s71_s18  ;;  %25 = vrot.lane.b32.xlu1 %v58_v3, %s72_s19 }
   0xa   :  { %31 = vrot.lane.b32.xlu0 %v59_v5, %s73_s24  ;;  %37 = vrot.lane.b32.xlu1 %v60_v6, %s74_s25 }
   0xe   :  { %43 = vrot.lane.b32.xlu0 %v61_v7, %s75_s0 }
  0x74   :  { %v8_v8 = vpop.permute.xlu0 %7   ;;  %v20_v9 = vpop.permute.xlu1 %19  }
  0x75   :  { %10 = vst.msk [vmem:[#allocation0] sm:$0x1] %vm9_vm1, %v8_v8  }
  0x78   :  { %v14_v10 = vpop.permute.xlu0 %13   ;;  %v26_v11 = vpop.permute.xlu1 %25  }
  0x79   :  { %16 = vst.msk [vmem:[#allocation0] sm:$0x1] %vm15_vm2, %v14_v10  }
  0x7a   :  { %22 = vst.msk [vmem:[#allocation0] sm:$0x1] %vm21_vm3, %v20_v9  }
  0x7b   :  { %28 = vst.msk [vmem:[#allocation0] sm:$0x1] %vm27_vm4, %v26_v11  }
  0x7c   :  { %v32_v12 = vpop.permute.xlu0 %31   ;;  %v38_v13 = vpop.permute.xlu1 %37  }
  0x7d   :  { %34 = vst.msk [vmem:[#allocation0] sm:$0x1] %vm33_vm5, %v32_v12  }
  0x7e   :  { %40 = vst.msk [vmem:[#allocation0] sm:$0x1] %vm39_vm6, %v38_v13  }
  0x80   :  { %v44_v14 = vpop.permute.xlu0 %43  }
  0x81   :  { %46 = vst.msk [vmem:[#allocation0] sm:$0x1] %vm45_vm7, %v44_v14  }
  0x88   :  { %v51_v15 = vld [vmem:[#allocation0] sm:$0x1] }
  0x89   :  { %54 = vst [vmem:[%s114_s1] sm:$0x1] %v51_v15 }

// kernel: mul.120
= control target key start
LH: loop header
LB: loop body
LE: loop exit
PB: predicated region body
PF: predicated region fallthrough
CT: control target
= control target key end

     0   :  { %s69_s10 = smov 28   ;;  %s70_s11 = smov 20   ;;  %vm3_vm0 = vcmask 31744   ;;  %vm9_vm1 = vcmask 261344   ;;  %vm15_vm2 = vcmask 228544   ;;  %vm21_vm3 = vcmask 195744   ;;  %s113_s0 = inlined_call_operand.vmem [shape: f32[8,4], index: 0, kind: input, shape index: {}]   ;;  %s114_s1 = inlined_call_operand.vmem [shape: f32[32], index: 1, kind: output, shape index: {}]  }
   0x1   :  { %v55_v0 = vld [vmem:[%s113_s0 + $0x7] sm:$0x1]   ;;  %v57_v1 = vld [vmem:[%s113_s0 + $0x5] sm:$0x1]   ;;  %v56_v2 = vld [vmem:[%s113_s0 + $0x6] sm:$0x1]  }
   0x2   :  { %7 = vrot.lane.b32.xlu0 %v55_v0, %s69_s10  ;;  %19 = vrot.lane.b32.xlu1 %v57_v1, %s70_s11  ;;  %v58_v3 = vld [vmem:[%s113_s0 + $0x4] sm:$0x1]   ;;  %v2_v4 = vld [vmem:[%s113_s0] sm:$0x1]   ;;  %s71_s18 = smov 24   ;;  %s72_s19 = smov 16  }
   0x3   :  { %4 = vst.msk [vmem:[#allocation0] sm:$0x1] %vm3_vm0, %v2_v4   ;;  %v59_v5 = vld [vmem:[%s113_s0 + $0x3] sm:$0x1]   ;;  %v60_v6 = vld [vmem:[%s113_s0 + $0x2] sm:$0x1]  }
   0x4   :  { %s73_s24 = smov 12   ;;  %s74_s25 = smov 8   ;;  %v61_v7 = vld [vmem:[%s113_s0 + $0x1] sm:$0x1]   ;;  %vm27_vm4 = vcmask 162944   ;;  %vm33_vm5 = vcmask 130144  }
   0x5   :  { %s75_s0 = smov 4   ;;  %vm39_vm6 = vcmask 97344   ;;  %vm45_vm7 = vcmask 64544  }
   0x6   :  { %13 = vrot.lane.b32.xlu0 %v56_v2, %s71_s18  ;;  %25 = vrot.lane.b32.xlu1 %v58_v3, %s72_s19 }
   0xa   :  { %31 = vrot.lane.b32.xlu0 %v59_v5, %s73_s24  ;;  %37 = vrot.lane.b32.xlu1 %v60_v6, %s74_s25 }
   0xe   :  { %43 = vrot.lane.b32.xlu0 %v61_v7, %s75_s0 }
  0x74   :  { %v8_v8 = vpop.permute.xlu0 %7   ;;  %v20_v9 = vpop.permute.xlu1 %19  }
  0x75   :  { %10 = vst.msk [vmem:[#allocation0] sm:$0x1] %vm9_vm1, %v8_v8  }
  0x78   :  { %v14_v10 = vpop.permute.xlu0 %13   ;;  %v26_v11 = vpop.permute.xlu1 %25  }
  0x79   :  { %16 = vst.msk [vmem:[#allocation0] sm:$0x1] %vm15_vm2, %v14_v10  }
  0x7a   :  { %22 = vst.msk [vmem:[#allocation0] sm:$0x1] %vm21_vm3, %v20_v9  }
  0x7b   :  { %28 = vst.msk [vmem:[#allocation0] sm:$0x1] %vm27_vm4, %v26_v11  }
  0x7c   :  { %v32_v12 = vpop.permute.xlu0 %31   ;;  %v38_v13 = vpop.permute.xlu1 %37  }
  0x7d   :  { %34 = vst.msk [vmem:[#allocation0] sm:$0x1] %vm33_vm5, %v32_v12  }
  0x7e   :  { %40 = vst.msk [vmem:[#allocation0] sm:$0x1] %vm39_vm6, %v38_v13  }
  0x80   :  { %v44_v14 = vpop.permute.xlu0 %43  }
  0x81   :  { %46 = vst.msk [vmem:[#allocation0] sm:$0x1] %vm45_vm7, %v44_v14  }
  0x88   :  { %v51_v15 = vld [vmem:[#allocation0] sm:$0x1] }
  0x89   :  { %54 = vst [vmem:[%s114_s1] sm:$0x1] %v51_v15 }

// kernel: main_model_forward.1
= control target key start
LH: loop header
LB: loop body
LE: loop exit
PB: predicated region body
PF: predicated region fallthrough
CT: control target
= control target key end

     0   :  { %vm183_vm0 = vcmask 785408   ;;  %s6853_s21 = smov 4   ;;  %s6857_s26 = smov 6   ;;  %s8824_s0 = inlined_call_operand.vmem [shape: f32[128,128], index: 0, kind: input, shape index: {}]   ;;  %s8825_s1 = inlined_call_operand.vmem [shape: f32[960,128], index: 1, kind: input, shape index: {}]   ;;  %s8826_s2 = inlined_call_operand.vmem [shape: f32[512,1], index: 2, kind: input, shape index: {}]   ;;  %s8827_s3 = inlined_call_operand.vmem [shape: f32[32,128], index: 3, kind: output, shape index: {}]  }
   0x1   :  { %v20_v0 = vld [vmem:[%s8824_s0 + $0x8] sm:$0xff]  ;;  %v19_v4 = vld [vmem:[%s8824_s0] sm:$0xff]  ;;  %v26_v14 = vld [vmem:[%s8824_s0 + $0x38] sm:$0xff]  ;;  %s6858_s27 = smov 122   ;;  %s6859_s7 = smov 8  }
   0x2   :  { %v28_v1 = vld [vmem:[%s8824_s0 + $0x48] sm:$0xff]  ;;  %v6896_v2 = vmax.f32 %v20_v0, 1.1920929e-07  ;;  %v27_v5 = vld [vmem:[%s8824_s0 + $0x40] sm:$0xff]  ;;  %v6910_v8 = vmax.f32 %v19_v4, 1.1920929e-07  ;;  %v34_v15 = vld [vmem:[%s8824_s0 + $0x78] sm:$0xff]  ;;  %s6860_s8 = smov 120  }
   0x3   :  { %v6898_v3 = vmax.f32 %v28_v1, 1.1920929e-07  ;;  %v6912_v9 = vmax.f32 %v27_v5, 1.1920929e-07  ;;  %v24_v16 = vld [vmem:[%s8824_s0 + $0x28] sm:$0xff]  ;;  %v25_v18 = vld [vmem:[%s8824_s0 + $0x30] sm:$0xff]  ;;  %v23_v24 = vld [vmem:[%s8824_s0 + $0x20] sm:$0xff]  ;;  %s6862_s28 = smov 118  }
   0x4   :  { %v40_v6 = vmul.f32 %v6896_v2, %v6896_v2  ;;  %v39_v11 = vmul.f32 %v6910_v8, %v6910_v8  ;;  %v32_v17 = vld [vmem:[%s8824_s0 + $0x68] sm:$0xff]  ;;  %v88_v19 = vmul.f32 %v6896_v2, %v34_v15  ;;  %v33_v23 = vld [vmem:[%s8824_s0 + $0x70] sm:$0xff]  ;;  %v31_v25 = vld [vmem:[%s8824_s0 + $0x60] sm:$0xff]  ;;  %v80_v45 = vmul.f32 %v6896_v2, %v26_v14  ;;  %s6863_s29 = smov 12   ;;  %s6864_s30 = smov 116  }
   0x5   :  { %v42_v7 = vmul.f32 %v6898_v3, %v6898_v3  ;;  %v41_v12 = vmul.f32 %v6912_v9, %v6912_v9  ;;  %v90_v20 = vmul.f32 %v6898_v3, %v26_v14  ;;  %v72_v21 = vmul.f32 %v6896_v2, %v32_v17  ;;  %v22_v26 = vld [vmem:[%s8824_s0 + $0x18] sm:$0xff]  ;;  %v21_v32 = vld [vmem:[%s8824_s0 + $0x10] sm:$0xff]  ;;  %v128_v14 = vld [vmem:[%s8825_s1 + $0x108] sm:$0xff]  ;;  %s6865_s10 = smov 14   ;;  %s6866_s11 = smov 114  }
   0x6   :  { %v74_v22 = vmul.f32 %v6898_v3, %v24_v16  ;;  %v87_v27 = vmul.f32 %v6910_v8, %v33_v23  ;;  %v89_v28 = vmul.f32 %v6912_v9, %v25_v18  ;;  %v71_v29 = vmul.f32 %v6910_v8, %v31_v25  ;;  %v30_v31 = vld [vmem:[%s8824_s0 + $0x58] sm:$0xff]  ;;  %v29_v33 = vld [vmem:[%s8824_s0 + $0x50] sm:$0xff]  ;;  %s6852_s0 = smov 2   ;;  %s6868_s4 = smov 112  }
   0x7   :  { %v44_v10 = vadd.f32 %v42_v7, %v40_v6  ;;  %v43_v13 = vadd.f32 %v41_v12, %v39_v11  ;;  %v73_v30 = vmul.f32 %v6912_v9, %v23_v24  ;;  %v92_v34 = vsub.f32 %v88_v19, %v90_v20  ;;  %v133_v19 = vld [vmem:[%s8825_s1 + $0x130] sm:$0xff]  ;;  %v134_v20 = vld [vmem:[%s8825_s1 + $0x138] sm:$0xff]  ;;  %s6869_s5 = smov 18  }
   0x8   :  { %v76_v35 = vsub.f32 %v72_v21, %v74_v22  ;;  %v56_v36 = vmul.f32 %v6896_v2, %v30_v31  ;;  %v58_v37 = vmul.f32 %v6898_v3, %v22_v26  ;;  %v55_v38 = vmul.f32 %v6910_v8, %v29_v33  ;;  %v135_v21 = vld [vmem:[%s8825_s1 + $0x140] sm:$0xff]  ;;  %v136_v22 = vld [vmem:[%s8825_s1 + $0x148] sm:$0xff] }
   0x9   :  { %6432 = vrcp.f32 %v44_v10  ;;  %v57_v39 = vmul.f32 %v6912_v9, %v21_v32  ;;  %v91_v41 = vsub.f32 %v87_v27, %v89_v28  ;;  %v75_v42 = vsub.f32 %v71_v29, %v73_v30  ;;  %v141_v27 = vld [vmem:[%s8825_s1 + $0x170] sm:$0xff]  ;;  %v142_v28 = vld [vmem:[%s8825_s1 + $0x178] sm:$0xff] }
   0xa   :  { %6434 = vrcp.f32 %v43_v13  ;;  %v82_v46 = vmul.f32 %v6898_v3, %v34_v15  ;;  %v79_v47 = vmul.f32 %v6910_v8, %v25_v18  ;;  %v81_v48 = vmul.f32 %v6912_v9, %v33_v23  ;;  %v129_v15 = vld [vmem:[%s8825_s1 + $0x110] sm:$0xff]  ;;  %v132_v18 = vld [vmem:[%s8825_s1 + $0x128] sm:$0xff]  ;;  %v158_v30 = vld [vmem:[%s8826_s2 + $0x78] sm:$0xff] }
   0xb   :  { %v60_v50 = vsub.f32 %v56_v36, %v58_v37  ;;  %v59_v51 = vsub.f32 %v55_v38, %v57_v39  ;;  %v64_v56 = vmul.f32 %v6896_v2, %v24_v16  ;;  %v66_v57 = vmul.f32 %v6898_v3, %v32_v17  ;;  %v130_v16 = vld [vmem:[%s8825_s1 + $0x118] sm:$0xff]  ;;  %v131_v17 = vld [vmem:[%s8825_s1 + $0x120] sm:$0xff]  ;;  %v137_v23 = vld [vmem:[%s8825_s1 + $0x150] sm:$0xff] }
   0xc   :  { %v84_v54 = vadd.f32 %v82_v46, %v80_v45  ;;  %v83_v55 = vadd.f32 %v81_v48, %v79_v47  ;;  %v63_v58 = vmul.f32 %v6910_v8, %v23_v24  ;;  %v65_v61 = vmul.f32 %v6912_v9, %v31_v25  ;;  %v138_v24 = vld [vmem:[%s8825_s1 + $0x158] sm:$0xff]  ;;  %v139_v25 = vld [vmem:[%s8825_s1 + $0x160] sm:$0xff] }
   0xd   :  { %v48_v62 = vmul.f32 %v6896_v2, %v22_v26  ;;  %v68_v63 = vadd.f32 %v66_v57, %v64_v56  ;;  %v50_v0 = vmul.f32 %v6898_v3, %v30_v31  ;;  %v47_v1 = vmul.f32 %v6910_v8, %v21_v32  ;;  %v111_v3 = vld [vmem:[%s8825_s1 + $0x80] sm:$0xff]  ;;  %v140_v26 = vld [vmem:[%s8825_s1 + $0x168] sm:$0xff]  ;;  %v150_v31 = vld [vmem:[%s8826_s2 + $0x38] sm:$0xff] }
   0xe   :  { %v49_v4 = vmul.f32 %v6912_v9, %v29_v33  ;;  %v67_v7 = vadd.f32 %v65_v61, %v63_v58  ;;  %v127_v8 = vld [vmem:[%s8825_s1 + $0x100] sm:$0xff]  ;;  %5892 = vmatprep.mubr.msk.f32.mxu0 %vm183_vm0, %v111_v3  ;;  %v6854_v29 = vmov 0   ;;  %v149_v32 = vld [vmem:[%s8826_s2 + $0x30] sm:$0xff]  ;;  %v146_v38 = vld [vmem:[%s8826_s2 + $0x18] sm:$0xff] }
   0xf   :  { %v52_v2 = vadd.f32 %v50_v0, %v48_v62  ;;  %5940 = vmatprep.mubr.msk.f32.mxu1 %vm183_vm0, %v127_v8  ;;  %6431 = vset.pattern.permute.xlu1 %v6854_v29  ;;  %v157_v33 = vld [vmem:[%s8826_s2 + $0x70] sm:$0xff]  ;;  %v147_v36 = vld [vmem:[%s8826_s2 + $0x20] sm:$0xff]  ;;  %v154_v39 = vld [vmem:[%s8826_s2 + $0x58] sm:$0xff] }
  0x10   :  { %v51_v11 = vadd.f32 %v49_v4, %v47_v1  ;;  %6430 = vset.pattern.permute.xlu0 %v6854_v29  ;;  %v155_v37 = vld [vmem:[%s8826_s2 + $0x60] sm:$0xff]  ;;  %v112_v58 = vld [vmem:[%s8825_s1 + $0x88] sm:$0xff]  ;;  %v113_v61 = vld [vmem:[%s8825_s1 + $0x90] sm:$0xff] }
  0x11   :  { %v151_v45 = vld [vmem:[%s8826_s2 + $0x40] sm:$0xff]  ;;  %v114_v62 = vld [vmem:[%s8825_s1 + $0x98] sm:$0xff]  ;;  %v116_v4 = vld [vmem:[%s8825_s1 + $0xa8] sm:$0xff] }
  0x12   :  { %v115_v1 = vld [vmem:[%s8825_s1 + $0xa0] sm:$0xff] }
  0x13   :  { %v103_v29 = vld [vmem:[%s8825_s1 + $0x40] sm:$0xff] }
  0x16   :  { %v6966_v40 = vpop.eup %6432 }
  0x17   :  { %v6969_v43 = vmul.f32 %v6966_v40, %v92_v34  ;;  %v6972_v44 = vmul.f32 %v6966_v40, %v76_v35  ;;  %v6435_v49 = vpop.eup %6434  ;;  %v62_v59 = vmul.f32 %v6966_v40, %v60_v50  ;;  %v86_v5 = vmul.f32 %v6966_v40, %v84_v54  ;;  %v148_v34 = vld [vmem:[%s8826_s2 + $0x28] sm:$0xff] }
  0x18   :  { %v93_v52 = vmul.f32 %v6435_v49, %v91_v41  ;;  %v6982_v53 = vmul.f32 %v6435_v49, %v75_v42  ;;  %v61_v60 = vmul.f32 %v6435_v49, %v59_v51  ;;  %v85_v6 = vmul.f32 %v6435_v49, %v83_v55  ;;  %v156_v35 = vld [vmem:[%s8826_s2 + $0x68] sm:$0xff]  ;;  %v153_v41 = vld [vmem:[%s8826_s2 + $0x50] sm:$0xff] }
  0x19   :  { %181 = vrot.lane.b32.xlu0 %v6969_v43, %s6852_s0  ;;  %177 = vrot.lane.b32.xlu1 %v6972_v44, %s6852_s0  ;;  %v70_v9 = vmul.f32 %v6966_v40, %v68_v63  ;;  %v69_v10 = vmul.f32 %v6435_v49, %v67_v7  ;;  %v54_v12 = vmul.f32 %v6966_v40, %v52_v2  ;;  %v145_v40 = vld [vmem:[%s8826_s2 + $0x10] sm:$0xff]  ;;  %v144_v42 = vld [vmem:[%s8826_s2 + $0x8] sm:$0xff] }
  0x1a   :  { %5916 = vmatprep.subr.mxu1 %v6969_v43  ;;  %v53_v13 = vmul.f32 %v6435_v49, %v51_v11  ;;  %v117_v7 = vld [vmem:[%s8825_s1 + $0xb0] sm:$0xff]  ;;  %v118_v2 = vld [vmem:[%s8825_s1 + $0xb8] sm:$0xff] }
  0x1b   :  { %5917 = vmatpush3.msra.mxu1 %v6969_v43 }
  0x1c   :  { %5918 = vmatprep.subr.mxu1 %v93_v52 }
  0x1d   :  { %179 = vrot.lane.b32.xlu0 %v93_v52, %s6852_s0  ;;  %175 = vrot.lane.b32.xlu1 %v6982_v53, %s6852_s0 }
  0x1e   :  { %5919 = vmatpush3.msra.mxu1 %v93_v52 }
  0x1f   :  { %5920 = vmatprep.subr.mxu1 %v6972_v44 }
  0x20   :  { %5921 = vmatpush3.msra.mxu1 %v6972_v44 }
  0x21   :  { %173 = vrot.lane.b32.xlu0 %v62_v59, %s6852_s0  ;;  %171 = vrot.lane.b32.xlu1 %v61_v60, %s6852_s0 }
  0x22   :  { %5922 = vmatprep.subr.mxu1 %v6982_v53 }
  0x23   :  { %5923 = vmatpush3.msra.mxu1 %v6982_v53 }
  0x24   :  { %5924 = vmatprep.subr.mxu1 %v62_v59 }
  0x25   :  { %169 = vrot.lane.b32.xlu0 %v86_v5, %s6852_s0  ;;  %167 = vrot.lane.b32.xlu1 %v85_v6, %s6852_s0 }
  0x26   :  { %5925 = vmatpush3.msra.mxu1 %v62_v59 }
  0x27   :  { %5926 = vmatprep.subr.mxu1 %v61_v60 }
  0x28   :  { %5927 = vmatpush3.msra.mxu1 %v61_v60 }
  0x29   :  { %165 = vrot.lane.b32.xlu0 %v70_v9, %s6852_s0  ;;  %163 = vrot.lane.b32.xlu1 %v69_v10, %s6852_s0 }
  0x2a   :  { %5928 = vmatprep.subr.mxu1 %v86_v5 }
  0x2b   :  { %5929 = vmatpush3.msra.mxu1 %v86_v5 }
  0x2c   :  { %5930 = vmatprep.subr.mxu1 %v85_v6 }
  0x2d   :  { %161 = vrot.lane.b32.xlu0 %v54_v12, %s6852_s0  ;;  %159 = vrot.lane.b32.xlu1 %v53_v13, %s6852_s0 }
  0x2e   :  { %5931 = vmatpush3.msra.mxu1 %v85_v6 }
  0x2f   :  { %5932 = vmatprep.subr.mxu1 %v70_v9 }
  0x30   :  { %5933 = vmatpush3.msra.mxu1 %v70_v9 }
  0x31   :  { %592 = vrot.lane.b32.xlu0 %v6969_v43, %s6853_s21  ;;  %590 = vrot.lane.b32.xlu1 %v93_v52, %s6853_s21  ;;  %v152_v43 = vld [vmem:[%s8826_s2 + $0x48] sm:$0xff] }
  0x32   :  { %5934 = vmatprep.subr.mxu1 %v69_v10 }
  0x33   :  { %5935 = vmatpush3.msra.mxu1 %v69_v10 }
  0x34   :  { %5936 = vmatprep.subr.mxu1 %v54_v12 }
  0x35   :  { %588 = vrot.lane.b32.xlu0 %v6972_v44, %s6853_s21  ;;  %586 = vrot.lane.b32.xlu1 %v6982_v53, %s6853_s21  ;;  %v143_v44 = vld [vmem:[%s8826_s2] sm:$0xff] }
  0x36   :  { %5937 = vmatpush3.msra.mxu1 %v54_v12 }
  0x37   :  { %5938 = vmatprep.subr.mxu1 %v53_v13 }
  0x38   :  { %5939 = vmatpush3.msra.mxu1 %v53_v13 }
  0x39   :  { %584 = vrot.lane.b32.xlu0 %v62_v59, %s6853_s21  ;;  %582 = vrot.lane.b32.xlu1 %v61_v60, %s6853_s21 }
  0x3a   :  { %5941 = vmatmul.mubr.msk.f32.vlgmr.msra.gmra.mxu1 %vm183_vm0, %v128_v14  ;;  %v122_v14 = vld [vmem:[%s8825_s1 + $0xd8] sm:$0xff] }
  0x3b   :  { %5943 = vmatprep.mubr.msk.f32.mxu1 %vm183_vm0, %v129_v15 }
  0x3d   :  { %580 = vrot.lane.b32.xlu0 %v86_v5, %s6853_s21  ;;  %578 = vrot.lane.b32.xlu1 %v85_v6, %s6853_s21 }
  0x3e   :  { %5944 = vmatmul.mubr.msk.f32.gmra.mxu1 %vm183_vm0, %v130_v16  ;;  %v123_v16 = vld [vmem:[%s8825_s1 + $0xe0] sm:$0xff] }
  0x3f   :  { %5946 = vmatprep.mubr.msk.f32.mxu1 %vm183_vm0, %v131_v17 }
  0x41   :  { %576 = vrot.lane.b32.xlu0 %v70_v9, %s6853_s21  ;;  %574 = vrot.lane.b32.xlu1 %v69_v10, %s6853_s21  ;;  %v119_v9 = vld [vmem:[%s8825_s1 + $0xc0] sm:$0xff]  ;;  %v120_v10 = vld [vmem:[%s8825_s1 + $0xc8] sm:$0xff] }
  0x42   :  { %5947 = vmatmul.mubr.msk.f32.gmra.mxu1 %vm183_vm0, %v132_v18  ;;  %v124_v18 = vld [vmem:[%s8825_s1 + $0xe8] sm:$0xff] }
  0x43   :  { %5949 = vmatprep.mubr.msk.f32.mxu1 %vm183_vm0, %v133_v19  ;;  %v125_v19 = vld [vmem:[%s8825_s1 + $0xf0] sm:$0xff] }
  0x45   :  { %572 = vrot.lane.b32.xlu0 %v54_v12, %s6853_s21  ;;  %570 = vrot.lane.b32.xlu1 %v53_v13, %s6853_s21  ;;  %v121_v13 = vld [vmem:[%s8825_s1 + $0xd0] sm:$0xff] }
  0x46   :  { %5950 = vmatmul.mubr.msk.f32.gmra.mxu1 %vm183_vm0, %v134_v20  ;;  %v126_v20 = vld [vmem:[%s8825_s1 + $0xf8] sm:$0xff] }
  0x47   :  { %5952 = vmatprep.mubr.msk.f32.mxu1 %vm183_vm0, %v135_v21  ;;  %v95_v21 = vld [vmem:[%s8825_s1] sm:$0xff] }
  0x49   :  { %880 = vperm.xlu1 %6431, %v158_v30   ;;  %840 = vperm.xlu0 %6430, %v150_v31   ;;  %v104_v30 = vld [vmem:[%s8825_s1 + $0x48] sm:$0xff]  ;;  %v105_v31 = vld [vmem:[%s8825_s1 + $0x50] sm:$0xff] }
  0x4a   :  { %5953 = vmatmul.mubr.msk.f32.gmra.mxu1 %vm183_vm0, %v136_v22  ;;  %v96_v22 = vld [vmem:[%s8825_s1 + $0x8] sm:$0xff] }
  0x4b   :  { %5955 = vmatprep.mubr.msk.f32.mxu1 %vm183_vm0, %v137_v23  ;;  %v97_v23 = vld [vmem:[%s8825_s1 + $0x10] sm:$0xff] }
  0x4d   :  { %835 = vperm.xlu1 %6431, %v149_v32   ;;  %875 = vperm.xlu0 %6430, %v157_v33   ;;  %v106_v32 = vld [vmem:[%s8825_s1 + $0x58] sm:$0xff]  ;;  %v107_v33 = vld [vmem:[%s8825_s1 + $0x60] sm:$0xff] }
  0x4e   :  { %5956 = vmatmul.mubr.msk.f32.gmra.mxu1 %vm183_vm0, %v138_v24  ;;  %v98_v24 = vld [vmem:[%s8825_s1 + $0x18] sm:$0xff] }
  0x4f   :  { %5958 = vmatprep.mubr.msk.f32.mxu1 %vm183_vm0, %v139_v25  ;;  %v99_v25 = vld [vmem:[%s8825_s1 + $0x20] sm:$0xff] }
  0x51   :  { %830 = vperm.xlu1 %6431, %v148_v34   ;;  %870 = vperm.xlu0 %6430, %v156_v35   ;;  %v108_v34 = vld [vmem:[%s8825_s1 + $0x68] sm:$0xff]  ;;  %v109_v35 = vld [vmem:[%s8825_s1 + $0x70] sm:$0xff] }
  0x52   :  { %5959 = vmatmul.mubr.msk.f32.gmra.mxu1 %vm183_vm0, %v140_v26  ;;  %v100_v26 = vld [vmem:[%s8825_s1 + $0x28] sm:$0xff] }
  0x53   :  { %5961 = vmatprep.mubr.msk.f32.mxu1 %vm183_vm0, %v141_v27  ;;  %v101_v27 = vld [vmem:[%s8825_s1 + $0x30] sm:$0xff] }
  0x55   :  { %825 = vperm.xlu1 %6431, %v147_v36   ;;  %865 = vperm.xlu0 %6430, %v155_v37   ;;  %v110_v36 = vld [vmem:[%s8825_s1 + $0x78] sm:$0xff] }
  0x56   :  { %5962 = vmatmul.mubr.msk.f32.gmra.mxu1 %vm183_vm0, %v142_v28  ;;  %v102_v28 = vld [vmem:[%s8825_s1 + $0x38] sm:$0xff] }
  0x59   :  { %820 = vperm.xlu1 %6431, %v146_v38   ;;  %860 = vperm.xlu0 %6430, %v154_v39  }
  0x5d   :  { %815 = vperm.xlu1 %6431, %v145_v40   ;;  %855 = vperm.xlu0 %6430, %v153_v41  }
  0x61   :  { %810 = vperm.xlu1 %6431, %v144_v42   ;;  %850 = vperm.xlu0 %6430, %v152_v43  }
  0x65   :  { %805 = vperm.xlu1 %6431, %v143_v44   ;;  %845 = vperm.xlu0 %6430, %v151_v45  }
  0x8b   :  { %v182_v46 = vpop.permute.xlu0 %181  ;;  %v178_v47 = vpop.permute.xlu1 %177 }
  0x8c   :  { %5868 = vmatprep.subr.mxu0 %v182_v46 }
  0x8d   :  { %5869 = vmatpush3.msra.mxu0 %v182_v46 }
  0x8f   :  { %v180_v48 = vpop.permute.xlu0 %179  ;;  %v176_v49 = vpop.permute.xlu1 %175 }
  0x90   :  { %5870 = vmatprep.subr.mxu0 %v180_v48 }
  0x91   :  { %5871 = vmatpush3.msra.mxu0 %v180_v48 }
  0x92   :  { %5872 = vmatprep.subr.mxu0 %v178_v47 }
  0x93   :  { %5873 = vmatpush3.msra.mxu0 %v178_v47  ;;  %v174_v50 = vpop.permute.xlu0 %173  ;;  %v172_v51 = vpop.permute.xlu1 %171 }
  0x94   :  { %5874 = vmatprep.subr.mxu0 %v176_v49 }
  0x95   :  { %5875 = vmatpush3.msra.mxu0 %v176_v49 }
  0x96   :  { %5876 = vmatprep.subr.mxu0 %v174_v50 }
  0x97   :  { %5877 = vmatpush3.msra.mxu0 %v174_v50  ;;  %v170_v52 = vpop.permute.xlu0 %169  ;;  %v168_v53 = vpop.permute.xlu1 %167 }
  0x98   :  { %5878 = vmatprep.subr.mxu0 %v172_v51 }
  0x99   :  { %5879 = vmatpush3.msra.mxu0 %v172_v51 }
  0x9a   :  { %5880 = vmatprep.subr.mxu0 %v170_v52 }
  0x9b   :  { %5881 = vmatpush3.msra.mxu0 %v170_v52  ;;  %v166_v54 = vpop.permute.xlu0 %165  ;;  %v164_v55 = vpop.permute.xlu1 %163 }
  0x9c   :  { %5882 = vmatprep.subr.mxu0 %v168_v53 }
  0x9d   :  { %5883 = vmatpush3.msra.mxu0 %v168_v53 }
  0x9e   :  { %5884 = vmatprep.subr.mxu0 %v166_v54 }
  0x9f   :  { %5885 = vmatpush3.msra.mxu0 %v166_v54  ;;  %v162_v56 = vpop.permute.xlu0 %161  ;;  %v160_v57 = vpop.permute.xlu1 %159 }
  0xa0   :  { %5886 = vmatprep.subr.mxu0 %v164_v55 }
  0xa1   :  { %5887 = vmatpush3.msra.mxu0 %v164_v55 }
  0xa2   :  { %5888 = vmatprep.subr.mxu0 %v162_v56 }
  0xa3   :  { %5889 = vmatpush3.msra.mxu0 %v162_v56  ;;  %v593_v59 = vpop.permute.xlu0 %592  ;;  %v591_v60 = vpop.permute.xlu1 %590 }
  0xa4   :  { %5890 = vmatprep.subr.mxu0 %v160_v57 }
  0xa5   :  { %5891 = vmatpush3.msra.mxu0 %v160_v57 }
  0xa6   :  { %5893 = vmatmul.mubr.msk.f32.vlgmr.msra.gmra.mxu0 %vm183_vm0, %v112_v58  ;;  %5964 = vmatprep.subr.mxu0 %v593_v59 }
  0xa7   :  { %5895 = vmatprep.mubr.msk.f32.mxu0 %vm183_vm0, %v113_v61  ;;  %5965 = vmatpush3.msra.mxu0 %v593_v59  ;;  %v589_v63 = vpop.permute.xlu0 %588  ;;  %v587_v0 = vpop.permute.xlu1 %586 }
  0xa8   :  { %5966 = vmatprep.subr.mxu0 %v591_v60 }
  0xa9   :  { %5967 = vmatpush3.msra.mxu0 %v591_v60 }
  0xaa   :  { %5896 = vmatmul.mubr.msk.f32.gmra.mxu0 %vm183_vm0, %v114_v62  ;;  %5968 = vmatprep.subr.mxu0 %v589_v63 }
  0xab   :  { %5898 = vmatprep.mubr.msk.f32.mxu0 %vm183_vm0, %v115_v1  ;;  %5969 = vmatpush3.msra.mxu0 %v589_v63  ;;  %v585_v5 = vpop.permute.xlu0 %584  ;;  %v583_v6 = vpop.permute.xlu1 %582 }
  0xac   :  { %5970 = vmatprep.subr.mxu0 %v587_v0 }
  0xad   :  { %5971 = vmatpush3.msra.mxu0 %v587_v0 }
  0xae   :  { %5899 = vmatmul.mubr.msk.f32.gmra.mxu0 %vm183_vm0, %v116_v4  ;;  %5972 = vmatprep.subr.mxu0 %v585_v5 }
  0xaf   :  { %5901 = vmatprep.mubr.msk.f32.mxu0 %vm183_vm0, %v117_v7  ;;  %5973 = vmatpush3.msra.mxu0 %v585_v5  ;;  %v581_v3 = vpop.permute.xlu0 %580  ;;  %v579_v8 = vpop.permute.xlu1 %578 }
  0xb0   :  { %5974 = vmatprep.subr.mxu0 %v583_v6 }
  0xb1   :  { %5975 = vmatpush3.msra.mxu0 %v583_v6 }
  0xb2   :  { %5902 = vmatmul.mubr.msk.f32.gmra.mxu0 %vm183_vm0, %v118_v2  ;;  %5976 = vmatprep.subr.mxu0 %v581_v3 }
  0xb3   :  { %5904 = vmatprep.mubr.msk.f32.mxu0 %vm183_vm0, %v119_v9  ;;  %5977 = vmatpush3.msra.mxu0 %v581_v3  ;;  %v577_v11 = vpop.permute.xlu0 %576  ;;  %v575_v12 = vpop.permute.xlu1 %574 }
  0xb4   :  { %5978 = vmatprep.subr.mxu0 %v579_v8 }
  0xb5   :  { %5979 = vmatpush3.msra.mxu0 %v579_v8 }
  0xb6   :  { %5905 = vmatmul.mubr.msk.f32.gmra.mxu0 %vm183_vm0, %v120_v10  ;;  %5980 = vmatprep.subr.mxu0 %v577_v11 }
  0xb7   :  { %5907 = vmatprep.mubr.msk.f32.mxu0 %vm183_vm0, %v121_v13  ;;  %5981 = vmatpush3.msra.mxu0 %v577_v11  ;;  %v573_v15 = vpop.permute.xlu0 %572  ;;  %v571_v17 = vpop.permute.xlu1 %570 }
  0xb8   :  { %5982 = vmatprep.subr.mxu0 %v575_v12 }
  0xb9   :  { %5983 = vmatpush3.msra.mxu0 %v575_v12 }
  0xba   :  { %5908 = vmatmul.mubr.msk.f32.gmra.mxu0 %vm183_vm0, %v122_v14  ;;  %5984 = vmatprep.subr.mxu0 %v573_v15 }
  0xbb   :  { %5910 = vmatprep.mubr.msk.f32.mxu0 %vm183_vm0, %v123_v16  ;;  %5985 = vmatpush3.msra.mxu0 %v573_v15 }
  0xbc   :  { %5986 = vmatprep.subr.mxu0 %v571_v17 }
  0xbd   :  { %5987 = vmatpush3.msra.mxu0 %v571_v17 }
  0xbe   :  { %5911 = vmatmul.mubr.msk.f32.gmra.mxu0 %vm183_vm0, %v124_v18 }
  0xbf   :  { %5913 = vmatprep.mubr.msk.f32.mxu0 %vm183_vm0, %v125_v19 }
  0xc2   :  { %5914 = vmatmul.mubr.msk.f32.gmra.mxu0 %vm183_vm0, %v126_v20 }
  0xc3   :  { %5988 = vmatprep.mubr.msk.f32.mxu0 %vm183_vm0, %v95_v21 }
  0xc4   :  { %v7276_v46 = vpop.permute.xlu1 %880  ;;  %v841_v58 = vpop.permute.xlu0 %840 }
  0xc6   :  { %5989 = vmatmul.mubr.msk.f32.vlgmr.msra.gmra.mxu0 %vm183_vm0, %v96_v22 }
  0xc7   :  { %5991 = vmatprep.mubr.msk.f32.mxu0 %vm183_vm0, %v97_v23 }
  0xc8   :  { %v836_v52 = vpop.permute.xlu1 %835  ;;  %v7282_v1 = vpop.permute.xlu0 %875 }
  0xca   :  { %5992 = vmatmul.mubr.msk.f32.gmra.mxu0 %vm183_vm0, %v98_v24 }
  0xcb   :  { %5994 = vmatprep.mubr.msk.f32.mxu0 %vm183_vm0, %v99_v25 }
  0xcc   :  { %v831_v57 = vpop.permute.xlu1 %830  ;;  %v7286_v3 = vpop.permute.xlu0 %870 }
  0xce   :  { %5995 = vmatmul.mubr.msk.f32.gmra.mxu0 %vm183_vm0, %v100_v26 }
  0xcf   :  { %5997 = vmatprep.mubr.msk.f32.mxu0 %vm183_vm0, %v101_v27 }
  0xd0   :  { %v7280_v0 = vpop.permute.xlu1 %825  ;;  %v7290_v14 = vpop.permute.xlu0 %865 }
  0xd2   :  { %5998 = vmatmul.mubr.msk.f32.gmra.mxu0 %vm183_vm0, %v102_v28 }
  0xd3   :  { %6000 = vmatprep.mubr.msk.f32.mxu0 %vm183_vm0, %v103_v29 }
  0xd4   :  { %v821_v2 = vpop.permute.xlu1 %820  ;;  %v861_v25 = vpop.permute.xlu0 %860 }
  0xd6   :  { %6001 = vmatmul.mubr.msk.f32.gmra.mxu0 %vm183_vm0, %v104_v30 }
  0xd7   :  { %6003 = vmatprep.mubr.msk.f32.mxu0 %vm183_vm0, %v105_v31 }
  0xd8   :  { %v7288_v13 = vpop.permute.xlu1 %815 }
  0xda   :  { %6004 = vmatmul.mubr.msk.f32.gmra.mxu0 %vm183_vm0, %v106_v32 }
  0xdb   :  { %6006 = vmatprep.mubr.msk.f32.mxu0 %vm183_vm0, %v107_v33 }
  0xdc   :  { %v811_v24 = vpop.permute.xlu1 %810 }
  0xde   :  { %6007 = vmatmul.mubr.msk.f32.gmra.mxu0 %vm183_vm0, %v108_v34 }
  0xdf   :  { %6009 = vmatprep.mubr.msk.f32.mxu0 %vm183_vm0, %v109_v35 }
  0xe2   :  { %6010 = vmatmul.mubr.msk.f32.gmra.mxu0 %vm183_vm0, %v110_v36  ;;  %vm1061_vm0 = vcmask 523264  }
  0xfa   :  { %v5942_v37 = vpop.f32.mrf.mxu1 }
  0xfc   :  { %v7268_v38 = vpop.f32.mrf.mxu1 }
  0xfe   :  { %v5945_v41 = vpop.f32.mrf.mxu1 }
 0x100   :  { %v7274_v44 = vpop.f32.mrf.mxu1 }
 0x102   :  { %v5948_v47 = vpop.f32.mrf.mxu1 }
 0x104   :  { %v511_v50 = vpop.f32.mrf.mxu1 }
 0x106   :  { %v5951_v54 = vpop.f32.mrf.mxu1 }
 0x108   :  { %v521_v59 = vpop.f32.mrf.mxu1 }
 0x10a   :  { %v5954_v62 = vpop.f32.mrf.mxu1 }
 0x10c   :  { %v531_v5 = vpop.f32.mrf.mxu1 }
 0x10e   :  { %v5957_v8 = vpop.f32.mrf.mxu1 }
 0x110   :  { %v541_v11 = vpop.f32.mrf.mxu1 }
 0x112   :  { %v5960_v18 = vpop.f32.mrf.mxu1 }
 0x114   :  { %v551_v27 = vpop.f32.mrf.mxu1 }
 0x116   :  { %v5963_v36 = vpop.f32.mrf.mxu1 }
 0x166   :  { %v5894_v39 = vpop.f32.mrf.mxu0 }
 0x167   :  { %v497_v16 = vadd.f32 %v5942_v37, %v5894_v39 }
 0x168   :  { %v7270_v40 = vpop.f32.mrf.mxu0 }
 0x16a   :  { %v5897_v42 = vpop.f32.mrf.mxu0 }
 0x16b   :  { %v507_v17 = vadd.f32 %v5945_v41, %v5897_v42  ;;  %v492_v41 = vadd.f32 %v7268_v38, %v7270_v40  ;;  %v561_v40 = vpop.f32.mrf.mxu1 }
 0x16c   :  { %v7272_v43 = vpop.f32.mrf.mxu0 }
 0x16e   :  { %v5900_v45 = vpop.f32.mrf.mxu0 }
 0x16f   :  { %v517_v21 = vadd.f32 %v5948_v47, %v5900_v45  ;;  %v856_v47 = vpop.permute.xlu0 %855 }
 0x170   :  { %v318_v48 = vpop.f32.mrf.mxu0 }
 0x172   :  { %v5903_v49 = vpop.f32.mrf.mxu0 }
 0x173   :  { %v527_v26 = vadd.f32 %v5951_v54, %v5903_v49  ;;  %v502_v49 = vadd.f32 %v7274_v44, %v7272_v43 }
 0x174   :  { %v328_v51 = vpop.f32.mrf.mxu0 }
 0x175   :  { %v522_v30 = vadd.f32 %v521_v59, %v328_v51  ;;  %v512_v51 = vadd.f32 %v511_v50, %v318_v48 }
 0x176   :  { %v5906_v53 = vpop.f32.mrf.mxu0 }
 0x178   :  { %v338_v55 = vpop.f32.mrf.mxu0 }
 0x17a   :  { %v5909_v56 = vpop.f32.mrf.mxu0 }
 0x17b   :  { %v547_v42 = vadd.f32 %v5957_v8, %v5909_v56 }
 0x17c   :  { %v348_v60 = vpop.f32.mrf.mxu0 }
 0x17e   :  { %v5912_v61 = vpop.f32.mrf.mxu0 }
 0x17f   :  { %v557_v38 = vadd.f32 %v5960_v18, %v5912_v61 }
 0x180   :  { %v7278_v63 = vpop.f32.mrf.mxu0 }
 0x181   :  { %v552_v50 = vadd.f32 %v551_v27, %v7278_v63 }
 0x182   :  { %v5915_v4 = vpop.f32.mrf.mxu0 }
 0x184   :  { %v7284_v6 = vpop.f32.mrf.mxu0 }
 0x186   :  { %v5990_v7 = vpop.f32.mrf.mxu0 }
 0x187   :  { %v788_v20 = vadd.f32 %v5990_v7, %v497_v16  ;;  %v532_v16 = vadd.f32 %v531_v5, %v338_v55  ;;  %v562_v55 = vadd.f32 %v561_v40, %v7284_v6 }
 0x188   :  { %v708_v9 = vpop.f32.mrf.mxu0 }
 0x189   :  { %v7292_v31 = vadd.f32 %v811_v24, %v788_v20  ;;  %v787_v61 = vadd.f32 %v708_v9, %v492_v41 }
 0x18a   :  { %v5993_v10 = vpop.f32.mrf.mxu0 }
 0x18b   :  { %v790_v22 = vadd.f32 %v5993_v10, %v507_v17  ;;  %v916_v45 = vmin.f32 %v7292_v31, 0.0 }
 0x18c   :  { %v718_v12 = vpop.f32.mrf.mxu0 }
 0x18d   :  { %v7294_v32 = vadd.f32 %v821_v2, %v790_v22  ;;  %v537_v2 = vadd.f32 %v5954_v62, %v5906_v53  ;;  %v933_v20 = vmul.f32 1.442695, %v916_v45  ;;  %v789_v43 = vadd.f32 %v718_v12, %v502_v49  ;;  %v851_v62 = vpop.permute.xlu0 %850 }
 0x18e   :  { %v5996_v15 = vpop.f32.mrf.mxu0 }
 0x18f   :  { %v792_v28 = vadd.f32 %v5996_v15, %v517_v21  ;;  %v918_v54 = vmin.f32 %v7294_v32, 0.0  ;;  %6436 = vpow2.f32 %v933_v20  ;;  %vm902_vm3 = vcmp.gt.f32.partialorder %v7294_v32, 0.0 }
 0x190   :  { %v728_v19 = vpop.f32.mrf.mxu0 }
 0x191   :  { %v7296_v37 = vadd.f32 %v831_v57, %v792_v28  ;;  %v542_v57 = vadd.f32 %v541_v11, %v348_v60  ;;  %v791_v8 = vadd.f32 %v728_v19, %v512_v51  ;;  %v937_v53 = vmul.f32 1.442695, %v918_v54 }
 0x192   :  { %v5999_v23 = vpop.f32.mrf.mxu0 }
 0x193   :  { %v794_v33 = vadd.f32 %v5999_v23, %v527_v26  ;;  %v920_v56 = vmin.f32 %v7296_v37, 0.0  ;;  %v7316_v12 = vadd.f32 %v7280_v0, %v791_v8  ;;  %6438 = vpow2.f32 %v937_v53  ;;  %v806_v0 = vpop.permute.xlu1 %805 }
 0x194   :  { %v738_v29 = vpop.f32.mrf.mxu0  ;;  %vm904_vm4 = vcmp.gt.f32.partialorder %v7296_v37, 0.0 }
 0x195   :  { %v793_v35 = vadd.f32 %v738_v29, %v522_v30  ;;  %v7304_v59 = vadd.f32 %v841_v58, %v794_v33  ;;  %v567_v58 = vadd.f32 %v5963_v36, %v5915_v4  ;;  %v941_v18 = vmul.f32 1.442695, %v920_v56 }
 0x196   :  { %v6002_v34 = vpop.f32.mrf.mxu0  ;;  %v7320_v4 = vadd.f32 %v7288_v13, %v789_v43  ;;  %v919_v13 = vmin.f32 %v7316_v12, 0.0  ;;  %v14_v43 = vlaneseq  ;;  %vm903_vm5 = vcmp.gt.f32.partialorder %v7316_v12, 0.0 }
 0x197   :  { %v7306_v10 = vadd.f32 %v836_v52, %v793_v35  ;;  %v922_v52 = vmin.f32 %v7304_v59, 0.0  ;;  %v796_v11 = vadd.f32 %v6002_v34, %v537_v2  ;;  %6440 = vpow2.f32 %v941_v18  ;;  %v846_v35 = vpop.permute.xlu0 %845 }
 0x198   :  { %v748_v39 = vpop.f32.mrf.mxu0  ;;  %v917_v54 = vmin.f32 %v7320_v4, 0.0  ;;  %v15_v53 = vand.u32 127, %v14_v43  ;;  %vm906_vm6 = vcmp.gt.f32.partialorder %v7304_v59, 0.0 }
 0x199   :  { %v921_v5 = vmin.f32 %v7306_v10, 0.0  ;;  %v945_v9 = vmul.f32 1.442695, %v922_v52  ;;  %v795_v23 = vadd.f32 %v748_v39, %v532_v16  ;;  %v7327_v27 = vadd.f32 %v851_v62, %v796_v11 }
 0x19a   :  { %v6005_v7 = vpop.f32.mrf.mxu0  ;;  %v935_v56 = vmul.f32 1.442695, %v917_v54  ;;  %vm16_vm1 = vcmp.ge.s32.totalorder %v15_v53, 4  ;;  %vm17_vm2 = vcmp.lt.s32.totalorder %v15_v53, 20  ;;  %vm905_vm7 = vcmp.gt.f32.partialorder %v7306_v10, 0.0  ;;  %v1040_v53 = vld [vmem:[%s8826_s2 + $0x98] sm:$0xff] }
 0x19b   :  { %v798_v15 = vadd.f32 %v6005_v7, %v547_v42  ;;  %v943_v26 = vmul.f32 1.442695, %v921_v5  ;;  %v7339_v42 = vadd.f32 %v806_v0, %v787_v61  ;;  %6442 = vpow2.f32 %v945_v9  ;;  %vm7377_vm13 = vmand %vm16_vm1, %vm17_vm2 }
 0x19c   :  { %v758_v17 = vpop.f32.mrf.mxu0  ;;  %v939_v7 = vmul.f32 1.442695, %v919_v13  ;;  %vm908_vm14 = vcmp.gt.f32.partialorder %v7327_v27, 0.0  ;;  %vm901_vm1 = vcmp.gt.f32.partialorder %v7320_v4, 0.0  ;;  %vm900_vm2 = vcmp.gt.f32.partialorder %v7292_v31, 0.0 }
 0x19d   :  { %v7309_v44 = vadd.f32 %v861_v25, %v798_v15  ;;  %v797_v48 = vadd.f32 %v758_v17, %v542_v57  ;;  %6444 = vpow2.f32 %v943_v26  ;;  %v915_v40 = vmin.f32 %v7339_v42, 0.0  ;;  %v7352_v17 = vpop.eup %6436 }
 0x19e   :  { %v6008_v60 = vpop.f32.mrf.mxu0 }
 0x19f   :  { %v926_v19 = vmin.f32 %v7309_v44, 0.0  ;;  %v800_v21 = vadd.f32 %v6008_v60, %v557_v38  ;;  %v7322_v22 = vadd.f32 %v856_v47, %v797_v48  ;;  %v924_v47 = vmin.f32 %v7327_v27, 0.0 }
 0x1a0   :  { %v768_v63 = vpop.f32.mrf.mxu0  ;;  %v6439_v20 = vpop.eup %6438  ;;  %v931_v48 = vmul.f32 1.442695, %v915_v40  ;;  %vm910_vm8 = vcmp.gt.f32.partialorder %v7309_v44, 0.0 }
 0x1a1   :  { %v799_v6 = vadd.f32 %v768_v63, %v552_v50  ;;  %v7325_v24 = vadd.f32 %v7286_v3, %v800_v21  ;;  %v953_v30 = vmul.f32 1.442695, %v926_v19  ;;  %v925_v3 = vmin.f32 %v7322_v22, 0.0 }
 0x1a2   :  { %v6011_v25 = vpop.f32.mrf.mxu0  ;;  %v949_v38 = vmul.f32 1.442695, %v924_v47  ;;  %v5278_v9 = vadd.f32 -1.0, %v6439_v20  ;;  %vm909_vm15 = vcmp.gt.f32.partialorder %v7322_v22, 0.0 }
 0x1a3   :  { %v7330_v28 = vadd.f32 %v7290_v14, %v799_v6  ;;  %v802_v29 = vadd.f32 %v6011_v25, %v567_v58  ;;  %v928_v33 = vmin.f32 %v7325_v24, 0.0  ;;  %v7341_v14 = vadd.f32 %v846_v35, %v795_v23 }
 0x1a4   :  { %v778_v34 = vpop.f32.mrf.mxu0  ;;  %v951_v2 = vmul.f32 1.442695, %v925_v3  ;;  %v6441_v50 = vpop.eup %6440  ;;  %vm912_vm9 = vcmp.gt.f32.partialorder %v7325_v24, 0.0 }
 0x1a5   :  { %v927_v36 = vmin.f32 %v7330_v28, 0.0  ;;  %v7337_v39 = vadd.f32 %v7276_v46, %v802_v29  ;;  %v801_v41 = vadd.f32 %v778_v34, %v562_v55  ;;  %v957_v45 = vmul.f32 1.442695, %v928_v33 }
 0x1a6   :  { %v923_v15 = vmin.f32 %v7341_v14, 0.0  ;;  %v5280_v19 = vadd.f32 -1.0, %v6441_v50  ;;  %vm911_vm11 = vcmp.gt.f32.partialorder %v7330_v28, 0.0 }
 0x1a7   :  { %v955_v49 = vmul.f32 1.442695, %v927_v36  ;;  %v930_v51 = vmin.f32 %v7337_v39, 0.0  ;;  %6446 = vpow2.f32 %v957_v45  ;;  %v7347_v46 = vadd.f32 %v7282_v1, %v801_v41 }
 0x1a8   :  { %6448 = vpow2.f32 %v953_v30  ;;  %v947_v1 = vmul.f32 1.442695, %v923_v15  ;;  %v6443_v58 = vpop.eup %6442  ;;  %vm914_vm10 = vcmp.gt.f32.partialorder %v7337_v39, 0.0  ;;  %v984_v36 = vsel %vm904_vm4, %v7296_v37, %v5280_v19 }
 0x1a9   :  { %v961_v57 = vmul.f32 1.442695, %v930_v51  ;;  %6450 = vpow2.f32 %v955_v49  ;;  %v929_v16 = vmin.f32 %v7347_v46, 0.0  ;;  %v5282_v62 = vadd.f32 -1.0, %v6443_v58 }
 0x1aa   :  { %v6445_v52 = vpop.eup %6444  ;;  %vm913_vm12 = vcmp.gt.f32.partialorder %v7347_v46, 0.0  ;;  %vm899_vm4 = vcmp.gt.f32.partialorder %v7339_v42, 0.0 }
 0x1ab   :  { %6452 = vpow2.f32 %v961_v57  ;;  %v959_v8 = vmul.f32 1.442695, %v929_v16  ;;  %v5281_v21 = vadd.f32 -1.0, %v6445_v52  ;;  %v986_v0 = vsel %vm906_vm6, %v7304_v59, %v5282_v62  ;;  %v1021_v16 = vld [vmem:[%s8825_s1 + $0x1c0] sm:$0xff]  ;;  %v1044_v52 = vld [vmem:[%s8826_s2 + $0xb8] sm:$0xff]  ;;  %v1042_v62 = vld [vmem:[%s8826_s2 + $0xa8] sm:$0xff] }
 0x1ac   :  { %6454 = vpow2.f32 %v939_v7  ;;  %v982_v57 = vsel %vm902_vm3, %v7294_v32, %v5278_v9  ;;  %6028 = vmatprep.mubr.msk.f32.mxu1 %vm1061_vm0, %v1021_v16  ;;  %vm907_vm3 = vcmp.gt.f32.partialorder %v7341_v14, 0.0  ;;  %v1019_v16 = vld [vmem:[%s8825_s1 + $0x1b0] sm:$0xff]  ;;  %vm1601_vm6 = vcmask 261120  }
 0x1ad   :  { %6456 = vpow2.f32 %v951_v2  ;;  %v985_v59 = vsel %vm905_vm7, %v7306_v10, %v5281_v21 }
 0x1ae   :  { %6458 = vpow2.f32 %v959_v8 }
 0x1af   :  { %6460 = vpow2.f32 %v949_v38 }
 0x1b0   :  { %6462 = vpow2.f32 %v935_v56 }
 0x1b1   :  { %6464 = vpow2.f32 %v947_v1 }
 0x1b2   :  { %6466 = vpow2.f32 %v931_v48 }
 0x1b4   :  { %v6447_v60 = vpop.eup %6446 }
 0x1b5   :  { %v6449_v55 = vpop.eup %6448  ;;  %v5288_v5 = vadd.f32 -1.0, %v6447_v60  ;;  %v1039_v60 = vld [vmem:[%s8826_s2 + $0x90] sm:$0xff] }
 0x1b6   :  { %v6451_v61 = vpop.eup %6450  ;;  %v5286_v26 = vadd.f32 -1.0, %v6449_v55  ;;  %v1043_v55 = vld [vmem:[%s8826_s2 + $0xb0] sm:$0xff] }
 0x1b7   :  { %v5287_v23 = vadd.f32 -1.0, %v6451_v61  ;;  %v992_v29 = vsel %vm912_vm9, %v7325_v24, %v5288_v5  ;;  %v1038_v61 = vld [vmem:[%s8826_s2 + $0x88] sm:$0xff]  ;;  %v1037_v5 = vld [vmem:[%s8826_s2 + $0x80] sm:$0xff] }
 0x1b8   :  { %v6453_v11 = vpop.eup %6452  ;;  %v7386_v47 = vmax.f32 %v984_v36, %v992_v29  ;;  %v990_v51 = vsel %vm910_vm8, %v7309_v44, %v5286_v26  ;;  %v1023_v29 = vld [vmem:[%s8825_s1 + $0x1d0] sm:$0xff]  ;;  %v1026_v36 = vld [vmem:[%s8825_s1 + $0x1e8] sm:$0xff]  ;;  %v1961_v24 = vld [vmem:[%s8825_s1 + $0x2c0] sm:$0xff] }
 0x1b9   :  { %v6455_v18 = vpop.eup %6454  ;;  %v5290_v63 = vadd.f32 -1.0, %v6453_v11  ;;  %v7416_v40 = vmax.f32 %v982_v57, %v990_v51  ;;  %v1041_v11 = vld [vmem:[%s8826_s2 + $0xa0] sm:$0xff]  ;;  %v1031_v51 = vld [vmem:[%s8825_s1 + $0x210] sm:$0xff]  ;;  %v1034_v57 = vld [vmem:[%s8825_s1 + $0x228] sm:$0xff] }
 0x1ba   :  { %v6457_v6 = vpop.eup %6456  ;;  %v5279_v33 = vadd.f32 -1.0, %v6455_v18  ;;  %v1010_v32 = vsel %vm7377_vm13, %v7386_v47, 0.0 }
 0x1bb   :  { %v6459_v25 = vpop.eup %6458  ;;  %v994_v13 = vsel %vm914_vm10, %v7337_v39, %v5290_v63  ;;  %v5285_v41 = vadd.f32 -1.0, %v6457_v6  ;;  %v991_v39 = vsel %vm911_vm11, %v7330_v28, %v5287_v23  ;;  %v5276_v28 = vadd.f32 -1.0, %v7352_v17 }
 0x1bc   :  { %v6461_v30 = vpop.eup %6460  ;;  %v5289_v34 = vadd.f32 -1.0, %v6459_v25  ;;  %v7366_v35 = vmax.f32 %v986_v0, %v994_v13  ;;  %v1022_v0 = vld [vmem:[%s8825_s1 + $0x1c8] sm:$0xff] }
 0x1bd   :  { %v6463_v3 = vpop.eup %6462  ;;  %v5284_v49 = vadd.f32 -1.0, %v6461_v30  ;;  %v980_v17 = vsel %vm900_vm2, %v7292_v31, %v5276_v28  ;;  %v1024_v30 = vld [vmem:[%s8825_s1 + $0x1d8] sm:$0xff] }
 0x1be   :  { %v993_v45 = vsel %vm913_vm12, %v7347_v46, %v5289_v34  ;;  %v1012_v37 = vsel %vm7377_vm13, %v7366_v35, 0.0  ;;  %v6465_v10 = vpop.eup %6464  ;;  %v5277_v7 = vadd.f32 -1.0, %v6463_v3  ;;  %v983_v46 = vsel %vm903_vm5, %v7316_v12, %v5279_v33  ;;  %v1032_v28 = vld [vmem:[%s8825_s1 + $0x218] sm:$0xff] }
 0x1bf   :  { %1059 = vrot.lane.b32.xlu1 %v1012_v37, %s6852_s0  ;;  %v7393_v54 = vmax.f32 %v985_v59, %v993_v45  ;;  %v6467_v2 = vpop.eup %6466  ;;  %v7406_v15 = vmax.f32 %v983_v46, %v991_v39  ;;  %v5283_v38 = vadd.f32 -1.0, %v6465_v10  ;;  %v989_v12 = vsel %vm909_vm15, %v7322_v22, %v5285_v41  ;;  %v1027_v41 = vld [vmem:[%s8825_s1 + $0x1f0] sm:$0xff]  ;;  %v1028_v39 = vld [vmem:[%s8825_s1 + $0x1f8] sm:$0xff]  ;;  %v1030_v10 = vld [vmem:[%s8825_s1 + $0x208] sm:$0xff] }
 0x1c0   :  { %v988_v56 = vsel %vm908_vm14, %v7327_v27, %v5284_v49  ;;  %v5275_v22 = vadd.f32 -1.0, %v6467_v2  ;;  %v981_v8 = vsel %vm901_vm1, %v7320_v4, %v5277_v7  ;;  %v1008_v27 = vsel %vm7377_vm13, %v7416_v40, 0.0  ;;  %v1014_v49 = vld [vmem:[%s8825_s1 + $0x188] sm:$0xff]  ;;  %v1016_v7 = vld [vmem:[%s8825_s1 + $0x198] sm:$0xff]  ;;  %v1033_v46 = vld [vmem:[%s8825_s1 + $0x220] sm:$0xff] }
 0x1c1   :  { %v1011_v44 = vsel %vm7377_vm13, %v7393_v54, 0.0  ;;  %v1009_v1 = vsel %vm7377_vm13, %v7406_v15, 0.0  ;;  %v7431_v20 = vmax.f32 %v981_v8, %v989_v12  ;;  %v987_v43 = vsel %vm907_vm3, %v7341_v14, %v5283_v38  ;;  %v1017_v2 = vld [vmem:[%s8825_s1 + $0x1a0] sm:$0xff]  ;;  %v1036_v38 = vld [vmem:[%s8825_s1 + $0x238] sm:$0xff] }
 0x1c2   :  { %1057 = vrot.lane.b32.xlu0 %v1011_v44, %s6852_s0  ;;  %v7438_v48 = vmax.f32 %v980_v17, %v988_v56  ;;  %v979_v31 = vsel %vm899_vm4, %v7339_v42, %v5275_v22  ;;  %v1013_v42 = vld [vmem:[%s8825_s1 + $0x180] sm:$0xff]  ;;  %v1020_v12 = vld [vmem:[%s8825_s1 + $0x1b8] sm:$0xff]  ;;  %vm2065_vm15 = vcmask 130048   ;;  %vm2910_vm4 = vcmask 64560  }
 0x1c3   :  { %1055 = vrot.lane.b32.xlu1 %v1010_v32, %s6852_s0  ;;  %v1007_v4 = vsel %vm7377_vm13, %v7431_v20, 0.0  ;;  %v7446_v50 = vmax.f32 %v979_v31, %v987_v43  ;;  %6084 = vmatprep.mubr.msk.f32.mxu0 %vm1061_vm0, %v1013_v42 }
 0x1c4   :  { %v1006_v14 = vsel %vm7377_vm13, %v7438_v48, 0.0 }
 0x1c5   :  { %v1005_v58 = vsel %vm7377_vm13, %v7446_v50, 0.0 }
 0x1c6   :  { %1053 = vrot.lane.b32.xlu0 %v1009_v1, %s6852_s0 }
 0x1c7   :  { %1051 = vrot.lane.b32.xlu1 %v1008_v27, %s6852_s0 }
 0x1ca   :  { %1049 = vrot.lane.b32.xlu0 %v1007_v4, %s6852_s0 }
 0x1cb   :  { %1047 = vrot.lane.b32.xlu1 %v1006_v14, %s6852_s0 }
 0x1ce   :  { %1045 = vrot.lane.b32.xlu0 %v1005_v58, %s6852_s0 }
 0x1cf   :  { %1334 = vrot.lane.b32.xlu1 %v1012_v37, %s6853_s21 }
 0x1d2   :  { %1332 = vrot.lane.b32.xlu0 %v1011_v44, %s6853_s21  ;;  %v1018_v44 = vld [vmem:[%s8825_s1 + $0x1a8] sm:$0xff] }
 0x1d3   :  { %1330 = vrot.lane.b32.xlu1 %v1010_v32, %s6853_s21 }
 0x1d6   :  { %1328 = vrot.lane.b32.xlu0 %v1009_v1, %s6853_s21 }
 0x1d7   :  { %1326 = vrot.lane.b32.xlu1 %v1008_v27, %s6853_s21 }
 0x1da   :  { %1324 = vrot.lane.b32.xlu0 %v1007_v4, %s6853_s21 }
 0x1db   :  { %1322 = vrot.lane.b32.xlu1 %v1006_v14, %s6853_s21 }
 0x1de   :  { %1320 = vrot.lane.b32.xlu0 %v1005_v58, %s6853_s21 }
 0x1df   :  { %1490 = vperm.xlu1 %6431, %v1040_v53  }
 0x1e2   :  { %1510 = vperm.xlu0 %6430, %v1044_v52  }
 0x1e3   :  { %1485 = vperm.xlu1 %6431, %v1039_v60  }
 0x1e6   :  { %1505 = vperm.xlu0 %6430, %v1043_v55  }
 0x1e7   :  { %1480 = vperm.xlu1 %6431, %v1038_v61  }
 0x1ea   :  { %1500 = vperm.xlu0 %6430, %v1042_v62  }
 0x1eb   :  { %1475 = vperm.xlu1 %6431, %v1037_v5  }
 0x1ee   :  { %1495 = vperm.xlu0 %6430, %v1041_v11  }
 0x231   :  { %v1060_v18 = vpop.permute.xlu1 %1059 }
 0x232   :  { %6012 = vmatprep.subr.mxu1 %v1060_v18 }
 0x233   :  { %6013 = vmatpush3.msra.mxu1 %v1060_v18 }
 0x234   :  { %v1058_v19 = vpop.permute.xlu0 %1057 }
 0x235   :  { %6014 = vmatprep.subr.mxu1 %v1058_v19  ;;  %v1056_v21 = vpop.permute.xlu1 %1055 }
 0x236   :  { %6015 = vmatpush3.msra.mxu1 %v1058_v19 }
 0x237   :  { %6016 = vmatprep.subr.mxu1 %v1056_v21 }
 0x238   :  { %6017 = vmatpush3.msra.mxu1 %v1056_v21  ;;  %v1054_v63 = vpop.permute.xlu0 %1053 }
 0x239   :  { %6018 = vmatprep.subr.mxu1 %v1054_v63  ;;  %v1052_v6 = vpop.permute.xlu1 %1051 }
 0x23a   :  { %6019 = vmatpush3.msra.mxu1 %v1054_v63 }
 0x23b   :  { %6020 = vmatprep.subr.mxu1 %v1052_v6 }
 0x23c   :  { %6021 = vmatpush3.msra.mxu1 %v1052_v6  ;;  %v1050_v9 = vpop.permute.xlu0 %1049 }
 0x23d   :  { %6022 = vmatprep.subr.mxu1 %v1050_v9  ;;  %v1048_v23 = vpop.permute.xlu1 %1047 }
 0x23e   :  { %6023 = vmatpush3.msra.mxu1 %v1050_v9 }
 0x23f   :  { %6024 = vmatprep.subr.mxu1 %v1048_v23 }
 0x240   :  { %6025 = vmatpush3.msra.mxu1 %v1048_v23  ;;  %v1046_v25 = vpop.permute.xlu0 %1045 }
 0x241   :  { %6026 = vmatprep.subr.mxu1 %v1046_v25  ;;  %v1335_v26 = vpop.permute.xlu1 %1334 }
 0x242   :  { %6027 = vmatpush3.msra.mxu1 %v1046_v25  ;;  %6068 = vmatprep.subr.mxu0 %v1335_v26 }
 0x243   :  { %6029 = vmatmul.mubr.msk.f32.vlgmr.msra.gmra.mxu1 %vm1061_vm0, %v1022_v0  ;;  %6040 = vmatprep.subr.msk.mxu1 %vm7377_vm13, %v7366_v35 }
 0x244   :  { %6041 = vmatpush3.msk.msra.mxu1 %vm7377_vm13, %v7366_v35  ;;  %6069 = vmatpush3.msra.mxu0 %v1335_v26  ;;  %v1333_v13 = vpop.permute.xlu0 %1332  ;;  %v1025_v35 = vld [vmem:[%s8825_s1 + $0x1e0] sm:$0xff] }
 0x245   :  { %6042 = vmatprep.subr.msk.mxu1 %vm7377_vm13, %v7393_v54  ;;  %6070 = vmatprep.subr.mxu0 %v1333_v13  ;;  %v1331_v33 = vpop.permute.xlu1 %1330 }
 0x246   :  { %6031 = vmatprep.mubr.msk.f32.mxu1 %vm1061_vm0, %v1023_v29  ;;  %6043 = vmatpush3.msk.msra.mxu1 %vm7377_vm13, %v7393_v54  ;;  %v1015_v54 = vld [vmem:[%s8825_s1 + $0x190] sm:$0xff] }
 0x247   :  { %6071 = vmatpush3.msra.mxu0 %v1333_v13  ;;  %6032 = vmatmul.mubr.msk.f32.gmra.mxu1 %vm1061_vm0, %v1024_v30 }
 0x248   :  { %6044 = vmatprep.subr.msk.mxu1 %vm7377_vm13, %v7386_v47  ;;  %6072 = vmatprep.subr.mxu0 %v1331_v33  ;;  %v1329_v34 = vpop.permute.xlu0 %1328 }
 0x249   :  { %6045 = vmatpush3.msk.msra.mxu1 %vm7377_vm13, %v7386_v47  ;;  %6073 = vmatpush3.msra.mxu0 %v1331_v33  ;;  %v1327_v3 = vpop.permute.xlu1 %1326  ;;  %v1029_v47 = vld [vmem:[%s8825_s1 + $0x200] sm:$0xff] }
 0x24a   :  { %6046 = vmatprep.subr.msk.mxu1 %vm7377_vm13, %v7406_v15  ;;  %6074 = vmatprep.subr.mxu0 %v1329_v34 }
 0x24b   :  { %6034 = vmatprep.mubr.msk.f32.mxu1 %vm1061_vm0, %v1025_v35  ;;  %6047 = vmatpush3.msk.msra.mxu1 %vm7377_vm13, %v7406_v15  ;;  %v1035_v15 = vld [vmem:[%s8825_s1 + $0x230] sm:$0xff] }
 0x24c   :  { %6075 = vmatpush3.msra.mxu0 %v1329_v34  ;;  %6035 = vmatmul.mubr.msk.f32.gmra.mxu1 %vm1061_vm0, %v1026_v36  ;;  %v1325_v59 = vpop.permute.xlu0 %1324 }
 0x24d   :  { %6048 = vmatprep.subr.msk.mxu1 %vm7377_vm13, %v7416_v40  ;;  %6076 = vmatprep.subr.mxu0 %v1327_v3  ;;  %v1323_v45 = vpop.permute.xlu1 %1322 }
 0x24e   :  { %6049 = vmatpush3.msk.msra.mxu1 %vm7377_vm13, %v7416_v40  ;;  %6077 = vmatpush3.msra.mxu0 %v1327_v3 }
 0x24f   :  { %6050 = vmatprep.subr.msk.mxu1 %vm7377_vm13, %v7431_v20  ;;  %6078 = vmatprep.subr.mxu0 %v1325_v59 }
 0x250   :  { %6037 = vmatprep.mubr.msk.f32.mxu1 %vm1061_vm0, %v1027_v41  ;;  %6051 = vmatpush3.msk.msra.mxu1 %vm7377_vm13, %v7431_v20  ;;  %v1321_v37 = vpop.permute.xlu0 %1320 }
 0x251   :  { %6079 = vmatpush3.msra.mxu0 %v1325_v59  ;;  %6038 = vmatmul.mubr.msk.f32.gmra.mxu1 %vm1061_vm0, %v1028_v39 }
 0x252   :  { %6052 = vmatprep.subr.msk.mxu1 %vm7377_vm13, %v7438_v48  ;;  %6080 = vmatprep.subr.mxu0 %v1323_v45 }
 0x253   :  { %6053 = vmatpush3.msk.msra.mxu1 %vm7377_vm13, %v7438_v48  ;;  %6081 = vmatpush3.msra.mxu0 %v1323_v45 }
 0x254   :  { %6054 = vmatprep.subr.msk.mxu1 %vm7377_vm13, %v7446_v50  ;;  %6082 = vmatprep.subr.mxu0 %v1321_v37 }
 0x255   :  { %6055 = vmatpush3.msk.msra.mxu1 %vm7377_vm13, %v7446_v50  ;;  %6056 = vmatprep.mubr.msk.f32.mxu1 %vm1061_vm0, %v1029_v47 }
 0x256   :  { %6083 = vmatpush3.msra.mxu0 %v1321_v37  ;;  %6057 = vmatmul.mubr.msk.f32.vlgmr.msra.gmra.mxu1 %vm1061_vm0, %v1030_v10 }
 0x257   :  { %6085 = vmatmul.mubr.msk.f32.vlgmr.msra.gmra.mxu0 %vm1061_vm0, %v1014_v49  ;;  %6059 = vmatprep.mubr.msk.f32.mxu1 %vm1061_vm0, %v1031_v51 }
 0x258   :  { %6087 = vmatprep.mubr.msk.f32.mxu0 %vm1061_vm0, %v1015_v54 }
 0x25a   :  { %6060 = vmatmul.mubr.msk.f32.gmra.mxu1 %vm1061_vm0, %v1032_v28  ;;  %v1491_v8 = vpop.permute.xlu1 %1490 }
 0x25b   :  { %6088 = vmatmul.mubr.msk.f32.gmra.mxu0 %vm1061_vm0, %v1016_v7  ;;  %6062 = vmatprep.mubr.msk.f32.mxu1 %vm1061_vm0, %v1033_v46 }
 0x25c   :  { %6090 = vmatprep.mubr.msk.f32.mxu0 %vm1061_vm0, %v1017_v2 }
 0x25d   :  { %v1511_v27 = vpop.permute.xlu0 %1510 }
 0x25e   :  { %6063 = vmatmul.mubr.msk.f32.gmra.mxu1 %vm1061_vm0, %v1034_v57  ;;  %v1486_v20 = vpop.permute.xlu1 %1485 }
 0x25f   :  { %6091 = vmatmul.mubr.msk.f32.gmra.mxu0 %vm1061_vm0, %v1018_v44  ;;  %6065 = vmatprep.mubr.msk.f32.mxu1 %vm1061_vm0, %v1035_v15 }
 0x260   :  { %6093 = vmatprep.mubr.msk.f32.mxu0 %vm1061_vm0, %v1019_v16 }
 0x261   :  { %v1506_v42 = vpop.permute.xlu0 %1505 }
 0x262   :  { %6066 = vmatmul.mubr.msk.f32.gmra.mxu1 %vm1061_vm0, %v1036_v38  ;;  %v1481_v31 = vpop.permute.xlu1 %1480 }
 0x263   :  { %6094 = vmatmul.mubr.msk.f32.gmra.mxu0 %vm1061_vm0, %v1020_v12 }
 0x265   :  { %v1501_v25 = vpop.permute.xlu0 %1500 }
 0x266   :  { %v1476_v18 = vpop.permute.xlu1 %1475 }
 0x269   :  { %v1496_v7 = vpop.permute.xlu0 %1495 }
 0x303   :  { %v6030_v32 = vpop.f32.mrf.mxu1 }
 0x305   :  { %v1152_v40 = vpop.f32.mrf.mxu1 }
 0x307   :  { %v6033_v56 = vpop.f32.mrf.mxu1 }
 0x309   :  { %v1162_v22 = vpop.f32.mrf.mxu1 }
 0x30c   :  { %v6036_v17 = vpop.f32.mrf.mxu1 }
 0x30e   :  { %v1172_v1 = vpop.f32.mrf.mxu1 }
 0x311   :  { %v6039_v43 = vpop.f32.mrf.mxu1 }
 0x313   :  { %v1182_v48 = vpop.f32.mrf.mxu1 }
 0x316   :  { %v6058_v4 = vpop.f32.mrf.mxu1 }
 0x317   :  { %v1287_v50 = vadd.f32 %v6058_v4, %v6030_v32  ;;  %v6086_v14 = vpop.f32.mrf.mxu0 }
 0x318   :  { %v1281_v58 = vpop.f32.mrf.mxu1 }
 0x319   :  { %v1466_v53 = vadd.f32 %v6086_v14, %v1287_v50  ;;  %v1282_v52 = vadd.f32 %v1281_v58, %v1152_v40  ;;  %v1426_v60 = vpop.f32.mrf.mxu0 }
 0x31a   :  { %v6061_v55 = vpop.f32.mrf.mxu1 }
 0x31b   :  { %v7629_v61 = vadd.f32 %v1481_v31, %v1466_v53  ;;  %v1465_v62 = vadd.f32 %v1426_v60, %v1282_v52  ;;  %v1297_v5 = vadd.f32 %v6061_v55, %v6033_v56  ;;  %v6089_v11 = vpop.f32.mrf.mxu0 }
 0x31c   :  { %v1291_v19 = vpop.f32.mrf.mxu1 }
 0x31d   :  { %v7631_v21 = vadd.f32 %v1476_v18, %v1465_v62  ;;  %v1468_v63 = vadd.f32 %v6089_v11, %v1297_v5  ;;  %v1436_v6 = vpop.f32.mrf.mxu0  ;;  %v1292_v9 = vadd.f32 %v1291_v19, %v1162_v22  ;;  %v1530_v0 = vmin.f32 %v7629_v61, 0.0 }
 0x31e   :  { %v6064_v23 = vpop.f32.mrf.mxu1  ;;  %vm1522_vm5 = vcmp.gt.f32.partialorder %v7629_v61, 0.0 }
 0x31f   :  { %v7634_v26 = vadd.f32 %v1491_v8, %v1468_v63  ;;  %v6092_v29 = vpop.f32.mrf.mxu0  ;;  %v1529_v13 = vmin.f32 %v7631_v21, 0.0  ;;  %v1467_v30 = vadd.f32 %v1436_v6, %v1292_v9  ;;  %v1307_v33 = vadd.f32 %v6064_v23, %v6036_v17 }
 0x320   :  { %v1301_v34 = vpop.f32.mrf.mxu1  ;;  %v1539_v45 = vmul.f32 1.442695, %v1530_v0  ;;  %vm1521_vm14 = vcmp.gt.f32.partialorder %v7631_v21, 0.0 }
 0x321   :  { %v1532_v35 = vmin.f32 %v7634_v26, 0.0  ;;  %v1446_v3 = vpop.f32.mrf.mxu0  ;;  %v7638_v36 = vadd.f32 %v1486_v20, %v1467_v30  ;;  %v1470_v59 = vadd.f32 %v6092_v29, %v1307_v33  ;;  %v1302_v41 = vadd.f32 %v1301_v34, %v1172_v1 }
 0x322   :  { %v6067_v39 = vpop.f32.mrf.mxu1  ;;  %v1537_v10 = vmul.f32 1.442695, %v1529_v13  ;;  %6468 = vpow2.f32 %v1539_v45  ;;  %vm1524_vm7 = vcmp.gt.f32.partialorder %v7634_v26, 0.0  ;;  %v1589_v45 = vld [vmem:[%s8826_s2 + $0xc0] sm:$0xff] }
 0x323   :  { %v1317_v37 = vadd.f32 %v6067_v39, %v6039_v43  ;;  %v6095_v47 = vpop.f32.mrf.mxu0  ;;  %v1531_v49 = vmin.f32 %v7638_v36, 0.0  ;;  %v1518_v51 = vadd.f32 %v1501_v25, %v1470_v59  ;;  %v1469_v54 = vadd.f32 %v1446_v3, %v1302_v41  ;;  %v1590_v41 = vld [vmem:[%s8826_s2 + $0xc8] sm:$0xff]  ;;  %v1592_v39 = vld [vmem:[%s8826_s2 + $0xd8] sm:$0xff] }
 0x324   :  { %v1311_v28 = vpop.f32.mrf.mxu1  ;;  %v1543_v46 = vmul.f32 1.442695, %v1532_v35  ;;  %6470 = vpow2.f32 %v1537_v10  ;;  %vm1523_vm10 = vcmp.gt.f32.partialorder %v7638_v36, 0.0  ;;  %v6855_v59 = vmov 0.0   ;;  %v1995_v10 = vld [vmem:[%s8826_s2 + $0x150] sm:$0xff] }
 0x325   :  { %v1472_v2 = vadd.f32 %v6095_v47, %v1317_v37  ;;  %v1312_v57 = vadd.f32 %v1311_v28, %v1182_v48  ;;  %v1534_v44 = vmin.f32 %v1518_v51, 0.0  ;;  %v1517_v15 = vadd.f32 %v1496_v7, %v1469_v54  ;;  %v1456_v16 = vpop.f32.mrf.mxu0  ;;  %2239 = vst [vmem:[#allocation3] sm:$0xff] %v6855_v59  ;;  %2240 = vst [vmem:[#allocation3 + $0x8] sm:$0xff] %v6855_v59  ;;  %v1591_v37 = vld [vmem:[%s8826_s2 + $0xd0] sm:$0xff]  ;;  %v1996_v47 = vld [vmem:[%s8826_s2 + $0x158] sm:$0xff] }
 0x326   :  { %v1541_v38 = vmul.f32 1.442695, %v1531_v49  ;;  %6472 = vpow2.f32 %v1543_v46  ;;  %vm1526_vm8 = vcmp.gt.f32.partialorder %v1518_v51, 0.0  ;;  %2241 = vst [vmem:[#allocation3 + $0x10] sm:$0xff] %v6855_v59  ;;  %2242 = vst [vmem:[#allocation3 + $0x18] sm:$0xff] %v6855_v59  ;;  %v1994_v49 = vld [vmem:[%s8826_s2 + $0x148] sm:$0xff] }
 0x327   :  { %v1520_v12 = vadd.f32 %v1511_v27, %v1472_v2  ;;  %v1471_v32 = vadd.f32 %v1456_v16, %v1312_v57  ;;  %v1547_v40 = vmul.f32 1.442695, %v1534_v44  ;;  %v1533_v56 = vmin.f32 %v1517_v15, 0.0  ;;  %v2000_v54 = vld [vmem:[%s8826_s2 + $0x178] sm:$0xff]  ;;  %v1999_v28 = vld [vmem:[%s8826_s2 + $0x170] sm:$0xff]  ;;  %v1998_v7 = vld [vmem:[%s8826_s2 + $0x168] sm:$0xff] }
 0x328   :  { %vm1525_vm11 = vcmp.gt.f32.partialorder %v1517_v15, 0.0  ;;  %v1997_v46 = vld [vmem:[%s8826_s2 + $0x160] sm:$0xff]  ;;  %v2004_v2 = vld [vmem:[%s8826_s2 + $0x198] sm:$0xff]  ;;  %v2003_v57 = vld [vmem:[%s8826_s2 + $0x190] sm:$0xff] }
 0x329   :  { %v1536_v22 = vmin.f32 %v1520_v12, 0.0  ;;  %v1519_v8 = vadd.f32 %v1506_v42, %v1471_v32  ;;  %6474 = vpow2.f32 %v1547_v40  ;;  %v1545_v17 = vmul.f32 1.442695, %v1533_v56  ;;  %v1581_v42 = vld [vmem:[%s8825_s1 + $0x260] sm:$0xff]  ;;  %v2002_v44 = vld [vmem:[%s8826_s2 + $0x188] sm:$0xff]  ;;  %v1984_v16 = vld [vmem:[%s8826_s2 + $0xf8] sm:$0xff] }
 0x32a   :  { %6476 = vpow2.f32 %v1541_v38  ;;  %6104 = vmatprep.mubr.msk.f32.mxu1 %vm1601_vm6, %v1581_v42  ;;  %vm1528_vm9 = vcmp.gt.f32.partialorder %v1520_v12, 0.0  ;;  %v1983_v38 = vld [vmem:[%s8826_s2 + $0xf0] sm:$0xff]  ;;  %v1981_v32 = vld [vmem:[%s8826_s2 + $0xe0] sm:$0xff]  ;;  %v1580_v42 = vld [vmem:[%s8825_s1 + $0x258] sm:$0xff] }
 0x32b   :  { %v1551_v1 = vmul.f32 1.442695, %v1536_v22  ;;  %v1535_v20 = vmin.f32 %v1519_v8, 0.0  ;;  %6478 = vpow2.f32 %v1545_v17  ;;  %vm1527_vm12 = vcmp.gt.f32.partialorder %v1519_v8, 0.0  ;;  %v1582_v17 = vld [vmem:[%s8825_s1 + $0x268] sm:$0xff] }
 0x32d   :  { %6480 = vpow2.f32 %v1551_v1  ;;  %v1549_v43 = vmul.f32 1.442695, %v1535_v20  ;;  %v1583_v20 = vld [vmem:[%s8825_s1 + $0x270] sm:$0xff] }
 0x32f   :  { %6482 = vpow2.f32 %v1549_v43  ;;  %v6469_v48 = vpop.eup %6468 }
 0x330   :  { %v5324_v60 = vadd.f32 -1.0, %v6469_v48  ;;  %v1584_v48 = vld [vmem:[%s8825_s1 + $0x278] sm:$0xff] }
 0x331   :  { %v6471_v31 = vpop.eup %6470 }
 0x332   :  { %v5323_v18 = vadd.f32 -1.0, %v6471_v31  ;;  %v1562_v25 = vsel %vm1522_vm5, %v7629_v61, %v5324_v60  ;;  %v7817_v60 = vld [vmem:[%s8825_s1 + $0x300] sm:$0xff]  ;;  %vm3212_vm5 = vcmask 80960  }
 0x333   :  { %v6473_v4 = vpop.eup %6472 }
 0x334   :  { %v5326_v58 = vadd.f32 -1.0, %v6473_v4  ;;  %v1561_v34 = vsel %vm1521_vm14, %v7631_v21, %v5323_v18  ;;  %v7855_v18 = vld [vmem:[%s8825_s1 + $0x328] sm:$0xff] }
 0x336   :  { %v6475_v27 = vpop.eup %6474  ;;  %v1564_v19 = vsel %vm1524_vm7, %v7634_v26, %v5326_v58  ;;  %v1587_v58 = vld [vmem:[%s8825_s1 + $0x290] sm:$0xff]  ;;  %vm3514_vm7 = vcmask 97360  }
 0x337   :  { %v6477_v50 = vpop.eup %6476  ;;  %v5328_v53 = vadd.f32 -1.0, %v6475_v27  ;;  %v1585_v27 = vld [vmem:[%s8825_s1 + $0x280] sm:$0xff] }
 0x338   :  { %v6479_v14 = vpop.eup %6478  ;;  %v5325_v55 = vadd.f32 -1.0, %v6477_v50  ;;  %v1586_v50 = vld [vmem:[%s8825_s1 + $0x288] sm:$0xff] }
 0x339   :  { %v5327_v62 = vadd.f32 -1.0, %v6479_v14  ;;  %v1566_v63 = vsel %vm1526_vm8, %v1518_v51, %v5328_v53  ;;  %v1993_v51 = vld [vmem:[%s8826_s2 + $0x140] sm:$0xff]  ;;  %v1578_v14 = vld [vmem:[%s8825_s1 + $0x248] sm:$0xff]  ;;  %v1579_v53 = vld [vmem:[%s8825_s1 + $0x250] sm:$0xff]  ;;  %vm3816_vm8 = vcmask 113760  }
 0x33a   :  { %v6481_v52 = vpop.eup %6480  ;;  %v1563_v0 = vsel %vm1523_vm10, %v7638_v36, %v5325_v55  ;;  %v7661_v33 = vmax.f32 %v1562_v25, %v1566_v63  ;;  %v1577_v36 = vld [vmem:[%s8825_s1 + $0x240] sm:$0xff]  ;;  %v7827_v55 = vld [vmem:[%s8825_s1 + $0x308] sm:$0xff]  ;;  %v7869_v63 = vld [vmem:[%s8825_s1 + $0x338] sm:$0xff]  ;;  %vm4420_vm10 = vcmask 146560  }
 0x33b   :  { %v5330_v5 = vadd.f32 -1.0, %v6481_v52  ;;  %v1565_v29 = vsel %vm1525_vm11, %v1517_v15, %v5327_v62  ;;  %6132 = vmatprep.mubr.msk.f32.mxu0 %vm1601_vm6, %v1577_v36  ;;  %v2001_v15 = vld [vmem:[%s8826_s2 + $0x180] sm:$0xff]  ;;  %v1588_v52 = vld [vmem:[%s8825_s1 + $0x298] sm:$0xff]  ;;  %v7832_v62 = vld [vmem:[%s8825_s1 + $0x310] sm:$0xff]  ;;  %vm4722_vm11 = vcmask 162960  }
 0x33c   :  { %v6483_v11 = vpop.eup %6482  ;;  %v7668_v35 = vmax.f32 %v1561_v34, %v1565_v29  ;;  %v1574_v3 = vsel %vm7377_vm13, %v7661_v33, 0.0  ;;  %v7897_v25 = vld [vmem:[%s8825_s1 + $0x358] sm:$0xff] }
 0x33d   :  { %v1568_v6 = vsel %vm1528_vm9, %v1520_v12, %v5330_v5  ;;  %v5329_v9 = vadd.f32 -1.0, %v6483_v11  ;;  %v1982_v12 = vld [vmem:[%s8826_s2 + $0xe8] sm:$0xff]  ;;  %v7841_v5 = vld [vmem:[%s8825_s1 + $0x318] sm:$0xff]  ;;  %v7846_v11 = vld [vmem:[%s8825_s1 + $0x320] sm:$0xff]  ;;  %vm4118_vm9 = vcmask 130160  }
 0x33e   :  { %v7649_v23 = vmax.f32 %v1564_v19, %v1568_v6  ;;  %v1573_v21 = vsel %vm7377_vm13, %v7668_v35, 0.0  ;;  %v7860_v19 = vld [vmem:[%s8825_s1 + $0x330] sm:$0xff]  ;;  %v7874_v6 = vld [vmem:[%s8825_s1 + $0x340] sm:$0xff] }
 0x33f   :  { %v1567_v13 = vsel %vm1527_vm12, %v1519_v8, %v5329_v9  ;;  %v7883_v9 = vld [vmem:[%s8825_s1 + $0x348] sm:$0xff] }
 0x340   :  { %v1576_v26 = vsel %vm7377_vm13, %v7649_v23, 0.0  ;;  %v7659_v30 = vmax.f32 %v1563_v0, %v1567_v13  ;;  %v1957_v0 = vld [vmem:[%s8825_s1 + $0x2a0] sm:$0xff] }
 0x341   :  { %1599 = vrot.lane.b32.xlu1 %v1576_v26, %s6852_s0 }
 0x342   :  { %v1575_v61 = vsel %vm7377_vm13, %v7659_v30, 0.0 }
 0x343   :  { %1597 = vrot.lane.b32.xlu0 %v1575_v61, %s6852_s0 }
 0x345   :  { %1595 = vrot.lane.b32.xlu1 %v1574_v3, %s6852_s0 }
 0x347   :  { %1593 = vrot.lane.b32.xlu0 %v1573_v21, %s6852_s0 }
 0x349   :  { %1802 = vrot.lane.b32.xlu1 %v1576_v26, %s6853_s21 }
 0x34b   :  { %1800 = vrot.lane.b32.xlu0 %v1575_v61, %s6853_s21 }
 0x34d   :  { %1798 = vrot.lane.b32.xlu1 %v1574_v3, %s6853_s21 }
 0x34f   :  { %1796 = vrot.lane.b32.xlu0 %v1573_v21, %s6853_s21 }
 0x351   :  { %1912 = vperm.xlu1 %6431, %v1590_v41  }
 0x353   :  { %1922 = vperm.xlu0 %6430, %v1592_v39  }
 0x355   :  { %1907 = vperm.xlu1 %6431, %v1589_v45  }
 0x357   :  { %1917 = vperm.xlu0 %6430, %v1591_v37  }
 0x359   :  { %2272 = vperm.xlu1 %6431, %v1996_v47  }
 0x35b   :  { %2267 = vperm.xlu0 %6430, %v1995_v10  }
 0x35d   :  { %2262 = vperm.xlu1 %6431, %v1994_v49  }
 0x35f   :  { %2257 = vperm.xlu0 %6430, %v1993_v51  }
 0x361   :  { %2292 = vperm.xlu1 %6431, %v2000_v54  }
 0x363   :  { %2287 = vperm.xlu0 %6430, %v1999_v28  }
 0x365   :  { %2282 = vperm.xlu1 %6431, %v1998_v7  }
 0x367   :  { %2277 = vperm.xlu0 %6430, %v1997_v46  }
 0x369   :  { %2312 = vperm.xlu1 %6431, %v2004_v2  }
 0x36b   :  { %2307 = vperm.xlu0 %6430, %v2003_v57  }
 0x36d   :  { %2302 = vperm.xlu1 %6431, %v2002_v44  }
 0x36f   :  { %2297 = vperm.xlu0 %6430, %v2001_v15  }
 0x371   :  { %2022 = vperm.xlu1 %6431, %v1984_v16  }
 0x373   :  { %2017 = vperm.xlu0 %6430, %v1983_v38  }
 0x375   :  { %2012 = vperm.xlu1 %6431, %v1982_v12  }
 0x377   :  { %2007 = vperm.xlu0 %6430, %v1981_v32  }
 0x3b3   :  { %v1600_v40 = vpop.permute.xlu1 %1599 }
 0x3b4   :  { %6096 = vmatprep.subr.mxu1 %v1600_v40 }
 0x3b5   :  { %6097 = vmatpush3.msra.mxu1 %v1600_v40  ;;  %v1598_v56 = vpop.permute.xlu0 %1597 }
 0x3b6   :  { %6098 = vmatprep.subr.mxu1 %v1598_v56 }
 0x3b7   :  { %v1596_v22 = vpop.permute.xlu1 %1595  ;;  %6099 = vmatpush3.msra.mxu1 %v1598_v56 }
 0x3b8   :  { %6100 = vmatprep.subr.mxu1 %v1596_v22 }
 0x3b9   :  { %6101 = vmatpush3.msra.mxu1 %v1596_v22  ;;  %v1594_v8 = vpop.permute.xlu0 %1593 }
 0x3ba   :  { %6102 = vmatprep.subr.mxu1 %v1594_v8 }
 0x3bb   :  { %v1803_v1 = vpop.permute.xlu1 %1802  ;;  %6103 = vmatpush3.msra.mxu1 %v1594_v8 }
 0x3bc   :  { %6105 = vmatmul.mubr.msk.f32.vlgmr.msra.gmra.mxu1 %vm1601_vm6, %v1582_v17  ;;  %6110 = vmatprep.subr.msk.mxu1 %vm7377_vm13, %v7649_v23 }
 0x3bd   :  { %6124 = vmatprep.subr.mxu0 %v1803_v1  ;;  %6111 = vmatpush3.msk.msra.mxu1 %vm7377_vm13, %v7649_v23  ;;  %v1801_v43 = vpop.permute.xlu0 %1800  ;;  %v7888_v23 = vld [vmem:[%s8825_s1 + $0x350] sm:$0xff] }
 0x3be   :  { %6125 = vmatpush3.msra.mxu0 %v1803_v1  ;;  %6112 = vmatprep.subr.msk.mxu1 %vm7377_vm13, %v7659_v30 }
 0x3bf   :  { %6126 = vmatprep.subr.mxu0 %v1801_v43  ;;  %v1799_v31 = vpop.permute.xlu1 %1798  ;;  %6107 = vmatprep.mubr.msk.f32.mxu1 %vm1601_vm6, %v1583_v20 }
 0x3c0   :  { %6113 = vmatpush3.msk.msra.mxu1 %vm7377_vm13, %v7659_v30  ;;  %6127 = vmatpush3.msra.mxu0 %v1801_v43 }
 0x3c1   :  { %6108 = vmatmul.mubr.msk.f32.gmra.mxu1 %vm1601_vm6, %v1584_v48  ;;  %6114 = vmatprep.subr.msk.mxu1 %vm7377_vm13, %v7661_v33  ;;  %v1797_v4 = vpop.permute.xlu0 %1796 }
 0x3c2   :  { %6128 = vmatprep.subr.mxu0 %v1799_v31  ;;  %6115 = vmatpush3.msk.msra.mxu1 %vm7377_vm13, %v7661_v33 }
 0x3c3   :  { %6129 = vmatpush3.msra.mxu0 %v1799_v31  ;;  %6116 = vmatprep.subr.msk.mxu1 %vm7377_vm13, %v7668_v35 }
 0x3c4   :  { %6130 = vmatprep.subr.mxu0 %v1797_v4  ;;  %6117 = vmatpush3.msk.msra.mxu1 %vm7377_vm13, %v7668_v35 }
 0x3c5   :  { %6118 = vmatprep.mubr.msk.f32.mxu1 %vm1601_vm6, %v1585_v27  ;;  %6131 = vmatpush3.msra.mxu0 %v1797_v4 }
 0x3c6   :  { %6119 = vmatmul.mubr.msk.f32.vlgmr.msra.gmra.mxu1 %vm1601_vm6, %v1586_v50  ;;  %6133 = vmatmul.mubr.msk.f32.vlgmr.msra.gmra.mxu0 %vm1601_vm6, %v1578_v14 }
 0x3c7   :  { %6121 = vmatprep.mubr.msk.f32.mxu1 %vm1601_vm6, %v1587_v58  ;;  %6135 = vmatprep.mubr.msk.f32.mxu0 %vm1601_vm6, %v1579_v53 }
 0x3c8   :  { %6160 = vmatprep.subr.mxu0 %v6855_v59 }
 0x3c9   :  { %6161 = vmatpush3.msra.mxu0 %v6855_v59 }
 0x3ca   :  { %6122 = vmatmul.mubr.msk.f32.gmra.mxu1 %vm1601_vm6, %v1588_v52  ;;  %6136 = vmatmul.mubr.msk.f32.gmra.mxu0 %vm1601_vm6, %v1580_v42 }
 0x3cb   :  { %6162 = vmatprep.mubr.msk.f32.mxu0 %vm1601_vm6, %v7817_v60  ;;  %6142 = vmatprep.mubr.msk.f32.mxu1 %vm2065_vm15, %v1957_v0  ;;  %v1988_v0 = vld [vmem:[%s8826_s2 + $0x118] sm:$0xff] }
 0x3cc   :  { %v1913_v30 = vpop.permute.xlu1 %1912 }
 0x3ce   :  { %6163 = vmatmul.mubr.msk.f32.vlgmr.msra.gmra.mxu0 %vm1601_vm6, %v7827_v55  ;;  %v1923_v34 = vpop.permute.xlu0 %1922 }
 0x3cf   :  { %6165 = vmatprep.mubr.msk.f32.mxu0 %vm1601_vm6, %v7832_v62 }
 0x3d0   :  { %v1908_v59 = vpop.permute.xlu1 %1907 }
 0x3d2   :  { %6166 = vmatmul.mubr.msk.f32.gmra.mxu0 %vm1601_vm6, %v7841_v5  ;;  %v1918_v47 = vpop.permute.xlu0 %1917 }
 0x3d3   :  { %6168 = vmatprep.mubr.msk.f32.mxu0 %vm1601_vm6, %v7846_v11 }
 0x3d4   :  { %v7913_v12 = vpop.permute.xlu1 %2272 }
 0x3d6   :  { %6169 = vmatmul.mubr.msk.f32.gmra.mxu0 %vm1601_vm6, %v7855_v18  ;;  %v7915_v8 = vpop.permute.xlu0 %2267 }
 0x3d7   :  { %6171 = vmatprep.mubr.msk.f32.mxu0 %vm1601_vm6, %v7860_v19 }
 0x3d8   :  { %v7920_v27 = vpop.permute.xlu1 %2262 }
 0x3da   :  { %6172 = vmatmul.mubr.msk.f32.gmra.mxu0 %vm1601_vm6, %v7869_v63  ;;  %v7924_v53 = vpop.permute.xlu0 %2257 }
 0x3db   :  { %6174 = vmatprep.mubr.msk.f32.mxu0 %vm1601_vm6, %v7874_v6 }
 0x3de   :  { %6175 = vmatmul.mubr.msk.f32.gmra.mxu0 %vm1601_vm6, %v7883_v9 }
 0x3df   :  { %6177 = vmatprep.mubr.msk.f32.mxu0 %vm1601_vm6, %v7888_v23 }
 0x3e2   :  { %6178 = vmatmul.mubr.msk.f32.gmra.mxu0 %vm1601_vm6, %v7897_v25 }
 0x3e3   :  { %6214 = vmatprep.mubr.msk.f32.mxu0 %vm1601_vm6, %v7817_v60 }
 0x47c   :  { %v6106_v29 = vpop.f32.mrf.mxu1 }
 0x47e   :  { %v1680_v13 = vpop.f32.mrf.mxu1 }
 0x481   :  { %v6109_v26 = vpop.f32.mrf.mxu1 }
 0x483   :  { %v1690_v33 = vpop.f32.mrf.mxu1 }
 0x486   :  { %v6120_v61 = vpop.f32.mrf.mxu1  ;;  %v6134_v35 = vpop.f32.mrf.mxu0 }
 0x487   :  { %v1783_v3 = vadd.f32 %v6120_v61, %v6106_v29  ;;  %v1987_v29 = vld [vmem:[%s8826_s2 + $0x110] sm:$0xff] }
 0x488   :  { %v1777_v36 = vpop.f32.mrf.mxu1  ;;  %v1882_v21 = vpop.f32.mrf.mxu0 }
 0x489   :  { %v1902_v41 = vadd.f32 %v6134_v35, %v1783_v3  ;;  %v1778_v39 = vadd.f32 %v1777_v36, %v1680_v13  ;;  %v7943_v36 = vpop.permute.xlu0 %2287 }
 0x48a   :  { %v6123_v45 = vpop.f32.mrf.mxu1  ;;  %v6137_v37 = vpop.f32.mrf.mxu0 }
 0x48b   :  { %v7907_v10 = vadd.f32 %v1913_v30, %v1902_v41  ;;  %v1901_v49 = vadd.f32 %v1882_v21, %v1778_v39  ;;  %v1793_v51 = vadd.f32 %v6123_v45, %v6109_v26  ;;  %v1986_v30 = vld [vmem:[%s8826_s2 + $0x108] sm:$0xff] }
 0x48c   :  { %v1787_v54 = vpop.f32.mrf.mxu1  ;;  %v1892_v28 = vpop.f32.mrf.mxu0 }
 0x48d   :  { %v1934_v7 = vmin.f32 %v7907_v10, 0.0  ;;  %v7910_v46 = vadd.f32 %v1908_v59, %v1901_v49  ;;  %v1904_v2 = vadd.f32 %v6137_v37, %v1793_v51  ;;  %v1788_v57 = vadd.f32 %v1787_v54, %v1690_v33  ;;  %v7938_v33 = vpop.permute.xlu1 %2292 }
 0x48e   :  { %v6164_v44 = vpop.f32.mrf.mxu0  ;;  %vm1930_vm0 = vcmp.gt.f32.partialorder %v7907_v10, 0.0 }
 0x48f   :  { %v1939_v15 = vmul.f32 1.442695, %v1934_v7  ;;  %v1933_v16 = vmin.f32 %v7910_v46, 0.0  ;;  %v1928_v38 = vadd.f32 %v1923_v34, %v1904_v2  ;;  %v1903_v32 = vadd.f32 %v1892_v28, %v1788_v57  ;;  %v1985_v34 = vld [vmem:[%s8826_s2 + $0x100] sm:$0xff]  ;;  %v7955_v57 = vpop.permute.xlu0 %2277 }
 0x490   :  { %v2417_v40 = vpop.f32.mrf.mxu0  ;;  %v2423_v58 = vadd.f32 %v6164_v44, %v7920_v27  ;;  %vm1929_vm2 = vcmp.gt.f32.partialorder %v7910_v46, 0.0 }
 0x491   :  { %6484 = vpow2.f32 %v1939_v15  ;;  %v1937_v56 = vmul.f32 1.442695, %v1933_v16  ;;  %v1936_v22 = vmin.f32 %v1928_v38, 0.0  ;;  %v1927_v17 = vadd.f32 %v1918_v47, %v1903_v32  ;;  %v7950_v51 = vpop.permute.xlu1 %2282  ;;  %v1958_v32 = vld [vmem:[%s8825_s1 + $0x2a8] sm:$0xff] }
 0x492   :  { %v6167_v1 = vpop.f32.mrf.mxu0  ;;  %v2418_v52 = vadd.f32 %v2417_v40, %v7924_v53  ;;  %vm1932_vm1 = vcmp.gt.f32.partialorder %v1928_v38, 0.0  ;;  %v1959_v40 = vld [vmem:[%s8825_s1 + $0x2b0] sm:$0xff] }
 0x493   :  { %v1943_v20 = vmul.f32 1.442695, %v1936_v22  ;;  %v2433_v43 = vadd.f32 %v6167_v1, %v7913_v12  ;;  %6486 = vpow2.f32 %v1937_v56  ;;  %v1935_v48 = vmin.f32 %v1927_v17, 0.0  ;;  %v1991_v56 = vld [vmem:[%s8826_s2 + $0x130] sm:$0xff]  ;;  %v1990_v1 = vld [vmem:[%s8826_s2 + $0x128] sm:$0xff] }
 0x494   :  { %v2427_v31 = vpop.f32.mrf.mxu0  ;;  %vm1931_vm3 = vcmp.gt.f32.partialorder %v1927_v17, 0.0 }
 0x495   :  { %6488 = vpow2.f32 %v1943_v20  ;;  %v2428_v4 = vadd.f32 %v2427_v31, %v7915_v8  ;;  %2486 = vrot.lane.b32.xlu1 %v2433_v43, %s6853_s21  ;;  %v1941_v50 = vmul.f32 1.442695, %v1935_v48  ;;  %v7992_v20 = vpop.permute.xlu1 %2312  ;;  %v7996_v48 = vpop.permute.xlu0 %2307 }
 0x496   :  { %v6170_v14 = vpop.f32.mrf.mxu0 }
 0x497   :  { %2484 = vrot.lane.b32.xlu0 %v2428_v4, %s6853_s21  ;;  %6490 = vpow2.f32 %v1941_v50  ;;  %v2443_v2 = vadd.f32 %v6170_v14, %v7950_v51  ;;  %v1962_v4 = vld [vmem:[%s8825_s1 + $0x2c8] sm:$0xff]  ;;  %v1989_v50 = vld [vmem:[%s8826_s2 + $0x120] sm:$0xff]  ;;  %v1963_v14 = vld [vmem:[%s8825_s1 + $0x2d0] sm:$0xff] }
 0x498   :  { %v2437_v42 = vpop.f32.mrf.mxu0 }
 0x499   :  { %2482 = vrot.lane.b32.xlu1 %v2423_v58, %s6853_s21  ;;  %v2438_v15 = vadd.f32 %v2437_v42, %v7955_v57  ;;  %v1964_v42 = vld [vmem:[%s8825_s1 + $0x2d8] sm:$0xff] }
 0x49a   :  { %v6173_v26 = vpop.f32.mrf.mxu0 }
 0x49b   :  { %2480 = vrot.lane.b32.xlu0 %v2418_v52, %s6853_s21  ;;  %v2453_v41 = vadd.f32 %v6173_v26, %v7938_v33  ;;  %v8011_v52 = vpop.permute.xlu1 %2302 }
 0x49c   :  { %v2447_v21 = vpop.f32.mrf.mxu0 }
 0x49d   :  { %2042 = vperm.xlu1 %6431, %v1988_v0   ;;  %v2448_v49 = vadd.f32 %v2447_v21, %v7943_v36 }
 0x49e   :  { %v6485_v13 = vpop.eup %6484  ;;  %v6176_v28 = vpop.f32.mrf.mxu0 }
 0x49f   :  { %2037 = vperm.xlu0 %6430, %v1987_v29   ;;  %v5348_v35 = vadd.f32 -1.0, %v6485_v13  ;;  %v2463_v0 = vadd.f32 %v6176_v28, %v8011_v52  ;;  %v1965_v29 = vld [vmem:[%s8825_s1 + $0x2e0] sm:$0xff]  ;;  %v8022_v13 = vpop.permute.xlu0 %2297 }
 0x4a0   :  { %v6487_v61 = vpop.eup %6486 }
 0x4a1   :  { %2032 = vperm.xlu1 %6431, %v1986_v30   ;;  %v5347_v39 = vadd.f32 -1.0, %v6487_v61  ;;  %v1950_v37 = vsel %vm1930_vm0, %v7907_v10, %v5348_v35  ;;  %v1966_v30 = vld [vmem:[%s8825_s1 + $0x2e8] sm:$0xff]  ;;  %v1968_v61 = vld [vmem:[%s8825_s1 + $0x2f8] sm:$0xff]  ;;  %v2023_v35 = vpop.permute.xlu1 %2022 }
 0x4a2   :  { %v6489_v3 = vpop.eup %6488 }
 0x4a3   :  { %v5350_v59 = vadd.f32 -1.0, %v6489_v3  ;;  %2027 = vperm.xlu0 %6430, %v1985_v34   ;;  %v1949_v10 = vsel %vm1929_vm2, %v7910_v46, %v5347_v39  ;;  %v1992_v46 = vld [vmem:[%s8826_s2 + $0x138] sm:$0xff]  ;;  %v1967_v34 = vld [vmem:[%s8825_s1 + $0x2f0] sm:$0xff]  ;;  %v2018_v3 = vpop.permute.xlu0 %2017 }
 0x4a4   :  { %v6491_v45 = vpop.eup %6490 }
 0x4a5   :  { %v1952_v47 = vsel %vm1932_vm1, %v1928_v38, %v5350_v59  ;;  %2530 = vrot.lane.b32.xlu1 %v2453_v41, %s6853_s21  ;;  %v5349_v54 = vadd.f32 -1.0, %v6491_v45  ;;  %v2457_v38 = vpop.f32.mrf.mxu0  ;;  %v2013_v21 = vpop.permute.xlu1 %2012 }
 0x4a6   :  { %v1954_v7 = vmax.f32 %v1950_v37, %v1952_v47  ;;  %v2458_v26 = vadd.f32 %v2457_v38, %v8022_v13 }
 0x4a7   :  { %2528 = vrot.lane.b32.xlu0 %v2448_v49, %s6853_s21  ;;  %v1951_v44 = vsel %vm1931_vm3, %v1927_v17, %v5349_v54  ;;  %v6179_v22 = vpop.f32.mrf.mxu0  ;;  %v1960_v17 = vld [vmem:[%s8825_s1 + $0x2b8] sm:$0xff]  ;;  %v2008_v59 = vpop.permute.xlu0 %2007 }
 0x4a8   :  { %6138 = vmatprep.subr.msk.mxu1 %vm7377_vm13, %v1954_v7  ;;  %v1953_v16 = vmax.f32 %v1949_v10, %v1951_v44  ;;  %v2473_v43 = vadd.f32 %v6179_v22, %v7992_v20 }
 0x4a9   :  { %2526 = vrot.lane.b32.xlu1 %v2443_v2, %s6853_s21  ;;  %6139 = vmatpush3.msk.msra.mxu1 %vm7377_vm13, %v1954_v7  ;;  %v2467_v31 = vpop.f32.mrf.mxu0 }
 0x4aa   :  { %6140 = vmatprep.subr.msk.mxu1 %vm7377_vm13, %v1953_v16  ;;  %v2468_v58 = vadd.f32 %v2467_v31, %v7996_v48 }
 0x4ab   :  { %2524 = vrot.lane.b32.xlu0 %v2438_v15, %s6853_s21  ;;  %6141 = vmatpush3.msk.msra.mxu1 %vm7377_vm13, %v1953_v16  ;;  %vm2608_vm13 = vcmask 48160  }
 0x4ac   :  { %6143 = vmatmul.mubr.msk.f32.vlgmr.msra.gmra.mxu1 %vm2065_vm15, %v1958_v32 }
 0x4ad   :  { %2062 = vperm.xlu1 %6431, %v1992_v46   ;;  %6145 = vmatprep.mubr.msk.f32.mxu1 %vm2065_vm15, %v1959_v40 }
 0x4af   :  { %2057 = vperm.xlu0 %6430, %v1991_v56  }
 0x4b0   :  { %6146 = vmatmul.mubr.msk.f32.gmra.mxu1 %vm2065_vm15, %v1960_v17 }
 0x4b1   :  { %2052 = vperm.xlu1 %6431, %v1990_v1   ;;  %6148 = vmatprep.mubr.msk.f32.mxu1 %vm2065_vm15, %v1961_v24 }
 0x4b3   :  { %2574 = vrot.lane.b32.xlu0 %v2473_v43, %s6853_s21 }
 0x4b4   :  { %6149 = vmatmul.mubr.msk.f32.gmra.mxu1 %vm2065_vm15, %v1962_v4 }
 0x4b5   :  { %2047 = vperm.xlu1 %6431, %v1989_v50   ;;  %6151 = vmatprep.mubr.msk.f32.mxu1 %vm2065_vm15, %v1963_v14 }
 0x4b7   :  { %2572 = vrot.lane.b32.xlu0 %v2468_v58, %s6853_s21 }
 0x4b8   :  { %6152 = vmatmul.mubr.msk.f32.gmra.mxu1 %vm2065_vm15, %v1964_v42 }
 0x4b9   :  { %2570 = vrot.lane.b32.xlu1 %v2463_v0, %s6853_s21  ;;  %6154 = vmatprep.mubr.msk.f32.mxu1 %vm2065_vm15, %v1965_v29 }
 0x4bb   :  { %2568 = vrot.lane.b32.xlu0 %v2458_v26, %s6853_s21  ;;  %s6856_s21 = smov 124  }
 0x4bc   :  { %6155 = vmatmul.mubr.msk.f32.gmra.mxu1 %vm2065_vm15, %v1966_v30 }
 0x4bd   :  { %6157 = vmatprep.mubr.msk.f32.mxu1 %vm2065_vm15, %v1967_v34 }
 0x4c0   :  { %6158 = vmatmul.mubr.msk.f32.gmra.mxu1 %vm2065_vm15, %v1968_v61 }
 0x4c1   :  { %6188 = vmatprep.mubr.msk.f32.mxu1 %vm1601_vm6, %v7817_v60 }
 0x507   :  { %v2487_v41 = vpop.permute.xlu1 %2486 }
 0x509   :  { %v2485_v39 = vpop.permute.xlu0 %2484 }
 0x50b   :  { %v2483_v45 = vpop.permute.xlu1 %2482 }
 0x50d   :  { %v2481_v37 = vpop.permute.xlu0 %2480 }
 0x518   :  { %v2043_v47 = vpop.permute.xlu1 %2042 }
 0x51a   :  { %v2038_v49 = vpop.permute.xlu0 %2037 }
 0x51c   :  { %v2033_v54 = vpop.permute.xlu1 %2032 }
 0x51e   :  { %v2028_v28 = vpop.permute.xlu0 %2027 }
 0x520   :  { %v2531_v16 = vpop.permute.xlu1 %2530 }
 0x522   :  { %v2529_v56 = vpop.permute.xlu0 %2528 }
 0x524   :  { %v2527_v14 = vpop.permute.xlu1 %2526 }
 0x526   :  { %v2525_v26 = vpop.permute.xlu0 %2524 }
 0x56c   :  { %v6144_v7 = vpop.f32.mrf.mxu1 }
 0x56d   :  { %v8043_v2 = vadd.f32 %v6144_v7, %v2013_v21  ;;  %v2058_v7 = vpop.permute.xlu0 %2057 }
 0x56e   :  { %v2168_v10 = vpop.f32.mrf.mxu1 }
 0x56f   :  { %v2493_v44 = vadd.f32 %v2483_v45, %v8043_v2  ;;  %v8046_v15 = vadd.f32 %v2168_v10, %v2008_v59 }
 0x570   :  { %v6147_v38 = vpop.f32.mrf.mxu1 }
 0x571   :  { %v5378_v32 = vmul.f32 -1.442695, %v2493_v44  ;;  %v2492_v46 = vadd.f32 %v2481_v37, %v8046_v15  ;;  %v8049_v40 = vadd.f32 %v6147_v38, %v2023_v35  ;;  %v2063_v37 = vpop.permute.xlu1 %2062 }
 0x572   :  { %v2178_v22 = vpop.f32.mrf.mxu1 }
 0x573   :  { %6492 = vpow2.f32 %v5378_v32  ;;  %v5377_v17 = vmul.f32 -1.442695, %v2492_v46  ;;  %v2495_v1 = vadd.f32 %v2487_v41, %v8049_v40  ;;  %v8052_v24 = vadd.f32 %v2178_v22, %v2018_v3  ;;  %v2575_v46 = vpop.permute.xlu0 %2574 }
 0x574   :  { %v6150_v43 = vpop.f32.mrf.mxu1 }
 0x575   :  { %6494 = vpow2.f32 %v5377_v17  ;;  %v5380_v31 = vmul.f32 -1.442695, %v2495_v1  ;;  %v2494_v4 = vadd.f32 %v2485_v39, %v8052_v24  ;;  %v8055_v50 = vadd.f32 %v6150_v43, %v2033_v54  ;;  %v2053_v38 = vpop.permute.xlu1 %2052 }
 0x576   :  { %v2188_v58 = vpop.f32.mrf.mxu1 }
 0x577   :  { %6496 = vpow2.f32 %v5380_v31  ;;  %v5379_v42 = vmul.f32 -1.442695, %v2494_v4  ;;  %v8057_v0 = vadd.f32 %v2188_v58, %v2028_v28  ;;  %v2537_v29 = vadd.f32 %v2527_v14, %v8055_v50  ;;  %v2573_v31 = vpop.permute.xlu0 %2572 }
 0x578   :  { %v6153_v30 = vpop.f32.mrf.mxu1 }
 0x579   :  { %6498 = vpow2.f32 %v5379_v42  ;;  %v8060_v34 = vadd.f32 %v6153_v30, %v2043_v47  ;;  %v5382_v61 = vmul.f32 -1.442695, %v2537_v29  ;;  %v2536_v35 = vadd.f32 %v2525_v26, %v8057_v0  ;;  %v2048_v1 = vpop.permute.xlu1 %2047 }
 0x57a   :  { %v2198_v3 = vpop.f32.mrf.mxu1 }
 0x57b   :  { %v8063_v21 = vadd.f32 %v2198_v3, %v2038_v49  ;;  %v2539_v59 = vadd.f32 %v2531_v16, %v8060_v34  ;;  %v5381_v41 = vmul.f32 -1.442695, %v2536_v35  ;;  %6500 = vpow2.f32 %v5382_v61 }
 0x57c   :  { %v6156_v22 = vpop.f32.mrf.mxu1 }
 0x57d   :  { %v5384_v39 = vmul.f32 -1.442695, %v2539_v59  ;;  %v2538_v45 = vadd.f32 %v2529_v56, %v8063_v21  ;;  %6502 = vpow2.f32 %v5381_v41  ;;  %v2571_v30 = vpop.permute.xlu1 %2570  ;;  %v8067_v3 = vadd.f32 %v6156_v22, %v2053_v38 }
 0x57e   :  { %v2208_v4 = vpop.f32.mrf.mxu1 }
 0x57f   :  { %v5383_v54 = vmul.f32 -1.442695, %v2538_v45  ;;  %6504 = vpow2.f32 %v5384_v39  ;;  %v2569_v39 = vpop.permute.xlu0 %2568 }
 0x580   :  { %v6493_v28 = vpop.eup %6492  ;;  %v6159_v61 = vpop.f32.mrf.mxu1 }
 0x581   :  { %v2509_v47 = vadd.f32 1.0, %v6493_v28  ;;  %6506 = vpow2.f32 %v5383_v54  ;;  %v8069_v54 = vadd.f32 %v2208_v4, %v2048_v1 }
 0x582   :  { %v6495_v10 = vpop.eup %6494 }
 0x583   :  { %6508 = vrcp.f32 %v2509_v47  ;;  %v2508_v44 = vadd.f32 1.0, %v6495_v10 }
 0x584   :  { %v6497_v49 = vpop.eup %6496 }
 0x585   :  { %6510 = vrcp.f32 %v2508_v44  ;;  %v2511_v16 = vadd.f32 1.0, %v6497_v49  ;;  %v2218_v44 = vpop.f32.mrf.mxu1  ;;  %v8072_v49 = vadd.f32 %v6159_v61, %v2063_v37 }
 0x586   :  { %v6499_v32 = vpop.eup %6498 }
 0x587   :  { %6512 = vrcp.f32 %v2511_v16  ;;  %v2510_v56 = vadd.f32 1.0, %v6499_v32 }
 0x588   :  { %v6501_v17 = vpop.eup %6500 }
 0x589   :  { %6514 = vrcp.f32 %v2510_v56  ;;  %v2553_v58 = vadd.f32 1.0, %v6501_v17  ;;  %v8075_v56 = vadd.f32 %v2218_v44, %v2058_v7 }
 0x58a   :  { %v6503_v43 = vpop.eup %6502 }
 0x58b   :  { %v2552_v29 = vadd.f32 1.0, %v6503_v43  ;;  %6516 = vrcp.f32 %v2553_v58 }
 0x58c   :  { %v6505_v14 = vpop.eup %6504 }
 0x58d   :  { %v2555_v35 = vadd.f32 1.0, %v6505_v14  ;;  %6518 = vrcp.f32 %v2552_v29 }
 0x58e   :  { %v6507_v42 = vpop.eup %6506 }
 0x58f   :  { %v2554_v45 = vadd.f32 1.0, %v6507_v42  ;;  %6520 = vrcp.f32 %v2555_v35 }
 0x590   :  { %v6509_v26 = vpop.eup %6508 }
 0x591   :  { %v2581_v59 = vmul.f32 %v6509_v26, %v2571_v30 }
 0x592   :  { %v6511_v41 = vpop.eup %6510 }
 0x593   :  { %v2585_v28 = vadd.f32 %v2581_v59, %v8067_v3  ;;  %v2580_v47 = vmul.f32 %v6511_v41, %v2569_v39 }
 0x594   :  { %v6513_v10 = vpop.eup %6512 }
 0x595   :  { %v2583_v16 = vmul.f32 %v6513_v10, %v2575_v46  ;;  %6522 = vtanh.f32 %v2585_v28  ;;  %v2584_v38 = vadd.f32 %v2580_v47, %v8069_v54 }
 0x596   :  { %v6515_v32 = vpop.eup %6514  ;;  %6524 = vrcp.f32 %v2554_v45 }
 0x597   :  { %v2587_v22 = vadd.f32 %v2583_v16, %v8072_v49  ;;  %v2582_v17 = vmul.f32 %v6515_v32, %v2573_v31  ;;  %6526 = vtanh.f32 %v2584_v38 }
 0x598   :  { %v6517_v43 = vpop.eup %6516 }
 0x599   :  { %6528 = vtanh.f32 %v2587_v22  ;;  %v2586_v1 = vadd.f32 %v2582_v17, %v8075_v56  ;;  %v2593_v14 = vsub.f32 1.0, %v6517_v43  ;;  %v2601_v29 = vmul.f32 0.0, %v6517_v43 }
 0x59a   :  { %v6519_v4 = vpop.eup %6518 }
 0x59b   :  { %6530 = vtanh.f32 %v2586_v1  ;;  %v2592_v26 = vsub.f32 1.0, %v6519_v4  ;;  %v2600_v35 = vmul.f32 0.0, %v6519_v4 }
 0x59c   :  { %v6521_v37 = vpop.eup %6520 }
 0x59d   :  { %v2595_v7 = vsub.f32 1.0, %v6521_v37  ;;  %v2603_v39 = vmul.f32 0.0, %v6521_v37 }
 0x5a2   :  { %v6523_v46 = vpop.eup %6522 }
 0x5a3   :  { %v6525_v58 = vpop.eup %6524  ;;  %v2597_v42 = vmul.f32 %v6523_v46, %v2593_v14 }
 0x5a4   :  { %v6527_v30 = vpop.eup %6526  ;;  %v2594_v45 = vsub.f32 1.0, %v6525_v58  ;;  %v2602_v16 = vmul.f32 0.0, %v6525_v58 }
 0x5a5   :  { %v8079_v61 = vadd.f32 %v2601_v29, %v2597_v42  ;;  %v2596_v31 = vmul.f32 %v6527_v30, %v2592_v26 }
 0x5a6   :  { %v6529_v59 = vpop.eup %6528 }
 0x5a7   :  { %v2599_v41 = vmul.f32 %v6529_v59, %v2595_v7  ;;  %v8081_v28 = vadd.f32 %v2600_v35, %v2596_v31  ;;  %2610 = vst.msk [vmem:[#allocation3 + $0x8] sm:$0xff] %vm2608_vm13, %v8079_v61 }
 0x5a8   :  { %v6531_v47 = vpop.eup %6530 }
 0x5a9   :  { %v8085_v10 = vadd.f32 %v2603_v39, %v2599_v41  ;;  %v2598_v44 = vmul.f32 %v6531_v47, %v2594_v45  ;;  %2609 = vst.msk [vmem:[#allocation3] sm:$0xff] %vm2608_vm13, %v8081_v28 }
 0x5ab   :  { %2635 = vrot.lane.b32.xlu1 %v8085_v10, %s6856_s21  ;;  %v8090_v38 = vadd.f32 %v2602_v16, %v2598_v44  ;;  %2612 = vst.msk [vmem:[#allocation3 + $0x18] sm:$0xff] %vm2608_vm13, %v8085_v10 }
 0x5ad   :  { %2633 = vrot.lane.b32.xlu0 %v8090_v38, %s6856_s21  ;;  %2611 = vst.msk [vmem:[#allocation3 + $0x10] sm:$0xff] %vm2608_vm13, %v8090_v38 }
 0x5af   :  { %2631 = vrot.lane.b32.xlu1 %v8079_v61, %s6856_s21 }
 0x5b1   :  { %2629 = vrot.lane.b32.xlu0 %v8081_v28, %s6856_s21 }
 0x61d   :  { %v2636_v32 = vpop.permute.xlu1 %2635 }
 0x61e   :  { %6180 = vmatprep.subr.mxu1 %v2636_v32 }
 0x61f   :  { %6181 = vmatpush3.msra.mxu1 %v2636_v32  ;;  %v2634_v22 = vpop.permute.xlu0 %2633 }
 0x620   :  { %6182 = vmatprep.subr.mxu1 %v2634_v22 }
 0x621   :  { %v2632_v17 = vpop.permute.xlu1 %2631  ;;  %6183 = vmatpush3.msra.mxu1 %v2634_v22 }
 0x622   :  { %6184 = vmatprep.subr.mxu1 %v2632_v17 }
 0x623   :  { %6185 = vmatpush3.msra.mxu1 %v2632_v17  ;;  %v2630_v1 = vpop.permute.xlu0 %2629 }
 0x624   :  { %6186 = vmatprep.subr.mxu1 %v2630_v1 }
 0x625   :  { %6187 = vmatpush3.msra.mxu1 %v2630_v1 }
 0x626   :  { %6189 = vmatmul.mubr.msk.f32.vlgmr.msra.gmra.mxu1 %vm1601_vm6, %v7827_v55 }
 0x627   :  { %6191 = vmatprep.mubr.msk.f32.mxu1 %vm1601_vm6, %v7832_v62 }
 0x62a   :  { %6192 = vmatmul.mubr.msk.f32.gmra.mxu1 %vm1601_vm6, %v7841_v5 }
 0x62b   :  { %6194 = vmatprep.mubr.msk.f32.mxu1 %vm1601_vm6, %v7846_v11 }
 0x62e   :  { %6195 = vmatmul.mubr.msk.f32.gmra.mxu1 %vm1601_vm6, %v7855_v18 }
 0x62f   :  { %6197 = vmatprep.mubr.msk.f32.mxu1 %vm1601_vm6, %v7860_v19 }
 0x632   :  { %6198 = vmatmul.mubr.msk.f32.gmra.mxu1 %vm1601_vm6, %v7869_v63 }
 0x633   :  { %6200 = vmatprep.mubr.msk.f32.mxu1 %vm1601_vm6, %v7874_v6 }
 0x636   :  { %6201 = vmatmul.mubr.msk.f32.gmra.mxu1 %vm1601_vm6, %v7883_v9 }
 0x637   :  { %6203 = vmatprep.mubr.msk.f32.mxu1 %vm1601_vm6, %v7888_v23 }
 0x63a   :  { %6204 = vmatmul.mubr.msk.f32.gmra.mxu1 %vm1601_vm6, %v7897_v25 }
 0x63b   :  { %6240 = vmatprep.mubr.msk.f32.mxu1 %vm1601_vm6, %v7817_v60 }
 0x6e6   :  { %v6190_v55 = vpop.f32.mrf.mxu1 }
 0x6e7   :  { %v2713_v58 = vadd.f32 %v6190_v55, %v7920_v27 }
 0x6e8   :  { %v2707_v62 = vpop.f32.mrf.mxu1 }
 0x6e9   :  { %v2708_v29 = vadd.f32 %v2707_v62, %v7924_v53 }
 0x6ea   :  { %v6193_v43 = vpop.f32.mrf.mxu1 }
 0x6eb   :  { %v2723_v4 = vadd.f32 %v6193_v43, %v7913_v12 }
 0x6ec   :  { %v2717_v37 = vpop.f32.mrf.mxu1 }
 0x6ed   :  { %v2718_v14 = vadd.f32 %v2717_v37, %v7915_v8  ;;  %2776 = vrot.lane.b32.xlu1 %v2723_v4, %s6857_s26 }
 0x6ee   :  { %v6196_v46 = vpop.f32.mrf.mxu1 }
 0x6ef   :  { %2774 = vrot.lane.b32.xlu0 %v2718_v14, %s6857_s26  ;;  %v2733_v35 = vadd.f32 %v6196_v46, %v7950_v51 }
 0x6f0   :  { %v2727_v42 = vpop.f32.mrf.mxu1 }
 0x6f1   :  { %2772 = vrot.lane.b32.xlu1 %v2713_v58, %s6857_s26  ;;  %v2728_v41 = vadd.f32 %v2727_v42, %v7955_v57 }
 0x6f2   :  { %v6199_v26 = vpop.f32.mrf.mxu1 }
 0x6f3   :  { %v2743_v60 = vadd.f32 %v6199_v26, %v7938_v33  ;;  %2770 = vrot.lane.b32.xlu0 %v2708_v29, %s6857_s26 }
 0x6f4   :  { %v2737_v30 = vpop.f32.mrf.mxu1 }
 0x6f5   :  { %v2738_v7 = vadd.f32 %v2737_v30, %v7943_v36  ;;  %2820 = vrot.lane.b32.xlu1 %v2743_v60, %s6857_s26 }
 0x6f6   :  { %v6202_v31 = vpop.f32.mrf.mxu1 }
 0x6f7   :  { %2818 = vrot.lane.b32.xlu0 %v2738_v7, %s6857_s26  ;;  %v2753_v16 = vadd.f32 %v6202_v31, %v8011_v52 }
 0x6f8   :  { %v2747_v59 = vpop.f32.mrf.mxu1 }
 0x6f9   :  { %2816 = vrot.lane.b32.xlu1 %v2733_v35, %s6857_s26  ;;  %v2748_v32 = vadd.f32 %v2747_v59, %v8022_v13 }
 0x6fa   :  { %v6205_v39 = vpop.f32.mrf.mxu1 }
 0x6fb   :  { %v2763_v45 = vadd.f32 %v6205_v39, %v7992_v20  ;;  %2814 = vrot.lane.b32.xlu0 %v2728_v41, %s6857_s26 }
 0x6fc   :  { %v2757_v47 = vpop.f32.mrf.mxu1 }
 0x6fd   :  { %v2758_v44 = vadd.f32 %v2757_v47, %v7996_v48  ;;  %2864 = vrot.lane.b32.xlu1 %v2763_v45, %s6857_s26 }
 0x6ff   :  { %2862 = vrot.lane.b32.xlu0 %v2758_v44, %s6857_s26 }
 0x701   :  { %2860 = vrot.lane.b32.xlu1 %v2753_v16, %s6857_s26 }
 0x703   :  { %2858 = vrot.lane.b32.xlu0 %v2748_v32, %s6857_s26 }
 0x705   :  { %2896 = vrot.lane.b32.xlu1 %v8085_v10, %s6852_s0 }
 0x707   :  { %2894 = vrot.lane.b32.xlu0 %v8090_v38, %s6852_s0 }
 0x709   :  { %2892 = vrot.lane.b32.xlu1 %v8079_v61, %s6852_s0 }
 0x70b   :  { %2890 = vrot.lane.b32.xlu0 %v8081_v28, %s6852_s0 }
 0x75f   :  { %v2777_v22 = vpop.permute.xlu1 %2776 }
 0x760   :  { %v2785_v17 = vadd.f32 %v2777_v22, %v8049_v40 }
 0x761   :  { %v2775_v1 = vpop.permute.xlu0 %2774 }
 0x762   :  { %v5400_v55 = vmul.f32 -1.442695, %v2785_v17  ;;  %v2784_v62 = vadd.f32 %v2775_v1, %v8052_v24 }
 0x763   :  { %v2773_v43 = vpop.permute.xlu1 %2772 }
 0x764   :  { %6532 = vpow2.f32 %v5400_v55  ;;  %v5399_v4 = vmul.f32 -1.442695, %v2784_v62  ;;  %v2783_v10 = vadd.f32 %v2773_v43, %v8043_v2 }
 0x765   :  { %v2771_v37 = vpop.permute.xlu0 %2770 }
 0x766   :  { %6534 = vpow2.f32 %v5399_v4  ;;  %v5398_v38 = vmul.f32 -1.442695, %v2783_v10  ;;  %v2782_v61 = vadd.f32 %v2771_v37, %v8046_v15 }
 0x767   :  { %v2821_v14 = vpop.permute.xlu1 %2820 }
 0x768   :  { %6536 = vpow2.f32 %v5398_v38  ;;  %v5397_v28 = vmul.f32 -1.442695, %v2782_v61  ;;  %v2829_v46 = vadd.f32 %v2821_v14, %v8060_v34 }
 0x769   :  { %v2819_v58 = vpop.permute.xlu0 %2818 }
 0x76a   :  { %6538 = vpow2.f32 %v5397_v28  ;;  %v5404_v42 = vmul.f32 -1.442695, %v2829_v46  ;;  %v2828_v29 = vadd.f32 %v2819_v58, %v8063_v21 }
 0x76b   :  { %v2817_v26 = vpop.permute.xlu1 %2816 }
 0x76c   :  { %v5403_v60 = vmul.f32 -1.442695, %v2828_v29  ;;  %v2827_v30 = vadd.f32 %v2817_v26, %v8055_v50  ;;  %6540 = vpow2.f32 %v5404_v42 }
 0x76d   :  { %v2815_v7 = vpop.permute.xlu0 %2814 }
 0x76e   :  { %v5402_v31 = vmul.f32 -1.442695, %v2827_v30  ;;  %v2826_v35 = vadd.f32 %v2815_v7, %v8057_v0  ;;  %6542 = vpow2.f32 %v5403_v60 }
 0x76f   :  { %v2865_v43 = vpop.permute.xlu1 %2864 }
 0x770   :  { %v5401_v59 = vmul.f32 -1.442695, %v2826_v35  ;;  %6544 = vpow2.f32 %v5402_v31 }
 0x771   :  { %v6533_v41 = vpop.eup %6532  ;;  %v2863_v61 = vpop.permute.xlu0 %2862 }
 0x772   :  { %v2801_v39 = vadd.f32 1.0, %v6533_v41  ;;  %6546 = vpow2.f32 %v5401_v59 }
 0x773   :  { %v6535_v45 = vpop.eup %6534  ;;  %v2861_v26 = vpop.permute.xlu1 %2860 }
 0x774   :  { %6548 = vrcp.f32 %v2801_v39  ;;  %v2800_v47 = vadd.f32 1.0, %v6535_v45 }
 0x775   :  { %v6537_v44 = vpop.eup %6536  ;;  %v2859_v31 = vpop.permute.xlu0 %2858 }
 0x776   :  { %6550 = vrcp.f32 %v2800_v47  ;;  %v2799_v16 = vadd.f32 1.0, %v6537_v44 }
 0x777   :  { %v6539_v32 = vpop.eup %6538  ;;  %v2897_v47 = vpop.permute.xlu1 %2896 }
 0x778   :  { %6552 = vrcp.f32 %v2799_v16  ;;  %v2798_v22 = vadd.f32 1.0, %v6539_v32 }
 0x779   :  { %v6541_v17 = vpop.eup %6540 }
 0x77a   :  { %6554 = vrcp.f32 %v2798_v22  ;;  %v2845_v62 = vadd.f32 1.0, %v6541_v17  ;;  %v2895_v22 = vpop.permute.xlu0 %2894 }
 0x77b   :  { %v6543_v1 = vpop.eup %6542 }
 0x77c   :  { %v2844_v10 = vadd.f32 1.0, %v6543_v1  ;;  %6556 = vrcp.f32 %v2845_v62 }
 0x77d   :  { %v6545_v55 = vpop.eup %6544 }
 0x77e   :  { %v2843_v38 = vadd.f32 1.0, %v6545_v55  ;;  %6558 = vrcp.f32 %v2844_v10 }
 0x77f   :  { %v6547_v4 = vpop.eup %6546 }
 0x780   :  { %v2842_v46 = vadd.f32 1.0, %v6547_v4  ;;  %6560 = vrcp.f32 %v2843_v38 }
 0x781   :  { %v6549_v37 = vpop.eup %6548 }
 0x782   :  { %v2873_v14 = vmul.f32 %v6549_v37, %v2865_v43 }
 0x783   :  { %v6551_v28 = vpop.eup %6550 }
 0x784   :  { %v2877_v58 = vadd.f32 %v2873_v14, %v8072_v49  ;;  %v2872_v42 = vmul.f32 %v6551_v28, %v2863_v61  ;;  %v2893_v14 = vpop.permute.xlu1 %2892 }
 0x785   :  { %v6553_v29 = vpop.eup %6552 }
 0x786   :  { %6562 = vtanh.f32 %v2877_v58  ;;  %v2876_v60 = vadd.f32 %v2872_v42, %v8075_v56  ;;  %v2871_v30 = vmul.f32 %v6553_v29, %v2861_v26  ;;  %v2891_v26 = vpop.permute.xlu0 %2890 }
 0x787   :  { %v6555_v7 = vpop.eup %6554  ;;  %6564 = vrcp.f32 %v2842_v46 }
 0x788   :  { %6566 = vtanh.f32 %v2876_v60  ;;  %v2875_v35 = vadd.f32 %v2871_v30, %v8067_v3  ;;  %v2870_v59 = vmul.f32 %v6555_v7, %v2859_v31 }
 0x789   :  { %v6557_v39 = vpop.eup %6556 }
 0x78a   :  { %6568 = vtanh.f32 %v2875_v35  ;;  %v2874_v41 = vadd.f32 %v2870_v59, %v8069_v54  ;;  %v2885_v16 = vsub.f32 1.0, %v6557_v39  ;;  %v2905_v55 = vmul.f32 %v6557_v39, %v2897_v47  ;;  %v8185_v47 = vld [vmem:[%s8825_s1 + $0x310] sm:$0xff] }
 0x78b   :  { %v6559_v45 = vpop.eup %6558 }
 0x78c   :  { %6570 = vtanh.f32 %v2874_v41  ;;  %v2884_v62 = vsub.f32 1.0, %v6559_v45  ;;  %v2904_v37 = vmul.f32 %v6559_v45, %v2895_v22  ;;  %v8178_v45 = vld [vmem:[%s8825_s1 + $0x308] sm:$0xff] }
 0x78d   :  { %v6561_v44 = vpop.eup %6560 }
 0x78e   :  { %v2883_v38 = vsub.f32 1.0, %v6561_v44  ;;  %v2903_v58 = vmul.f32 %v6561_v44, %v2893_v14 }
 0x793   :  { %v6563_v32 = vpop.eup %6562 }
 0x794   :  { %v6565_v17 = vpop.eup %6564  ;;  %v2889_v1 = vmul.f32 %v6563_v32, %v2885_v16 }
 0x795   :  { %v6567_v43 = vpop.eup %6566  ;;  %v2882_v42 = vsub.f32 1.0, %v6565_v17  ;;  %v2902_v7 = vmul.f32 %v6565_v17, %v2891_v26 }
 0x796   :  { %v8155_v4 = vadd.f32 %v2905_v55, %v2889_v1  ;;  %v2888_v10 = vmul.f32 %v6567_v43, %v2884_v62 }
 0x797   :  { %v6569_v61 = vpop.eup %6568 }
 0x798   :  { %2914 = vst.msk [vmem:[#allocation3 + $0x18] sm:$0xff] %vm2910_vm4, %v8155_v4  ;;  %v8159_v28 = vadd.f32 %v2904_v37, %v2888_v10  ;;  %v2887_v46 = vmul.f32 %v6569_v61, %v2883_v38  ;;  %2937 = vrot.lane.b32.xlu1 %v8155_v4, %s6858_s27 }
 0x799   :  { %v6571_v29 = vpop.eup %6570 }
 0x79a   :  { %2913 = vst.msk [vmem:[#allocation3 + $0x10] sm:$0xff] %vm2910_vm4, %v8159_v28  ;;  %v8164_v60 = vadd.f32 %v2903_v58, %v2887_v46  ;;  %v2886_v30 = vmul.f32 %v6571_v29, %v2882_v42  ;;  %2935 = vrot.lane.b32.xlu0 %v8159_v28, %s6858_s27 }
 0x79c   :  { %2912 = vst.msk [vmem:[#allocation3 + $0x8] sm:$0xff] %vm2910_vm4, %v8164_v60  ;;  %v8169_v31 = vadd.f32 %v2902_v7, %v2886_v30  ;;  %2933 = vrot.lane.b32.xlu1 %v8164_v60, %s6858_s27 }
 0x79e   :  { %2911 = vst.msk [vmem:[#allocation3] sm:$0xff] %vm2910_vm4, %v8169_v31  ;;  %2931 = vrot.lane.b32.xlu0 %v8169_v31, %s6858_s27  ;;  %s6861_s27 = smov 10  }
 0x80a   :  { %v2938_v35 = vpop.permute.xlu1 %2937 }
 0x80b   :  { %6206 = vmatprep.subr.mxu0 %v2938_v35 }
 0x80c   :  { %6207 = vmatpush3.msra.mxu0 %v2938_v35  ;;  %v2936_v59 = vpop.permute.xlu0 %2935 }
 0x80d   :  { %6208 = vmatprep.subr.mxu0 %v2936_v59 }
 0x80e   :  { %v2934_v41 = vpop.permute.xlu1 %2933  ;;  %6209 = vmatpush3.msra.mxu0 %v2936_v59 }
 0x80f   :  { %6210 = vmatprep.subr.mxu0 %v2934_v41 }
 0x810   :  { %6211 = vmatpush3.msra.mxu0 %v2934_v41  ;;  %v2932_v39 = vpop.permute.xlu0 %2931 }
 0x811   :  { %6212 = vmatprep.subr.mxu0 %v2932_v39 }
 0x812   :  { %6213 = vmatpush3.msra.mxu0 %v2932_v39 }
 0x813   :  { %6215 = vmatmul.mubr.msk.f32.vlgmr.msra.gmra.mxu0 %vm1601_vm6, %v8178_v45 }
 0x814   :  { %6217 = vmatprep.mubr.msk.f32.mxu0 %vm1601_vm6, %v8185_v47 }
 0x817   :  { %6218 = vmatmul.mubr.msk.f32.gmra.mxu0 %vm1601_vm6, %v7841_v5  ;;  %v8210_v5 = vld [vmem:[%s8825_s1 + $0x300] sm:$0xff] }
 0x818   :  { %6220 = vmatprep.mubr.msk.f32.mxu0 %vm1601_vm6, %v7846_v11 }
 0x81b   :  { %6221 = vmatmul.mubr.msk.f32.gmra.mxu0 %vm1601_vm6, %v7855_v18 }
 0x81c   :  { %6223 = vmatprep.mubr.msk.f32.mxu0 %vm1601_vm6, %v7860_v19 }
 0x81f   :  { %6224 = vmatmul.mubr.msk.f32.gmra.mxu0 %vm1601_vm6, %v7869_v63 }
 0x820   :  { %6226 = vmatprep.mubr.msk.f32.mxu0 %vm1601_vm6, %v7874_v6 }
 0x823   :  { %6227 = vmatmul.mubr.msk.f32.gmra.mxu0 %vm1601_vm6, %v7883_v9 }
 0x824   :  { %6229 = vmatprep.mubr.msk.f32.mxu0 %vm1601_vm6, %v7888_v23 }
 0x827   :  { %6230 = vmatmul.mubr.msk.f32.gmra.mxu0 %vm1601_vm6, %v7897_v25 }
 0x828   :  { %6266 = vmatprep.mubr.msk.f32.mxu0 %vm1601_vm6, %v8210_v5 }
 0x8d3   :  { %v6216_v11 = vpop.f32.mrf.mxu0 }
 0x8d4   :  { %v3015_v25 = vadd.f32 %v6216_v11, %v7920_v27 }
 0x8d5   :  { %v3009_v18 = vpop.f32.mrf.mxu0 }
 0x8d6   :  { %v3010_v16 = vadd.f32 %v3009_v18, %v7924_v53 }
 0x8d7   :  { %v6219_v19 = vpop.f32.mrf.mxu0 }
 0x8d8   :  { %v3025_v63 = vadd.f32 %v6219_v19, %v7913_v12 }
 0x8d9   :  { %v3019_v6 = vpop.f32.mrf.mxu0 }
 0x8da   :  { %v3020_v9 = vadd.f32 %v3019_v6, %v7915_v8  ;;  %3078 = vrot.lane.b32.xlu1 %v3025_v63, %s6859_s7 }
 0x8db   :  { %v6222_v23 = vpop.f32.mrf.mxu0 }
 0x8dc   :  { %3076 = vrot.lane.b32.xlu0 %v3020_v9, %s6859_s7  ;;  %v3035_v62 = vadd.f32 %v6222_v23, %v7950_v51 }
 0x8dd   :  { %v3029_v44 = vpop.f32.mrf.mxu0 }
 0x8de   :  { %3074 = vrot.lane.b32.xlu1 %v3015_v25, %s6859_s7  ;;  %v3030_v10 = vadd.f32 %v3029_v44, %v7955_v57 }
 0x8df   :  { %v6225_v32 = vpop.f32.mrf.mxu0 }
 0x8e0   :  { %v3045_v22 = vadd.f32 %v6225_v32, %v7938_v33  ;;  %3072 = vrot.lane.b32.xlu0 %v3010_v16, %s6859_s7 }
 0x8e1   :  { %v3039_v17 = vpop.f32.mrf.mxu0 }
 0x8e2   :  { %v3040_v1 = vadd.f32 %v3039_v17, %v7943_v36  ;;  %3122 = vrot.lane.b32.xlu1 %v3045_v22, %s6859_s7 }
 0x8e3   :  { %v6228_v55 = vpop.f32.mrf.mxu0 }
 0x8e4   :  { %3120 = vrot.lane.b32.xlu0 %v3040_v1, %s6859_s7  ;;  %v3055_v46 = vadd.f32 %v6228_v55, %v8011_v52 }
 0x8e5   :  { %v3049_v43 = vpop.f32.mrf.mxu0 }
 0x8e6   :  { %3118 = vrot.lane.b32.xlu1 %v3035_v62, %s6859_s7  ;;  %v3050_v58 = vadd.f32 %v3049_v43, %v8022_v13 }
 0x8e7   :  { %v6231_v37 = vpop.f32.mrf.mxu0 }
 0x8e8   :  { %v3065_v38 = vadd.f32 %v6231_v37, %v7992_v20  ;;  %3116 = vrot.lane.b32.xlu0 %v3030_v10, %s6859_s7 }
 0x8e9   :  { %v3059_v61 = vpop.f32.mrf.mxu0 }
 0x8ea   :  { %v3060_v14 = vadd.f32 %v3059_v61, %v7996_v48  ;;  %3166 = vrot.lane.b32.xlu1 %v3065_v38, %s6859_s7 }
 0x8ec   :  { %3164 = vrot.lane.b32.xlu0 %v3060_v14, %s6859_s7 }
 0x8ee   :  { %3162 = vrot.lane.b32.xlu1 %v3055_v46, %s6859_s7 }
 0x8f0   :  { %3160 = vrot.lane.b32.xlu0 %v3050_v58, %s6859_s7 }
 0x8f2   :  { %3198 = vrot.lane.b32.xlu1 %v8155_v4, %s6852_s0 }
 0x8f4   :  { %3196 = vrot.lane.b32.xlu0 %v8159_v28, %s6852_s0 }
 0x8f6   :  { %3194 = vrot.lane.b32.xlu1 %v8164_v60, %s6852_s0 }
 0x8f8   :  { %3192 = vrot.lane.b32.xlu0 %v8169_v31, %s6852_s0 }
 0x94c   :  { %v3079_v42 = vpop.permute.xlu1 %3078 }
 0x94d   :  { %v3087_v29 = vadd.f32 %v3079_v42, %v8049_v40 }
 0x94e   :  { %v3077_v26 = vpop.permute.xlu0 %3076 }
 0x94f   :  { %v5420_v30 = vmul.f32 -1.442695, %v3087_v29  ;;  %v3086_v7 = vadd.f32 %v3077_v26, %v8052_v24 }
 0x950   :  { %v3075_v35 = vpop.permute.xlu1 %3074 }
 0x951   :  { %6572 = vpow2.f32 %v5420_v30  ;;  %v5419_v59 = vmul.f32 -1.442695, %v3086_v7  ;;  %v3085_v4 = vadd.f32 %v3075_v35, %v8043_v2 }
 0x952   :  { %v3073_v41 = vpop.permute.xlu0 %3072 }
 0x953   :  { %6574 = vpow2.f32 %v5419_v59  ;;  %v5418_v28 = vmul.f32 -1.442695, %v3085_v4  ;;  %v3084_v60 = vadd.f32 %v3073_v41, %v8046_v15 }
 0x954   :  { %v3123_v39 = vpop.permute.xlu1 %3122 }
 0x955   :  { %6576 = vpow2.f32 %v5418_v28  ;;  %v5417_v31 = vmul.f32 -1.442695, %v3084_v60  ;;  %v3131_v11 = vadd.f32 %v3123_v39, %v8060_v34 }
 0x956   :  { %v3121_v18 = vpop.permute.xlu0 %3120 }
 0x957   :  { %6578 = vpow2.f32 %v5417_v31  ;;  %v5424_v19 = vmul.f32 -1.442695, %v3131_v11  ;;  %v3130_v63 = vadd.f32 %v3121_v18, %v8063_v21 }
 0x958   :  { %v3119_v6 = vpop.permute.xlu1 %3118 }
 0x959   :  { %v5423_v9 = vmul.f32 -1.442695, %v3130_v63  ;;  %v3129_v23 = vadd.f32 %v3119_v6, %v8055_v50  ;;  %6580 = vpow2.f32 %v5424_v19 }
 0x95a   :  { %v3117_v25 = vpop.permute.xlu0 %3116 }
 0x95b   :  { %v5422_v44 = vmul.f32 -1.442695, %v3129_v23  ;;  %v3128_v16 = vadd.f32 %v3117_v25, %v8057_v0  ;;  %6582 = vpow2.f32 %v5423_v9 }
 0x95c   :  { %v3167_v58 = vpop.permute.xlu1 %3166 }
 0x95d   :  { %v5421_v32 = vmul.f32 -1.442695, %v3128_v16  ;;  %6584 = vpow2.f32 %v5422_v44 }
 0x95e   :  { %v6573_v22 = vpop.eup %6572  ;;  %v3165_v7 = vpop.permute.xlu0 %3164 }
 0x95f   :  { %v3103_v17 = vadd.f32 1.0, %v6573_v22  ;;  %6586 = vpow2.f32 %v5421_v32 }
 0x960   :  { %v6575_v1 = vpop.eup %6574  ;;  %v3163_v39 = vpop.permute.xlu1 %3162 }
 0x961   :  { %6588 = vrcp.f32 %v3103_v17  ;;  %v3102_v55 = vadd.f32 1.0, %v6575_v1 }
 0x962   :  { %v6577_v62 = vpop.eup %6576  ;;  %v3161_v19 = vpop.permute.xlu0 %3160 }
 0x963   :  { %6590 = vrcp.f32 %v3102_v55  ;;  %v3101_v43 = vadd.f32 1.0, %v6577_v62 }
 0x964   :  { %v6579_v10 = vpop.eup %6578  ;;  %v3199_v44 = vpop.permute.xlu1 %3198 }
 0x965   :  { %6592 = vrcp.f32 %v3101_v43  ;;  %v3100_v37 = vadd.f32 1.0, %v6579_v10 }
 0x966   :  { %v6581_v38 = vpop.eup %6580  ;;  %v3197_v17 = vpop.permute.xlu0 %3196 }
 0x967   :  { %6594 = vrcp.f32 %v3100_v37  ;;  %v3147_v46 = vadd.f32 1.0, %v6581_v38 }
 0x968   :  { %v6583_v61 = vpop.eup %6582 }
 0x969   :  { %v3146_v29 = vadd.f32 1.0, %v6583_v61  ;;  %6596 = vrcp.f32 %v3147_v46 }
 0x96a   :  { %v6585_v14 = vpop.eup %6584 }
 0x96b   :  { %v3145_v30 = vadd.f32 1.0, %v6585_v14  ;;  %6598 = vrcp.f32 %v3146_v29 }
 0x96c   :  { %v6587_v42 = vpop.eup %6586 }
 0x96d   :  { %v3144_v4 = vadd.f32 1.0, %v6587_v42  ;;  %6600 = vrcp.f32 %v3145_v30 }
 0x96e   :  { %v6589_v26 = vpop.eup %6588 }
 0x96f   :  { %v3175_v35 = vmul.f32 %v6589_v26, %v3167_v58  ;;  %v3195_v58 = vpop.permute.xlu1 %3194 }
 0x970   :  { %v6591_v59 = vpop.eup %6590 }
 0x971   :  { %v3179_v41 = vadd.f32 %v3175_v35, %v8072_v49  ;;  %v3174_v28 = vmul.f32 %v6591_v59, %v3165_v7  ;;  %v3193_v35 = vpop.permute.xlu0 %3192 }
 0x972   :  { %v6593_v60 = vpop.eup %6592 }
 0x973   :  { %6602 = vtanh.f32 %v3179_v41  ;;  %v3178_v31 = vadd.f32 %v3174_v28, %v8075_v56  ;;  %v3173_v11 = vmul.f32 %v6593_v60, %v3163_v39 }
 0x974   :  { %v6595_v18 = vpop.eup %6594  ;;  %6604 = vrcp.f32 %v3144_v4 }
 0x975   :  { %6606 = vtanh.f32 %v3178_v31  ;;  %v3177_v63 = vadd.f32 %v3173_v11, %v8067_v3  ;;  %v3172_v6 = vmul.f32 %v6595_v18, %v3161_v19  ;;  %v8273_v18 = vld [vmem:[%s8825_s1 + $0x318] sm:$0xff]  ;;  %v8280_v19 = vld [vmem:[%s8825_s1 + $0x320] sm:$0xff] }
 0x976   :  { %v6597_v23 = vpop.eup %6596 }
 0x977   :  { %6608 = vtanh.f32 %v3177_v63  ;;  %v3176_v9 = vadd.f32 %v3172_v6, %v8069_v54  ;;  %v3187_v32 = vsub.f32 1.0, %v6597_v23  ;;  %v3207_v62 = vmul.f32 %v6597_v23, %v3199_v44  ;;  %v8287_v63 = vld [vmem:[%s8825_s1 + $0x328] sm:$0xff]  ;;  %v8294_v6 = vld [vmem:[%s8825_s1 + $0x330] sm:$0xff]  ;;  %v8308_v23 = vld [vmem:[%s8825_s1 + $0x340] sm:$0xff] }
 0x978   :  { %v6599_v25 = vpop.eup %6598  ;;  %v8322_v44 = vld [vmem:[%s8825_s1 + $0x350] sm:$0xff] }
 0x979   :  { %6610 = vtanh.f32 %v3176_v9  ;;  %v3186_v43 = vsub.f32 1.0, %v6599_v25  ;;  %v3206_v61 = vmul.f32 %v6599_v25, %v3197_v17  ;;  %v8301_v9 = vld [vmem:[%s8825_s1 + $0x338] sm:$0xff]  ;;  %v8315_v25 = vld [vmem:[%s8825_s1 + $0x348] sm:$0xff] }
 0x97a   :  { %v6601_v16 = vpop.eup %6600 }
 0x97b   :  { %v3185_v14 = vsub.f32 1.0, %v6601_v16  ;;  %v3205_v26 = vmul.f32 %v6601_v16, %v3195_v58  ;;  %v8329_v16 = vld [vmem:[%s8825_s1 + $0x358] sm:$0xff] }
 0x980   :  { %v6603_v22 = vpop.eup %6602 }
 0x981   :  { %v6605_v1 = vpop.eup %6604  ;;  %v3191_v55 = vmul.f32 %v6603_v22, %v3187_v32 }
 0x982   :  { %v6607_v10 = vpop.eup %6606  ;;  %v3184_v30 = vsub.f32 1.0, %v6605_v1  ;;  %v3204_v41 = vmul.f32 %v6605_v1, %v3193_v35 }
 0x983   :  { %v8246_v37 = vadd.f32 %v3207_v62, %v3191_v55  ;;  %v3190_v38 = vmul.f32 %v6607_v10, %v3186_v43 }
 0x984   :  { %v6609_v46 = vpop.eup %6608 }
 0x985   :  { %3216 = vst.msk [vmem:[#allocation3 + $0x18] sm:$0xff] %vm3212_vm5, %v8246_v37  ;;  %v8250_v42 = vadd.f32 %v3206_v61, %v3190_v38  ;;  %v3189_v29 = vmul.f32 %v6609_v46, %v3185_v14  ;;  %3239 = vrot.lane.b32.xlu1 %v8246_v37, %s6860_s8 }
 0x986   :  { %v6611_v7 = vpop.eup %6610 }
 0x987   :  { %3215 = vst.msk [vmem:[#allocation3 + $0x10] sm:$0xff] %vm3212_vm5, %v8250_v42  ;;  %v8255_v59 = vadd.f32 %v3205_v26, %v3189_v29  ;;  %v3188_v4 = vmul.f32 %v6611_v7, %v3184_v30  ;;  %3237 = vrot.lane.b32.xlu0 %v8250_v42, %s6860_s8 }
 0x989   :  { %3214 = vst.msk [vmem:[#allocation3 + $0x8] sm:$0xff] %vm3212_vm5, %v8255_v59  ;;  %v8260_v28 = vadd.f32 %v3204_v41, %v3188_v4  ;;  %3235 = vrot.lane.b32.xlu1 %v8255_v59, %s6860_s8 }
 0x98b   :  { %3213 = vst.msk [vmem:[#allocation3] sm:$0xff] %vm3212_vm5, %v8260_v28  ;;  %3233 = vrot.lane.b32.xlu0 %v8260_v28, %s6860_s8 }
 0x9f7   :  { %v3240_v60 = vpop.permute.xlu1 %3239 }
 0x9f8   :  { %6232 = vmatprep.subr.mxu1 %v3240_v60 }
 0x9f9   :  { %6233 = vmatpush3.msra.mxu1 %v3240_v60  ;;  %v3238_v39 = vpop.permute.xlu0 %3237 }
 0x9fa   :  { %6234 = vmatprep.subr.mxu1 %v3238_v39 }
 0x9fb   :  { %v3236_v31 = vpop.permute.xlu1 %3235  ;;  %6235 = vmatpush3.msra.mxu1 %v3238_v39 }
 0x9fc   :  { %6236 = vmatprep.subr.mxu1 %v3236_v31 }
 0x9fd   :  { %6237 = vmatpush3.msra.mxu1 %v3236_v31  ;;  %v3234_v11 = vpop.permute.xlu0 %3233 }
 0x9fe   :  { %6238 = vmatprep.subr.mxu1 %v3234_v11 }
 0x9ff   :  { %6239 = vmatpush3.msra.mxu1 %v3234_v11 }
 0xa00   :  { %6241 = vmatmul.mubr.msk.f32.vlgmr.msra.gmra.mxu1 %vm1601_vm6, %v8178_v45 }
 0xa01   :  { %6243 = vmatprep.mubr.msk.f32.mxu1 %vm1601_vm6, %v8185_v47 }
 0xa04   :  { %6244 = vmatmul.mubr.msk.f32.gmra.mxu1 %vm1601_vm6, %v8273_v18 }
 0xa05   :  { %6246 = vmatprep.mubr.msk.f32.mxu1 %vm1601_vm6, %v8280_v19 }
 0xa08   :  { %6247 = vmatmul.mubr.msk.f32.gmra.mxu1 %vm1601_vm6, %v8287_v63 }
 0xa09   :  { %6249 = vmatprep.mubr.msk.f32.mxu1 %vm1601_vm6, %v8294_v6 }
 0xa0c   :  { %6250 = vmatmul.mubr.msk.f32.gmra.mxu1 %vm1601_vm6, %v8301_v9 }
 0xa0d   :  { %6252 = vmatprep.mubr.msk.f32.mxu1 %vm1601_vm6, %v8308_v23 }
 0xa10   :  { %6253 = vmatmul.mubr.msk.f32.gmra.mxu1 %vm1601_vm6, %v8315_v25 }
 0xa11   :  { %6255 = vmatprep.mubr.msk.f32.mxu1 %vm1601_vm6, %v8322_v44 }
 0xa14   :  { %6256 = vmatmul.mubr.msk.f32.gmra.mxu1 %vm1601_vm6, %v8329_v16 }
 0xa15   :  { %6292 = vmatprep.mubr.msk.f32.mxu1 %vm1601_vm6, %v8210_v5 }
 0xac0   :  { %v6242_v32 = vpop.f32.mrf.mxu1 }
 0xac1   :  { %v3317_v10 = vadd.f32 %v6242_v32, %v7920_v27 }
 0xac2   :  { %v3311_v22 = vpop.f32.mrf.mxu1 }
 0xac3   :  { %v3312_v61 = vadd.f32 %v3311_v22, %v7924_v53 }
 0xac4   :  { %v6245_v17 = vpop.f32.mrf.mxu1 }
 0xac5   :  { %v3327_v1 = vadd.f32 %v6245_v17, %v7913_v12 }
 0xac6   :  { %v3321_v55 = vpop.f32.mrf.mxu1 }
 0xac7   :  { %v3322_v62 = vadd.f32 %v3321_v55, %v7915_v8  ;;  %3380 = vrot.lane.b32.xlu1 %v3327_v1, %s6861_s27 }
 0xac8   :  { %v6248_v43 = vpop.f32.mrf.mxu1 }
 0xac9   :  { %3378 = vrot.lane.b32.xlu0 %v3322_v62, %s6861_s27  ;;  %v3337_v30 = vadd.f32 %v6248_v43, %v7950_v51 }
 0xaca   :  { %v3331_v38 = vpop.f32.mrf.mxu1 }
 0xacb   :  { %3376 = vrot.lane.b32.xlu1 %v3317_v10, %s6861_s27  ;;  %v3332_v35 = vadd.f32 %v3331_v38, %v7955_v57 }
 0xacc   :  { %v6251_v14 = vpop.f32.mrf.mxu1 }
 0xacd   :  { %v3347_v46 = vadd.f32 %v6251_v14, %v7938_v33  ;;  %3374 = vrot.lane.b32.xlu0 %v3312_v61, %s6861_s27 }
 0xace   :  { %v3341_v58 = vpop.f32.mrf.mxu1 }
 0xacf   :  { %v3342_v29 = vadd.f32 %v3341_v58, %v7943_v36  ;;  %3424 = vrot.lane.b32.xlu1 %v3347_v46, %s6861_s27 }
 0xad0   :  { %v6254_v26 = vpop.f32.mrf.mxu1 }
 0xad1   :  { %3422 = vrot.lane.b32.xlu0 %v3342_v29, %s6861_s27  ;;  %v3357_v31 = vadd.f32 %v6254_v26, %v8011_v52 }
 0xad2   :  { %v3351_v7 = vpop.f32.mrf.mxu1 }
 0xad3   :  { %3420 = vrot.lane.b32.xlu1 %v3337_v30, %s6861_s27  ;;  %v3352_v11 = vadd.f32 %v3351_v7, %v8022_v13 }
 0xad4   :  { %v6257_v4 = vpop.f32.mrf.mxu1 }
 0xad5   :  { %v3367_v41 = vadd.f32 %v6257_v4, %v7992_v20  ;;  %3418 = vrot.lane.b32.xlu0 %v3332_v35, %s6861_s27 }
 0xad6   :  { %v3361_v60 = vpop.f32.mrf.mxu1 }
 0xad7   :  { %v3362_v39 = vadd.f32 %v3361_v60, %v7996_v48  ;;  %3468 = vrot.lane.b32.xlu1 %v3367_v41, %s6861_s27 }
 0xad9   :  { %3466 = vrot.lane.b32.xlu0 %v3362_v39, %s6861_s27 }
 0xadb   :  { %3464 = vrot.lane.b32.xlu1 %v3357_v31, %s6861_s27 }
 0xadd   :  { %3462 = vrot.lane.b32.xlu0 %v3352_v11, %s6861_s27 }
 0xadf   :  { %3500 = vrot.lane.b32.xlu1 %v8246_v37, %s6852_s0 }
 0xae1   :  { %3498 = vrot.lane.b32.xlu0 %v8250_v42, %s6852_s0 }
 0xae3   :  { %3496 = vrot.lane.b32.xlu1 %v8255_v59, %s6852_s0 }
 0xae5   :  { %3494 = vrot.lane.b32.xlu0 %v8260_v28, %s6852_s0 }
 0xb39   :  { %v3381_v32 = vpop.permute.xlu1 %3380 }
 0xb3a   :  { %v3389_v22 = vadd.f32 %v3381_v32, %v8049_v40 }
 0xb3b   :  { %v3379_v17 = vpop.permute.xlu0 %3378 }
 0xb3c   :  { %v5440_v1 = vmul.f32 -1.442695, %v3389_v22  ;;  %v3388_v55 = vadd.f32 %v3379_v17, %v8052_v24 }
 0xb3d   :  { %v3377_v62 = vpop.permute.xlu1 %3376 }
 0xb3e   :  { %6612 = vpow2.f32 %v5440_v1  ;;  %v5439_v43 = vmul.f32 -1.442695, %v3388_v55  ;;  %v3387_v37 = vadd.f32 %v3377_v62, %v8043_v2 }
 0xb3f   :  { %v3375_v10 = vpop.permute.xlu0 %3374 }
 0xb40   :  { %6614 = vpow2.f32 %v5439_v43  ;;  %v5438_v42 = vmul.f32 -1.442695, %v3387_v37  ;;  %v3386_v59 = vadd.f32 %v3375_v10, %v8046_v15 }
 0xb41   :  { %v3425_v38 = vpop.permute.xlu1 %3424 }
 0xb42   :  { %6616 = vpow2.f32 %v5438_v42  ;;  %v5437_v28 = vmul.f32 -1.442695, %v3386_v59  ;;  %v3433_v61 = vadd.f32 %v3425_v38, %v8060_v34 }
 0xb43   :  { %v3423_v14 = vpop.permute.xlu0 %3422 }
 0xb44   :  { %6618 = vpow2.f32 %v5437_v28  ;;  %v5444_v46 = vmul.f32 -1.442695, %v3433_v61  ;;  %v3432_v58 = vadd.f32 %v3423_v14, %v8063_v21 }
 0xb45   :  { %v3421_v29 = vpop.permute.xlu1 %3420 }
 0xb46   :  { %v5443_v26 = vmul.f32 -1.442695, %v3432_v58  ;;  %v3431_v30 = vadd.f32 %v3421_v29, %v8055_v50  ;;  %6620 = vpow2.f32 %v5444_v46 }
 0xb47   :  { %v3419_v7 = vpop.permute.xlu0 %3418 }
 0xb48   :  { %v5442_v35 = vmul.f32 -1.442695, %v3431_v30  ;;  %v3430_v4 = vadd.f32 %v3419_v7, %v8057_v0  ;;  %6622 = vpow2.f32 %v5443_v26 }
 0xb49   :  { %v3469_v10 = vpop.permute.xlu1 %3468 }
 0xb4a   :  { %v5441_v41 = vmul.f32 -1.442695, %v3430_v4  ;;  %6624 = vpow2.f32 %v5442_v35 }
 0xb4b   :  { %v6613_v60 = vpop.eup %6612  ;;  %v3467_v61 = vpop.permute.xlu0 %3466 }
 0xb4c   :  { %v3405_v39 = vadd.f32 1.0, %v6613_v60  ;;  %6626 = vpow2.f32 %v5441_v41 }
 0xb4d   :  { %v6615_v31 = vpop.eup %6614  ;;  %v3465_v7 = vpop.permute.xlu1 %3464 }
 0xb4e   :  { %6628 = vrcp.f32 %v3405_v39  ;;  %v3404_v11 = vadd.f32 1.0, %v6615_v31 }
 0xb4f   :  { %v6617_v32 = vpop.eup %6616  ;;  %v3463_v60 = vpop.permute.xlu0 %3462 }
 0xb50   :  { %6630 = vrcp.f32 %v3404_v11  ;;  %v3403_v22 = vadd.f32 1.0, %v6617_v32 }
 0xb51   :  { %v6619_v17 = vpop.eup %6618 }
 0xb52   :  { %6632 = vrcp.f32 %v3403_v22  ;;  %v3402_v1 = vadd.f32 1.0, %v6619_v17  ;;  %v3501_v17 = vpop.permute.xlu1 %3500 }
 0xb53   :  { %v6621_v55 = vpop.eup %6620 }
 0xb54   :  { %6634 = vrcp.f32 %v3402_v1  ;;  %v3449_v37 = vadd.f32 1.0, %v6621_v55 }
 0xb55   :  { %v6623_v62 = vpop.eup %6622 }
 0xb56   :  { %v3448_v59 = vadd.f32 1.0, %v6623_v62  ;;  %6636 = vrcp.f32 %v3449_v37 }
 0xb57   :  { %v6625_v43 = vpop.eup %6624 }
 0xb58   :  { %v3447_v28 = vadd.f32 1.0, %v6625_v43  ;;  %6638 = vrcp.f32 %v3448_v59  ;;  %v3499_v43 = vpop.permute.xlu0 %3498 }
 0xb59   :  { %v6627_v42 = vpop.eup %6626 }
 0xb5a   :  { %v3446_v58 = vadd.f32 1.0, %v6627_v42  ;;  %6640 = vrcp.f32 %v3447_v28 }
 0xb5b   :  { %v6629_v38 = vpop.eup %6628 }
 0xb5c   :  { %v3477_v14 = vmul.f32 %v6629_v38, %v3469_v10 }
 0xb5d   :  { %v6631_v46 = vpop.eup %6630 }
 0xb5e   :  { %v3481_v29 = vadd.f32 %v3477_v14, %v8072_v49  ;;  %v3476_v26 = vmul.f32 %v6631_v46, %v3467_v61 }
 0xb5f   :  { %v6633_v30 = vpop.eup %6632 }
 0xb60   :  { %6642 = vtanh.f32 %v3481_v29  ;;  %v3480_v35 = vadd.f32 %v3476_v26, %v8075_v56  ;;  %v3475_v4 = vmul.f32 %v6633_v30, %v3465_v7  ;;  %v3497_v29 = vpop.permute.xlu1 %3496 }
 0xb61   :  { %v6635_v41 = vpop.eup %6634  ;;  %6644 = vrcp.f32 %v3446_v58 }
 0xb62   :  { %6646 = vtanh.f32 %v3480_v35  ;;  %v3479_v39 = vadd.f32 %v3475_v4, %v8067_v3  ;;  %v3474_v31 = vmul.f32 %v6635_v41, %v3463_v60  ;;  %v3495_v41 = vpop.permute.xlu0 %3494 }
 0xb63   :  { %v6637_v32 = vpop.eup %6636 }
 0xb64   :  { %6648 = vtanh.f32 %v3479_v39  ;;  %v3478_v11 = vadd.f32 %v3474_v31, %v8069_v54  ;;  %v3489_v55 = vsub.f32 1.0, %v6637_v32  ;;  %v3509_v42 = vmul.f32 %v6637_v32, %v3501_v17 }
 0xb65   :  { %v6639_v22 = vpop.eup %6638 }
 0xb66   :  { %6650 = vtanh.f32 %v3478_v11  ;;  %v3488_v59 = vsub.f32 1.0, %v6639_v22  ;;  %v3508_v14 = vmul.f32 %v6639_v22, %v3499_v43 }
 0xb67   :  { %v6641_v1 = vpop.eup %6640 }
 0xb68   :  { %v3487_v46 = vsub.f32 1.0, %v6641_v1  ;;  %v3507_v7 = vmul.f32 %v6641_v1, %v3497_v29 }
 0xb6d   :  { %v6643_v62 = vpop.eup %6642 }
 0xb6e   :  { %v6645_v37 = vpop.eup %6644  ;;  %v3493_v10 = vmul.f32 %v6643_v62, %v3489_v55 }
 0xb6f   :  { %v6647_v38 = vpop.eup %6646  ;;  %v3486_v35 = vsub.f32 1.0, %v6645_v37  ;;  %v3506_v31 = vmul.f32 %v6645_v37, %v3495_v41 }
 0xb70   :  { %v8367_v28 = vadd.f32 %v3509_v42, %v3493_v10  ;;  %v3492_v61 = vmul.f32 %v6647_v38, %v3488_v59 }
 0xb71   :  { %v6649_v58 = vpop.eup %6648 }
 0xb72   :  { %3518 = vst.msk [vmem:[#allocation3 + $0x18] sm:$0xff] %vm3514_vm7, %v8367_v28  ;;  %v8371_v26 = vadd.f32 %v3508_v14, %v3492_v61  ;;  %v3491_v30 = vmul.f32 %v6649_v58, %v3487_v46  ;;  %3541 = vrot.lane.b32.xlu1 %v8367_v28, %s6862_s28 }
 0xb73   :  { %v6651_v4 = vpop.eup %6650 }
 0xb74   :  { %3517 = vst.msk [vmem:[#allocation3 + $0x10] sm:$0xff] %vm3514_vm7, %v8371_v26  ;;  %v8376_v60 = vadd.f32 %v3507_v7, %v3491_v30  ;;  %v3490_v39 = vmul.f32 %v6651_v4, %v3486_v35  ;;  %3539 = vrot.lane.b32.xlu0 %v8371_v26, %s6862_s28 }
 0xb76   :  { %3516 = vst.msk [vmem:[#allocation3 + $0x8] sm:$0xff] %vm3514_vm7, %v8376_v60  ;;  %v8381_v11 = vadd.f32 %v3506_v31, %v3490_v39  ;;  %3537 = vrot.lane.b32.xlu1 %v8376_v60, %s6862_s28 }
 0xb78   :  { %3515 = vst.msk [vmem:[#allocation3] sm:$0xff] %vm3514_vm7, %v8381_v11  ;;  %3535 = vrot.lane.b32.xlu0 %v8381_v11, %s6862_s28 }
 0xbe4   :  { %v3542_v32 = vpop.permute.xlu1 %3541 }
 0xbe5   :  { %6258 = vmatprep.subr.mxu0 %v3542_v32 }
 0xbe6   :  { %6259 = vmatpush3.msra.mxu0 %v3542_v32  ;;  %v3540_v22 = vpop.permute.xlu0 %3539 }
 0xbe7   :  { %6260 = vmatprep.subr.mxu0 %v3540_v22 }
 0xbe8   :  { %v3538_v17 = vpop.permute.xlu1 %3537  ;;  %6261 = vmatpush3.msra.mxu0 %v3540_v22 }
 0xbe9   :  { %6262 = vmatprep.subr.mxu0 %v3538_v17 }
 0xbea   :  { %6263 = vmatpush3.msra.mxu0 %v3538_v17  ;;  %v3536_v1 = vpop.permute.xlu0 %3535 }
 0xbeb   :  { %6264 = vmatprep.subr.mxu0 %v3536_v1 }
 0xbec   :  { %6265 = vmatpush3.msra.mxu0 %v3536_v1 }
 0xbed   :  { %6267 = vmatmul.mubr.msk.f32.vlgmr.msra.gmra.mxu0 %vm1601_vm6, %v8178_v45 }
 0xbee   :  { %6269 = vmatprep.mubr.msk.f32.mxu0 %vm1601_vm6, %v8185_v47 }
 0xbf1   :  { %6270 = vmatmul.mubr.msk.f32.gmra.mxu0 %vm1601_vm6, %v8273_v18 }
 0xbf2   :  { %6272 = vmatprep.mubr.msk.f32.mxu0 %vm1601_vm6, %v8280_v19 }
 0xbf5   :  { %6273 = vmatmul.mubr.msk.f32.gmra.mxu0 %vm1601_vm6, %v8287_v63 }
 0xbf6   :  { %6275 = vmatprep.mubr.msk.f32.mxu0 %vm1601_vm6, %v8294_v6 }
 0xbf9   :  { %6276 = vmatmul.mubr.msk.f32.gmra.mxu0 %vm1601_vm6, %v8301_v9 }
 0xbfa   :  { %6278 = vmatprep.mubr.msk.f32.mxu0 %vm1601_vm6, %v8308_v23 }
 0xbfd   :  { %6279 = vmatmul.mubr.msk.f32.gmra.mxu0 %vm1601_vm6, %v8315_v25 }
 0xbfe   :  { %6281 = vmatprep.mubr.msk.f32.mxu0 %vm1601_vm6, %v8322_v44 }
 0xc01   :  { %6282 = vmatmul.mubr.msk.f32.gmra.mxu0 %vm1601_vm6, %v8329_v16 }
 0xc02   :  { %6318 = vmatprep.mubr.msk.f32.mxu0 %vm1601_vm6, %v8210_v5 }
 0xcad   :  { %v6268_v45 = vpop.f32.mrf.mxu0 }
 0xcae   :  { %v3619_v42 = vadd.f32 %v6268_v45, %v7920_v27 }
 0xcaf   :  { %v3613_v47 = vpop.f32.mrf.mxu0 }
 0xcb0   :  { %v3614_v38 = vadd.f32 %v3613_v47, %v7924_v53 }
 0xcb1   :  { %v6271_v55 = vpop.f32.mrf.mxu0 }
 0xcb2   :  { %v3629_v62 = vadd.f32 %v6271_v55, %v7913_v12 }
 0xcb3   :  { %v3623_v43 = vpop.f32.mrf.mxu0 }
 0xcb4   :  { %v3624_v37 = vadd.f32 %v3623_v43, %v7915_v8  ;;  %3682 = vrot.lane.b32.xlu1 %v3629_v62, %s6863_s29 }
 0xcb5   :  { %v6274_v10 = vpop.f32.mrf.mxu0 }
 0xcb6   :  { %3680 = vrot.lane.b32.xlu0 %v3624_v37, %s6863_s29  ;;  %v3639_v29 = vadd.f32 %v6274_v10, %v7950_v51 }
 0xcb7   :  { %v3633_v59 = vpop.f32.mrf.mxu0 }
 0xcb8   :  { %3678 = vrot.lane.b32.xlu1 %v3619_v42, %s6863_s29  ;;  %v3634_v7 = vadd.f32 %v3633_v59, %v7955_v57 }
 0xcb9   :  { %v6277_v61 = vpop.f32.mrf.mxu0 }
 0xcba   :  { %v3649_v5 = vadd.f32 %v6277_v61, %v7938_v33  ;;  %3676 = vrot.lane.b32.xlu0 %v3614_v38, %s6863_s29 }
 0xcbb   :  { %v3643_v14 = vpop.f32.mrf.mxu0 }
 0xcbc   :  { %v3644_v46 = vadd.f32 %v3643_v14, %v7943_v36  ;;  %3726 = vrot.lane.b32.xlu1 %v3649_v5, %s6863_s29 }
 0xcbd   :  { %v6280_v58 = vpop.f32.mrf.mxu0 }
 0xcbe   :  { %3724 = vrot.lane.b32.xlu0 %v3644_v46, %s6863_s29  ;;  %v3659_v31 = vadd.f32 %v6280_v58, %v8011_v52 }
 0xcbf   :  { %v3653_v30 = vpop.f32.mrf.mxu0 }
 0xcc0   :  { %3722 = vrot.lane.b32.xlu1 %v3639_v29, %s6863_s29  ;;  %v3654_v32 = vadd.f32 %v3653_v30, %v8022_v13 }
 0xcc1   :  { %v6283_v35 = vpop.f32.mrf.mxu0 }
 0xcc2   :  { %v3669_v4 = vadd.f32 %v6283_v35, %v7992_v20  ;;  %3720 = vrot.lane.b32.xlu0 %v3634_v7, %s6863_s29 }
 0xcc3   :  { %v3663_v41 = vpop.f32.mrf.mxu0 }
 0xcc4   :  { %v3664_v39 = vadd.f32 %v3663_v41, %v7996_v48  ;;  %3770 = vrot.lane.b32.xlu1 %v3669_v4, %s6863_s29 }
 0xcc6   :  { %3768 = vrot.lane.b32.xlu0 %v3664_v39, %s6863_s29 }
 0xcc8   :  { %3766 = vrot.lane.b32.xlu1 %v3659_v31, %s6863_s29 }
 0xcca   :  { %3764 = vrot.lane.b32.xlu0 %v3654_v32, %s6863_s29 }
 0xccc   :  { %3802 = vrot.lane.b32.xlu1 %v8367_v28, %s6852_s0 }
 0xcce   :  { %3800 = vrot.lane.b32.xlu0 %v8371_v26, %s6852_s0 }
 0xcd0   :  { %3798 = vrot.lane.b32.xlu1 %v8376_v60, %s6852_s0 }
 0xcd2   :  { %3796 = vrot.lane.b32.xlu0 %v8381_v11, %s6852_s0 }
 0xd26   :  { %v3683_v22 = vpop.permute.xlu1 %3682 }
 0xd27   :  { %v3691_v17 = vadd.f32 %v3683_v22, %v8049_v40 }
 0xd28   :  { %v3681_v1 = vpop.permute.xlu0 %3680 }
 0xd29   :  { %v5460_v45 = vmul.f32 -1.442695, %v3691_v17  ;;  %v3690_v47 = vadd.f32 %v3681_v1, %v8052_v24 }
 0xd2a   :  { %v3679_v55 = vpop.permute.xlu1 %3678 }
 0xd2b   :  { %6652 = vpow2.f32 %v5460_v45  ;;  %v5459_v62 = vmul.f32 -1.442695, %v3690_v47  ;;  %v3689_v28 = vadd.f32 %v3679_v55, %v8043_v2 }
 0xd2c   :  { %v3677_v43 = vpop.permute.xlu0 %3676 }
 0xd2d   :  { %6654 = vpow2.f32 %v5459_v62  ;;  %v5458_v26 = vmul.f32 -1.442695, %v3689_v28  ;;  %v3688_v60 = vadd.f32 %v3677_v43, %v8046_v15 }
 0xd2e   :  { %v3727_v37 = vpop.permute.xlu1 %3726 }
 0xd2f   :  { %6656 = vpow2.f32 %v5458_v26  ;;  %v5457_v11 = vmul.f32 -1.442695, %v3688_v60  ;;  %v3735_v10 = vadd.f32 %v3727_v37, %v8060_v34 }
 0xd30   :  { %v3725_v42 = vpop.permute.xlu0 %3724 }
 0xd31   :  { %6658 = vpow2.f32 %v5457_v11  ;;  %v5464_v59 = vmul.f32 -1.442695, %v3735_v10  ;;  %v3734_v38 = vadd.f32 %v3725_v42, %v8063_v21 }
 0xd32   :  { %v3723_v61 = vpop.permute.xlu1 %3722 }
 0xd33   :  { %v5463_v5 = vmul.f32 -1.442695, %v3734_v38  ;;  %v3733_v14 = vadd.f32 %v3723_v61, %v8055_v50  ;;  %6660 = vpow2.f32 %v5464_v59 }
 0xd34   :  { %v3721_v46 = vpop.permute.xlu0 %3720 }
 0xd35   :  { %v5462_v58 = vmul.f32 -1.442695, %v3733_v14  ;;  %v3732_v29 = vadd.f32 %v3721_v46, %v8057_v0  ;;  %6662 = vpow2.f32 %v5463_v5 }
 0xd36   :  { %v3771_v55 = vpop.permute.xlu1 %3770 }
 0xd37   :  { %v5461_v30 = vmul.f32 -1.442695, %v3732_v29  ;;  %6664 = vpow2.f32 %v5462_v58 }
 0xd38   :  { %v6653_v7 = vpop.eup %6652  ;;  %v3769_v60 = vpop.permute.xlu0 %3768 }
 0xd39   :  { %v3707_v35 = vadd.f32 1.0, %v6653_v7  ;;  %6666 = vpow2.f32 %v5461_v30 }
 0xd3a   :  { %v6655_v4 = vpop.eup %6654  ;;  %v3767_v61 = vpop.permute.xlu1 %3766 }
 0xd3b   :  { %6668 = vrcp.f32 %v3707_v35  ;;  %v3706_v41 = vadd.f32 1.0, %v6655_v4 }
 0xd3c   :  { %v6657_v39 = vpop.eup %6656  ;;  %v3765_v58 = vpop.permute.xlu0 %3764 }
 0xd3d   :  { %6670 = vrcp.f32 %v3706_v41  ;;  %v3705_v31 = vadd.f32 1.0, %v6657_v39 }
 0xd3e   :  { %v6659_v32 = vpop.eup %6658  ;;  %v3803_v41 = vpop.permute.xlu1 %3802 }
 0xd3f   :  { %6672 = vrcp.f32 %v3705_v31  ;;  %v3704_v22 = vadd.f32 1.0, %v6659_v32 }
 0xd40   :  { %v6661_v17 = vpop.eup %6660 }
 0xd41   :  { %6674 = vrcp.f32 %v3704_v22  ;;  %v3751_v47 = vadd.f32 1.0, %v6661_v17  ;;  %v3801_v22 = vpop.permute.xlu0 %3800 }
 0xd42   :  { %v6663_v1 = vpop.eup %6662 }
 0xd43   :  { %v3750_v28 = vadd.f32 1.0, %v6663_v1  ;;  %6676 = vrcp.f32 %v3751_v47 }
 0xd44   :  { %v6665_v45 = vpop.eup %6664 }
 0xd45   :  { %v3749_v26 = vadd.f32 1.0, %v6665_v45  ;;  %6678 = vrcp.f32 %v3750_v28 }
 0xd46   :  { %v6667_v62 = vpop.eup %6666 }
 0xd47   :  { %v3748_v10 = vadd.f32 1.0, %v6667_v62  ;;  %6680 = vrcp.f32 %v3749_v26 }
 0xd48   :  { %v6669_v43 = vpop.eup %6668 }
 0xd49   :  { %v3779_v37 = vmul.f32 %v6669_v43, %v3771_v55 }
 0xd4a   :  { %v6671_v11 = vpop.eup %6670 }
 0xd4b   :  { %v3783_v42 = vadd.f32 %v3779_v37, %v8072_v49  ;;  %v3778_v59 = vmul.f32 %v6671_v11, %v3769_v60  ;;  %v3799_v37 = vpop.permute.xlu1 %3798 }
 0xd4c   :  { %v6673_v38 = vpop.eup %6672 }
 0xd4d   :  { %6682 = vtanh.f32 %v3783_v42  ;;  %v3782_v5 = vadd.f32 %v3778_v59, %v8075_v56  ;;  %v3777_v14 = vmul.f32 %v6673_v38, %v3767_v61  ;;  %v3797_v61 = vpop.permute.xlu0 %3796 }
 0xd4e   :  { %v6675_v46 = vpop.eup %6674  ;;  %6684 = vrcp.f32 %v3748_v10 }
 0xd4f   :  { %6686 = vtanh.f32 %v3782_v5  ;;  %v3781_v29 = vadd.f32 %v3777_v14, %v8067_v3  ;;  %v3776_v30 = vmul.f32 %v6675_v46, %v3765_v58 }
 0xd50   :  { %v6677_v35 = vpop.eup %6676 }
 0xd51   :  { %6688 = vtanh.f32 %v3781_v29  ;;  %v3780_v7 = vadd.f32 %v3776_v30, %v8069_v54  ;;  %v3791_v31 = vsub.f32 1.0, %v6677_v35  ;;  %v3811_v45 = vmul.f32 %v6677_v35, %v3803_v41  ;;  %v8473_v41 = vld [vmem:[%s8825_s1 + $0x310] sm:$0xff] }
 0xd52   :  { %v6679_v4 = vpop.eup %6678 }
 0xd53   :  { %6690 = vtanh.f32 %v3780_v7  ;;  %v3790_v47 = vsub.f32 1.0, %v6679_v4  ;;  %v3810_v43 = vmul.f32 %v6679_v4, %v3801_v22  ;;  %v8466_v4 = vld [vmem:[%s8825_s1 + $0x308] sm:$0xff] }
 0xd54   :  { %v6681_v39 = vpop.eup %6680 }
 0xd55   :  { %v3789_v26 = vsub.f32 1.0, %v6681_v39  ;;  %v3809_v42 = vmul.f32 %v6681_v39, %v3799_v37 }
 0xd5a   :  { %v6683_v32 = vpop.eup %6682 }
 0xd5b   :  { %v6685_v17 = vpop.eup %6684  ;;  %v3795_v1 = vmul.f32 %v6683_v32, %v3791_v31 }
 0xd5c   :  { %v6687_v55 = vpop.eup %6686  ;;  %v3788_v59 = vsub.f32 1.0, %v6685_v17  ;;  %v3808_v46 = vmul.f32 %v6685_v17, %v3797_v61 }
 0xd5d   :  { %v8443_v62 = vadd.f32 %v3811_v45, %v3795_v1  ;;  %v3794_v28 = vmul.f32 %v6687_v55, %v3790_v47 }
 0xd5e   :  { %v6689_v60 = vpop.eup %6688 }
 0xd5f   :  { %3820 = vst.msk [vmem:[#allocation3 + $0x18] sm:$0xff] %vm3816_vm8, %v8443_v62  ;;  %v8447_v11 = vadd.f32 %v3810_v43, %v3794_v28  ;;  %v3793_v10 = vmul.f32 %v6689_v60, %v3789_v26  ;;  %3843 = vrot.lane.b32.xlu1 %v8443_v62, %s6864_s30 }
 0xd60   :  { %v6691_v38 = vpop.eup %6690 }
 0xd61   :  { %3819 = vst.msk [vmem:[#allocation3 + $0x10] sm:$0xff] %vm3816_vm8, %v8447_v11  ;;  %v8452_v5 = vadd.f32 %v3809_v42, %v3793_v10  ;;  %v3792_v14 = vmul.f32 %v6691_v38, %v3788_v59  ;;  %3841 = vrot.lane.b32.xlu0 %v8447_v11, %s6864_s30 }
 0xd63   :  { %3818 = vst.msk [vmem:[#allocation3 + $0x8] sm:$0xff] %vm3816_vm8, %v8452_v5  ;;  %v8457_v58 = vadd.f32 %v3808_v46, %v3792_v14  ;;  %3839 = vrot.lane.b32.xlu1 %v8452_v5, %s6864_s30 }
 0xd65   :  { %3817 = vst.msk [vmem:[#allocation3] sm:$0xff] %vm3816_vm8, %v8457_v58  ;;  %3837 = vrot.lane.b32.xlu0 %v8457_v58, %s6864_s30  ;;  %s6867_s30 = smov 16  }
 0xdd1   :  { %v3844_v29 = vpop.permute.xlu1 %3843 }
 0xdd2   :  { %6284 = vmatprep.subr.mxu1 %v3844_v29 }
 0xdd3   :  { %6285 = vmatpush3.msra.mxu1 %v3844_v29  ;;  %v3842_v30 = vpop.permute.xlu0 %3841 }
 0xdd4   :  { %6286 = vmatprep.subr.mxu1 %v3842_v30 }
 0xdd5   :  { %v3840_v7 = vpop.permute.xlu1 %3839  ;;  %6287 = vmatpush3.msra.mxu1 %v3842_v30 }
 0xdd6   :  { %6288 = vmatprep.subr.mxu1 %v3840_v7 }
 0xdd7   :  { %6289 = vmatpush3.msra.mxu1 %v3840_v7  ;;  %v3838_v35 = vpop.permute.xlu0 %3837 }
 0xdd8   :  { %6290 = vmatprep.subr.mxu1 %v3838_v35 }
 0xdd9   :  { %6291 = vmatpush3.msra.mxu1 %v3838_v35 }
 0xdda   :  { %6293 = vmatmul.mubr.msk.f32.vlgmr.msra.gmra.mxu1 %vm1601_vm6, %v8466_v4 }
 0xddb   :  { %6295 = vmatprep.mubr.msk.f32.mxu1 %vm1601_vm6, %v8473_v41 }
 0xdde   :  { %6296 = vmatmul.mubr.msk.f32.gmra.mxu1 %vm1601_vm6, %v8273_v18  ;;  %v6842_v18 = vld [vmem:[%s8825_s1 + $0x300] sm:$0xff] }
 0xddf   :  { %6298 = vmatprep.mubr.msk.f32.mxu1 %vm1601_vm6, %v8280_v19 }
 0xde2   :  { %6299 = vmatmul.mubr.msk.f32.gmra.mxu1 %vm1601_vm6, %v8287_v63 }
 0xde3   :  { %6301 = vmatprep.mubr.msk.f32.mxu1 %vm1601_vm6, %v8294_v6 }
 0xde6   :  { %6302 = vmatmul.mubr.msk.f32.gmra.mxu1 %vm1601_vm6, %v8301_v9 }
 0xde7   :  { %6304 = vmatprep.mubr.msk.f32.mxu1 %vm1601_vm6, %v8308_v23 }
 0xdea   :  { %6305 = vmatmul.mubr.msk.f32.gmra.mxu1 %vm1601_vm6, %v8315_v25 }
 0xdeb   :  { %6307 = vmatprep.mubr.msk.f32.mxu1 %vm1601_vm6, %v8322_v44 }
 0xdee   :  { %6308 = vmatmul.mubr.msk.f32.gmra.mxu1 %vm1601_vm6, %v8329_v16 }
 0xdef   :  { %6344 = vmatprep.mubr.msk.f32.mxu1 %vm1601_vm6, %v6842_v18 }
 0xe9a   :  { %v6294_v19 = vpop.f32.mrf.mxu1 }
 0xe9b   :  { %v3921_v39 = vadd.f32 %v6294_v19, %v7920_v27 }
 0xe9c   :  { %v3915_v63 = vpop.f32.mrf.mxu1 }
 0xe9d   :  { %v3916_v31 = vadd.f32 %v3915_v63, %v7924_v53 }
 0xe9e   :  { %v6297_v6 = vpop.f32.mrf.mxu1 }
 0xe9f   :  { %v3931_v9 = vadd.f32 %v6297_v6, %v7913_v12 }
 0xea0   :  { %v3925_v23 = vpop.f32.mrf.mxu1 }
 0xea1   :  { %v3926_v25 = vadd.f32 %v3925_v23, %v7915_v8  ;;  %3984 = vrot.lane.b32.xlu1 %v3931_v9, %s6865_s10 }
 0xea2   :  { %v6300_v44 = vpop.f32.mrf.mxu1 }
 0xea3   :  { %3982 = vrot.lane.b32.xlu0 %v3926_v25, %s6865_s10  ;;  %v3941_v47 = vadd.f32 %v6300_v44, %v7950_v51 }
 0xea4   :  { %v3935_v16 = vpop.f32.mrf.mxu1 }
 0xea5   :  { %3980 = vrot.lane.b32.xlu1 %v3921_v39, %s6865_s10  ;;  %v3936_v28 = vadd.f32 %v3935_v16, %v7955_v57 }
 0xea6   :  { %v6303_v32 = vpop.f32.mrf.mxu1 }
 0xea7   :  { %v3951_v22 = vadd.f32 %v6303_v32, %v7938_v33  ;;  %3978 = vrot.lane.b32.xlu0 %v3916_v31, %s6865_s10 }
 0xea8   :  { %v3945_v17 = vpop.f32.mrf.mxu1 }
 0xea9   :  { %v3946_v1 = vadd.f32 %v3945_v17, %v7943_v36  ;;  %4028 = vrot.lane.b32.xlu1 %v3951_v22, %s6865_s10 }
 0xeaa   :  { %v6306_v45 = vpop.f32.mrf.mxu1 }
 0xeab   :  { %4026 = vrot.lane.b32.xlu0 %v3946_v1, %s6865_s10  ;;  %v3961_v10 = vadd.f32 %v6306_v45, %v8011_v52 }
 0xeac   :  { %v3955_v55 = vpop.f32.mrf.mxu1 }
 0xead   :  { %4024 = vrot.lane.b32.xlu1 %v3941_v47, %s6865_s10  ;;  %v3956_v42 = vadd.f32 %v3955_v55, %v8022_v13 }
 0xeae   :  { %v6309_v43 = vpop.f32.mrf.mxu1 }
 0xeaf   :  { %v3971_v26 = vadd.f32 %v6309_v43, %v7992_v20  ;;  %4022 = vrot.lane.b32.xlu0 %v3936_v28, %s6865_s10 }
 0xeb0   :  { %v3965_v60 = vpop.f32.mrf.mxu1 }
 0xeb1   :  { %v3966_v37 = vadd.f32 %v3965_v60, %v7996_v48  ;;  %4072 = vrot.lane.b32.xlu1 %v3971_v26, %s6865_s10 }
 0xeb3   :  { %4070 = vrot.lane.b32.xlu0 %v3966_v37, %s6865_s10 }
 0xeb5   :  { %4068 = vrot.lane.b32.xlu1 %v3961_v10, %s6865_s10 }
 0xeb7   :  { %4066 = vrot.lane.b32.xlu0 %v3956_v42, %s6865_s10 }
 0xeb9   :  { %4104 = vrot.lane.b32.xlu1 %v8443_v62, %s6852_s0 }
 0xebb   :  { %4102 = vrot.lane.b32.xlu0 %v8447_v11, %s6852_s0 }
 0xebd   :  { %4100 = vrot.lane.b32.xlu1 %v8452_v5, %s6852_s0 }
 0xebf   :  { %4098 = vrot.lane.b32.xlu0 %v8457_v58, %s6852_s0 }
 0xf13   :  { %v3985_v59 = vpop.permute.xlu1 %3984 }
 0xf14   :  { %v3993_v38 = vadd.f32 %v3985_v59, %v8049_v40 }
 0xf15   :  { %v3983_v61 = vpop.permute.xlu0 %3982 }
 0xf16   :  { %v5480_v14 = vmul.f32 -1.442695, %v3993_v38  ;;  %v3992_v46 = vadd.f32 %v3983_v61, %v8052_v24 }
 0xf17   :  { %v3981_v29 = vpop.permute.xlu1 %3980 }
 0xf18   :  { %6692 = vpow2.f32 %v5480_v14  ;;  %v5479_v30 = vmul.f32 -1.442695, %v3992_v46  ;;  %v3991_v62 = vadd.f32 %v3981_v29, %v8043_v2 }
 0xf19   :  { %v3979_v7 = vpop.permute.xlu0 %3978 }
 0xf1a   :  { %6694 = vpow2.f32 %v5479_v30  ;;  %v5478_v11 = vmul.f32 -1.442695, %v3991_v62  ;;  %v3990_v5 = vadd.f32 %v3979_v7, %v8046_v15 }
 0xf1b   :  { %v4029_v35 = vpop.permute.xlu1 %4028 }
 0xf1c   :  { %6696 = vpow2.f32 %v5478_v11  ;;  %v5477_v58 = vmul.f32 -1.442695, %v3990_v5  ;;  %v4037_v18 = vadd.f32 %v4029_v35, %v8060_v34 }
 0xf1d   :  { %v4027_v19 = vpop.permute.xlu0 %4026 }
 0xf1e   :  { %6698 = vpow2.f32 %v5477_v58  ;;  %v5484_v63 = vmul.f32 -1.442695, %v4037_v18  ;;  %v4036_v6 = vadd.f32 %v4027_v19, %v8063_v21 }
 0xf1f   :  { %v4025_v9 = vpop.permute.xlu1 %4024 }
 0xf20   :  { %v5483_v23 = vmul.f32 -1.442695, %v4036_v6  ;;  %v4035_v25 = vadd.f32 %v4025_v9, %v8055_v50  ;;  %6700 = vpow2.f32 %v5484_v63 }
 0xf21   :  { %v4023_v44 = vpop.permute.xlu0 %4022 }
 0xf22   :  { %v5482_v39 = vmul.f32 -1.442695, %v4035_v25  ;;  %v4034_v16 = vadd.f32 %v4023_v44, %v8057_v0  ;;  %6702 = vpow2.f32 %v5483_v23 }
 0xf23   :  { %v4073_v10 = vpop.permute.xlu1 %4072 }
 0xf24   :  { %v5481_v31 = vmul.f32 -1.442695, %v4034_v16  ;;  %6704 = vpow2.f32 %v5482_v39 }
 0xf25   :  { %v6693_v32 = vpop.eup %6692  ;;  %v4071_v14 = vpop.permute.xlu0 %4070 }
 0xf26   :  { %v4009_v22 = vadd.f32 1.0, %v6693_v32  ;;  %6706 = vpow2.f32 %v5481_v31 }
 0xf27   :  { %v6695_v17 = vpop.eup %6694  ;;  %v4069_v5 = vpop.permute.xlu1 %4068 }
 0xf28   :  { %6708 = vrcp.f32 %v4009_v22  ;;  %v4008_v1 = vadd.f32 1.0, %v6695_v17 }
 0xf29   :  { %v6697_v45 = vpop.eup %6696  ;;  %v4067_v19 = vpop.permute.xlu0 %4066 }
 0xf2a   :  { %6710 = vrcp.f32 %v4008_v1  ;;  %v4007_v47 = vadd.f32 1.0, %v6697_v45 }
 0xf2b   :  { %v6699_v55 = vpop.eup %6698  ;;  %v4105_v44 = vpop.permute.xlu1 %4104 }
 0xf2c   :  { %6712 = vrcp.f32 %v4007_v47  ;;  %v4006_v28 = vadd.f32 1.0, %v6699_v55 }
 0xf2d   :  { %v6701_v43 = vpop.eup %6700  ;;  %v4103_v32 = vpop.permute.xlu0 %4102 }
 0xf2e   :  { %6714 = vrcp.f32 %v4006_v28  ;;  %v4053_v37 = vadd.f32 1.0, %v6701_v43 }
 0xf2f   :  { %v6703_v26 = vpop.eup %6702 }
 0xf30   :  { %v4052_v59 = vadd.f32 1.0, %v6703_v26  ;;  %6716 = vrcp.f32 %v4053_v37  ;;  %v4101_v37 = vpop.permute.xlu1 %4100 }
 0xf31   :  { %v6705_v60 = vpop.eup %6704 }
 0xf32   :  { %v4051_v61 = vadd.f32 1.0, %v6705_v60  ;;  %6718 = vrcp.f32 %v4052_v59 }
 0xf33   :  { %v6707_v42 = vpop.eup %6706 }
 0xf34   :  { %v4050_v30 = vadd.f32 1.0, %v6707_v42  ;;  %6720 = vrcp.f32 %v4051_v61 }
 0xf35   :  { %v6709_v38 = vpop.eup %6708 }
 0xf36   :  { %v4081_v46 = vmul.f32 %v6709_v38, %v4073_v10 }
 0xf37   :  { %v6711_v29 = vpop.eup %6710 }
 0xf38   :  { %v4085_v62 = vadd.f32 %v4081_v46, %v8072_v49  ;;  %v4080_v7 = vmul.f32 %v6711_v29, %v4071_v14  ;;  %v4099_v14 = vpop.permute.xlu0 %4098 }
 0xf39   :  { %v6713_v11 = vpop.eup %6712 }
 0xf3a   :  { %6722 = vtanh.f32 %v4085_v62  ;;  %v4084_v35 = vadd.f32 %v4080_v7, %v8075_v56  ;;  %v4079_v58 = vmul.f32 %v6713_v11, %v4069_v5 }
 0xf3b   :  { %v6715_v18 = vpop.eup %6714  ;;  %6724 = vrcp.f32 %v4050_v30 }
 0xf3c   :  { %6726 = vtanh.f32 %v4084_v35  ;;  %v4083_v63 = vadd.f32 %v4079_v58, %v8067_v3  ;;  %v4078_v6 = vmul.f32 %v6715_v18, %v4067_v19  ;;  %v8558_v58 = vld [vmem:[%s8825_s1 + $0x318] sm:$0xff]  ;;  %v8565_v18 = vld [vmem:[%s8825_s1 + $0x320] sm:$0xff]  ;;  %v8572_v19 = vld [vmem:[%s8825_s1 + $0x328] sm:$0xff] }
 0xf3d   :  { %v6717_v23 = vpop.eup %6716 }
 0xf3e   :  { %6728 = vtanh.f32 %v4083_v63  ;;  %v4082_v9 = vadd.f32 %v4078_v6, %v8069_v54  ;;  %v4093_v16 = vsub.f32 1.0, %v6717_v23  ;;  %v4113_v1 = vmul.f32 %v6717_v23, %v4105_v44  ;;  %v8579_v63 = vld [vmem:[%s8825_s1 + $0x330] sm:$0xff]  ;;  %v8586_v6 = vld [vmem:[%s8825_s1 + $0x338] sm:$0xff]  ;;  %v8600_v23 = vld [vmem:[%s8825_s1 + $0x348] sm:$0xff] }
 0xf3f   :  { %v6719_v25 = vpop.eup %6718  ;;  %v8614_v44 = vld [vmem:[%s8825_s1 + $0x358] sm:$0xff] }
 0xf40   :  { %6730 = vtanh.f32 %v4082_v9  ;;  %v4092_v45 = vsub.f32 1.0, %v6719_v25  ;;  %v4112_v43 = vmul.f32 %v6719_v25, %v4103_v32  ;;  %v8593_v9 = vld [vmem:[%s8825_s1 + $0x340] sm:$0xff]  ;;  %v8607_v25 = vld [vmem:[%s8825_s1 + $0x350] sm:$0xff] }
 0xf41   :  { %v6721_v39 = vpop.eup %6720 }
 0xf42   :  { %v4091_v26 = vsub.f32 1.0, %v6721_v39  ;;  %v4111_v59 = vmul.f32 %v6721_v39, %v4101_v37 }
 0xf47   :  { %v6723_v31 = vpop.eup %6722 }
 0xf48   :  { %v6725_v22 = vpop.eup %6724  ;;  %v4097_v17 = vmul.f32 %v6723_v31, %v4093_v16 }
 0xf49   :  { %v6727_v47 = vpop.eup %6726  ;;  %v4090_v38 = vsub.f32 1.0, %v6725_v22  ;;  %v4110_v30 = vmul.f32 %v6725_v22, %v4099_v14 }
 0xf4a   :  { %v8531_v55 = vadd.f32 %v4113_v1, %v4097_v17  ;;  %v4096_v28 = vmul.f32 %v6727_v47, %v4092_v45 }
 0xf4b   :  { %v6729_v60 = vpop.eup %6728 }
 0xf4c   :  { %4122 = vst.msk [vmem:[#allocation3 + $0x18] sm:$0xff] %vm4118_vm9, %v8531_v55  ;;  %v8535_v10 = vadd.f32 %v4112_v43, %v4096_v28  ;;  %v4095_v42 = vmul.f32 %v6729_v60, %v4091_v26  ;;  %4145 = vrot.lane.b32.xlu1 %v8531_v55, %s6866_s11 }
 0xf4d   :  { %v6731_v61 = vpop.eup %6730 }
 0xf4e   :  { %4121 = vst.msk [vmem:[#allocation3 + $0x10] sm:$0xff] %vm4118_vm9, %v8535_v10  ;;  %v8540_v46 = vadd.f32 %v4111_v59, %v4095_v42  ;;  %v4094_v29 = vmul.f32 %v6731_v61, %v4090_v38  ;;  %4143 = vrot.lane.b32.xlu0 %v8535_v10, %s6866_s11 }
 0xf50   :  { %4120 = vst.msk [vmem:[#allocation3 + $0x8] sm:$0xff] %vm4118_vm9, %v8540_v46  ;;  %v8545_v62 = vadd.f32 %v4110_v30, %v4094_v29  ;;  %4141 = vrot.lane.b32.xlu1 %v8540_v46, %s6866_s11 }
 0xf52   :  { %4119 = vst.msk [vmem:[#allocation3] sm:$0xff] %vm4118_vm9, %v8545_v62  ;;  %4139 = vrot.lane.b32.xlu0 %v8545_v62, %s6866_s11 }
 0xfbe   :  { %v4146_v7 = vpop.permute.xlu1 %4145 }
 0xfbf   :  { %6310 = vmatprep.subr.mxu0 %v4146_v7 }
 0xfc0   :  { %6311 = vmatpush3.msra.mxu0 %v4146_v7  ;;  %v4144_v11 = vpop.permute.xlu0 %4143 }
 0xfc1   :  { %6312 = vmatprep.subr.mxu0 %v4144_v11 }
 0xfc2   :  { %v4142_v5 = vpop.permute.xlu1 %4141  ;;  %6313 = vmatpush3.msra.mxu0 %v4144_v11 }
 0xfc3   :  { %6314 = vmatprep.subr.mxu0 %v4142_v5 }
 0xfc4   :  { %6315 = vmatpush3.msra.mxu0 %v4142_v5  ;;  %v4140_v35 = vpop.permute.xlu0 %4139 }
 0xfc5   :  { %6316 = vmatprep.subr.mxu0 %v4140_v35 }
 0xfc6   :  { %6317 = vmatpush3.msra.mxu0 %v4140_v35 }
 0xfc7   :  { %6319 = vmatmul.mubr.msk.f32.vlgmr.msra.gmra.mxu0 %vm1601_vm6, %v8466_v4 }
 0xfc8   :  { %6321 = vmatprep.mubr.msk.f32.mxu0 %vm1601_vm6, %v8473_v41 }
 0xfcb   :  { %6322 = vmatmul.mubr.msk.f32.gmra.mxu0 %vm1601_vm6, %v8558_v58 }
 0xfcc   :  { %6324 = vmatprep.mubr.msk.f32.mxu0 %vm1601_vm6, %v8565_v18 }
 0xfcf   :  { %6325 = vmatmul.mubr.msk.f32.gmra.mxu0 %vm1601_vm6, %v8572_v19 }
 0xfd0   :  { %6327 = vmatprep.mubr.msk.f32.mxu0 %vm1601_vm6, %v8579_v63 }
 0xfd3   :  { %6328 = vmatmul.mubr.msk.f32.gmra.mxu0 %vm1601_vm6, %v8586_v6 }
 0xfd4   :  { %6330 = vmatprep.mubr.msk.f32.mxu0 %vm1601_vm6, %v8593_v9 }
 0xfd7   :  { %6331 = vmatmul.mubr.msk.f32.gmra.mxu0 %vm1601_vm6, %v8600_v23 }
 0xfd8   :  { %6333 = vmatprep.mubr.msk.f32.mxu0 %vm1601_vm6, %v8607_v25 }
 0xfdb   :  { %6334 = vmatmul.mubr.msk.f32.gmra.mxu0 %vm1601_vm6, %v8614_v44 }
0x1087   :  { %v6320_v39 = vpop.f32.mrf.mxu0 }
0x1088   :  { %v4223_v45 = vadd.f32 %v6320_v39, %v7920_v27 }
0x1089   :  { %v4217_v16 = vpop.f32.mrf.mxu0 }
0x108a   :  { %v4218_v28 = vadd.f32 %v4217_v16, %v7924_v53 }
0x108b   :  { %v6323_v31 = vpop.f32.mrf.mxu0 }
0x108c   :  { %v4233_v32 = vadd.f32 %v6323_v31, %v7913_v12 }
0x108d   :  { %v4227_v22 = vpop.f32.mrf.mxu0 }
0x108e   :  { %v4228_v17 = vadd.f32 %v4227_v22, %v7915_v8  ;;  %4286 = vrot.lane.b32.xlu1 %v4233_v32, %s6867_s30 }
0x108f   :  { %v6326_v1 = vpop.f32.mrf.mxu0 }
0x1090   :  { %4284 = vrot.lane.b32.xlu0 %v4228_v17, %s6867_s30  ;;  %v4243_v59 = vadd.f32 %v6326_v1, %v7950_v51 }
0x1091   :  { %v4237_v47 = vpop.f32.mrf.mxu0 }
0x1092   :  { %4282 = vrot.lane.b32.xlu1 %v4223_v45, %s6867_s30  ;;  %v4238_v61 = vadd.f32 %v4237_v47, %v7955_v57 }
0x1093   :  { %v6329_v43 = vpop.f32.mrf.mxu0 }
0x1094   :  { %v4253_v26 = vadd.f32 %v6329_v43, %v7938_v33  ;;  %4280 = vrot.lane.b32.xlu0 %v4218_v28, %s6867_s30 }
0x1095   :  { %v4247_v60 = vpop.f32.mrf.mxu0 }
0x1096   :  { %v4248_v37 = vadd.f32 %v4247_v60, %v7943_v36  ;;  %4330 = vrot.lane.b32.xlu1 %v4253_v26, %s6867_s30 }
0x1097   :  { %v6332_v42 = vpop.f32.mrf.mxu0 }
0x1098   :  { %4328 = vrot.lane.b32.xlu0 %v4248_v37, %s6867_s30  ;;  %v4263_v11 = vadd.f32 %v6332_v42, %v8011_v52 }
0x1099   :  { %v4257_v38 = vpop.f32.mrf.mxu0 }
0x109a   :  { %4326 = vrot.lane.b32.xlu1 %v4243_v59, %s6867_s30  ;;  %v4258_v5 = vadd.f32 %v4257_v38, %v8022_v13 }
0x109b   :  { %v6335_v14 = vpop.f32.mrf.mxu0 }
0x109c   :  { %v4273_v29 = vadd.f32 %v6335_v14, %v7992_v20  ;;  %4324 = vrot.lane.b32.xlu0 %v4238_v61, %s6867_s30 }
0x109d   :  { %v4267_v30 = vpop.f32.mrf.mxu0 }
0x109e   :  { %v4268_v7 = vadd.f32 %v4267_v30, %v7996_v48  ;;  %4374 = vrot.lane.b32.xlu1 %v4273_v29, %s6867_s30 }
0x10a0   :  { %4372 = vrot.lane.b32.xlu0 %v4268_v7, %s6867_s30 }
0x10a2   :  { %4370 = vrot.lane.b32.xlu1 %v4263_v11, %s6867_s30 }
0x10a4   :  { %4368 = vrot.lane.b32.xlu0 %v4258_v5, %s6867_s30 }
0x10a6   :  { %4406 = vrot.lane.b32.xlu1 %v8531_v55, %s6852_s0 }
0x10a8   :  { %4404 = vrot.lane.b32.xlu0 %v8535_v10, %s6852_s0 }
0x10aa   :  { %4402 = vrot.lane.b32.xlu1 %v8540_v46, %s6852_s0 }
0x10ac   :  { %4400 = vrot.lane.b32.xlu0 %v8545_v62, %s6852_s0 }
0x1100   :  { %v4287_v35 = vpop.permute.xlu1 %4286 }
0x1101   :  { %v4295_v39 = vadd.f32 %v4287_v35, %v8049_v40 }
0x1102   :  { %v4285_v16 = vpop.permute.xlu0 %4284 }
0x1103   :  { %v5500_v31 = vmul.f32 -1.442695, %v4295_v39  ;;  %v4294_v32 = vadd.f32 %v4285_v16, %v8052_v24 }
0x1104   :  { %v4283_v22 = vpop.permute.xlu1 %4282 }
0x1105   :  { %6732 = vpow2.f32 %v5500_v31  ;;  %v5499_v17 = vmul.f32 -1.442695, %v4294_v32  ;;  %v4293_v55 = vadd.f32 %v4283_v22, %v8043_v2 }
0x1106   :  { %v4281_v1 = vpop.permute.xlu0 %4280 }
0x1107   :  { %6734 = vpow2.f32 %v5499_v17  ;;  %v5498_v10 = vmul.f32 -1.442695, %v4293_v55  ;;  %v4292_v46 = vadd.f32 %v4281_v1, %v8046_v15 }
0x1108   :  { %v4331_v45 = vpop.permute.xlu1 %4330 }
0x1109   :  { %6736 = vpow2.f32 %v5498_v10  ;;  %v5497_v62 = vmul.f32 -1.442695, %v4292_v46  ;;  %v4339_v47 = vadd.f32 %v4331_v45, %v8060_v34 }
0x110a   :  { %v4329_v28 = vpop.permute.xlu0 %4328 }
0x110b   :  { %6738 = vpow2.f32 %v5497_v62  ;;  %v5504_v43 = vmul.f32 -1.442695, %v4339_v47  ;;  %v4338_v26 = vadd.f32 %v4329_v28, %v8063_v21 }
0x110c   :  { %v4327_v60 = vpop.permute.xlu1 %4326 }
0x110d   :  { %v5503_v37 = vmul.f32 -1.442695, %v4338_v26  ;;  %v4337_v42 = vadd.f32 %v4327_v60, %v8055_v50  ;;  %6740 = vpow2.f32 %v5504_v43 }
0x110e   :  { %v4325_v59 = vpop.permute.xlu0 %4324 }
0x110f   :  { %v5502_v38 = vmul.f32 -1.442695, %v4337_v42  ;;  %v4336_v61 = vadd.f32 %v4325_v59, %v8057_v0  ;;  %6742 = vpow2.f32 %v5503_v37 }
0x1110   :  { %v4375_v55 = vpop.permute.xlu1 %4374 }
0x1111   :  { %v5501_v14 = vmul.f32 -1.442695, %v4336_v61  ;;  %6744 = vpow2.f32 %v5502_v38 }
0x1112   :  { %v6733_v29 = vpop.eup %6732  ;;  %v4373_v62 = vpop.permute.xlu0 %4372 }
0x1113   :  { %v4311_v30 = vadd.f32 1.0, %v6733_v29  ;;  %6746 = vpow2.f32 %v5501_v14 }
0x1114   :  { %v6735_v7 = vpop.eup %6734  ;;  %v4371_v42 = vpop.permute.xlu1 %4370 }
0x1115   :  { %6748 = vrcp.f32 %v4311_v30  ;;  %v4310_v11 = vadd.f32 1.0, %v6735_v7 }
0x1116   :  { %v6737_v5 = vpop.eup %6736  ;;  %v4369_v14 = vpop.permute.xlu0 %4368 }
0x1117   :  { %6750 = vrcp.f32 %v4310_v11  ;;  %v4309_v35 = vadd.f32 1.0, %v6737_v5 }
0x1118   :  { %v6739_v39 = vpop.eup %6738 }
0x1119   :  { %6752 = vrcp.f32 %v4309_v35  ;;  %v4308_v16 = vadd.f32 1.0, %v6739_v39  ;;  %v4407_v35 = vpop.permute.xlu1 %4406 }
0x111a   :  { %v6741_v31 = vpop.eup %6740 }
0x111b   :  { %6754 = vrcp.f32 %v4308_v16  ;;  %v4355_v17 = vadd.f32 1.0, %v6741_v31 }
0x111c   :  { %v6743_v32 = vpop.eup %6742 }
0x111d   :  { %v4354_v10 = vadd.f32 1.0, %v6743_v32  ;;  %6756 = vrcp.f32 %v4355_v17  ;;  %v4405_v32 = vpop.permute.xlu0 %4404 }
0x111e   :  { %v6745_v22 = vpop.eup %6744 }
0x111f   :  { %v4353_v45 = vadd.f32 1.0, %v6745_v22  ;;  %6758 = vrcp.f32 %v4354_v10 }
0x1120   :  { %v6747_v1 = vpop.eup %6746 }
0x1121   :  { %v4352_v43 = vadd.f32 1.0, %v6747_v1  ;;  %6760 = vrcp.f32 %v4353_v45 }
0x1122   :  { %v6749_v46 = vpop.eup %6748 }
0x1123   :  { %v4383_v47 = vmul.f32 %v6749_v46, %v4375_v55 }
0x1124   :  { %v6751_v28 = vpop.eup %6750 }
0x1125   :  { %v4387_v26 = vadd.f32 %v4383_v47, %v8072_v49  ;;  %v4382_v60 = vmul.f32 %v6751_v28, %v4373_v62 }
0x1126   :  { %v6753_v37 = vpop.eup %6752 }
0x1127   :  { %6762 = vtanh.f32 %v4387_v26  ;;  %v4386_v59 = vadd.f32 %v4382_v60, %v8075_v56  ;;  %v4381_v38 = vmul.f32 %v6753_v37, %v4371_v42 }
0x1128   :  { %v6755_v61 = vpop.eup %6754  ;;  %6764 = vrcp.f32 %v4352_v43  ;;  %v4403_v43 = vpop.permute.xlu1 %4402 }
0x1129   :  { %6766 = vtanh.f32 %v4386_v59  ;;  %v4385_v29 = vadd.f32 %v4381_v38, %v8067_v3  ;;  %v4380_v30 = vmul.f32 %v6755_v61, %v4369_v14  ;;  %v4401_v38 = vpop.permute.xlu0 %4400 }
0x112a   :  { %v6757_v11 = vpop.eup %6756 }
0x112b   :  { %6768 = vtanh.f32 %v4385_v29  ;;  %v4384_v7 = vadd.f32 %v4380_v30, %v8069_v54  ;;  %v4395_v16 = vsub.f32 1.0, %v6757_v11  ;;  %v4415_v55 = vmul.f32 %v6757_v11, %v4407_v35 }
0x112c   :  { %v6759_v5 = vpop.eup %6758 }
0x112d   :  { %6770 = vtanh.f32 %v4384_v7  ;;  %v4394_v1 = vsub.f32 1.0, %v6759_v5  ;;  %v4414_v62 = vmul.f32 %v6759_v5, %v4405_v32 }
0x112e   :  { %v6761_v39 = vpop.eup %6760 }
0x112f   :  { %v4393_v47 = vsub.f32 1.0, %v6761_v39  ;;  %v4413_v37 = vmul.f32 %v6761_v39, %v4403_v43 }
0x1134   :  { %v6763_v31 = vpop.eup %6762 }
0x1135   :  { %v6765_v22 = vpop.eup %6764  ;;  %v4399_v17 = vmul.f32 %v6763_v31, %v4395_v16 }
0x1136   :  { %v6767_v10 = vpop.eup %6766  ;;  %v4392_v42 = vsub.f32 1.0, %v6765_v22  ;;  %v4412_v29 = vmul.f32 %v6765_v22, %v4401_v38 }
0x1137   :  { %v8650_v46 = vadd.f32 %v4415_v55, %v4399_v17  ;;  %v4398_v45 = vmul.f32 %v6767_v10, %v4394_v1  ;;  %v4984_v1 = vld [vmem:[%s8826_s2 + $0x1d8] sm:$0xff]  ;;  %v4983_v10 = vld [vmem:[%s8826_s2 + $0x1d0] sm:$0xff] }
0x1138   :  { %v6769_v28 = vpop.eup %6768 }
0x1139   :  { %4424 = vst.msk [vmem:[#allocation3 + $0x18] sm:$0xff] %vm4420_vm10, %v8650_v46  ;;  %v8654_v26 = vadd.f32 %v4414_v62, %v4398_v45  ;;  %v4397_v60 = vmul.f32 %v6769_v28, %v4393_v47  ;;  %4447 = vrot.lane.b32.xlu1 %v8650_v46, %s6868_s4  ;;  %v4742_v45 = vld [vmem:[%s8826_s2 + $0x1c8] sm:$0xff]  ;;  %v4987_v62 = vld [vmem:[%s8826_s2 + $0x1f0] sm:$0xff]  ;;  %v4988_v47 = vld [vmem:[%s8826_s2 + $0x1f8] sm:$0xff] }
0x113a   :  { %v6771_v59 = vpop.eup %6770  ;;  %v4731_v28 = vld [vmem:[%s8825_s1 + $0x360] sm:$0xff] }
0x113b   :  { %4423 = vst.msk [vmem:[#allocation3 + $0x10] sm:$0xff] %vm4420_vm10, %v8654_v26  ;;  %v8659_v61 = vadd.f32 %v4413_v37, %v4397_v60  ;;  %v4396_v14 = vmul.f32 %v6771_v59, %v4392_v42  ;;  %4445 = vrot.lane.b32.xlu0 %v8654_v26, %s6868_s4  ;;  %6370 = vmatprep.mubr.msk.f32.mxu0 %vm1601_vm6, %v4731_v28 }
0x113d   :  { %4422 = vst.msk [vmem:[#allocation3 + $0x8] sm:$0xff] %vm4420_vm10, %v8659_v61  ;;  %v8664_v30 = vadd.f32 %v4412_v29, %v4396_v14  ;;  %4443 = vrot.lane.b32.xlu1 %v8659_v61, %s6868_s4 }
0x113f   :  { %4421 = vst.msk [vmem:[#allocation3] sm:$0xff] %vm4420_vm10, %v8664_v30  ;;  %4441 = vrot.lane.b32.xlu0 %v8664_v30, %s6868_s4 }
0x11ab   :  { %v4448_v7 = vpop.permute.xlu1 %4447 }
0x11ac   :  { %6336 = vmatprep.subr.mxu1 %v4448_v7 }
0x11ad   :  { %6337 = vmatpush3.msra.mxu1 %v4448_v7  ;;  %v4446_v11 = vpop.permute.xlu0 %4445 }
0x11ae   :  { %6338 = vmatprep.subr.mxu1 %v4446_v11 }
0x11af   :  { %v4444_v5 = vpop.permute.xlu1 %4443  ;;  %6339 = vmatpush3.msra.mxu1 %v4446_v11 }
0x11b0   :  { %6340 = vmatprep.subr.mxu1 %v4444_v5 }
0x11b1   :  { %6341 = vmatpush3.msra.mxu1 %v4444_v5  ;;  %v4442_v35 = vpop.permute.xlu0 %4441 }
0x11b2   :  { %6342 = vmatprep.subr.mxu1 %v4442_v35 }
0x11b3   :  { %6343 = vmatpush3.msra.mxu1 %v4442_v35 }
0x11b4   :  { %6345 = vmatmul.mubr.msk.f32.vlgmr.msra.gmra.mxu1 %vm1601_vm6, %v8466_v4 }
0x11b5   :  { %6347 = vmatprep.mubr.msk.f32.mxu1 %vm1601_vm6, %v8473_v41 }
0x11b8   :  { %6348 = vmatmul.mubr.msk.f32.gmra.mxu1 %vm1601_vm6, %v8558_v58 }
0x11b9   :  { %6350 = vmatprep.mubr.msk.f32.mxu1 %vm1601_vm6, %v8565_v18 }
0x11bc   :  { %6351 = vmatmul.mubr.msk.f32.gmra.mxu1 %vm1601_vm6, %v8572_v19 }
0x11bd   :  { %6353 = vmatprep.mubr.msk.f32.mxu1 %vm1601_vm6, %v8579_v63 }
0x11c0   :  { %6354 = vmatmul.mubr.msk.f32.gmra.mxu1 %vm1601_vm6, %v8586_v6 }
0x11c1   :  { %6356 = vmatprep.mubr.msk.f32.mxu1 %vm1601_vm6, %v8593_v9 }
0x11c4   :  { %6357 = vmatmul.mubr.msk.f32.gmra.mxu1 %vm1601_vm6, %v8600_v23 }
0x11c5   :  { %6359 = vmatprep.mubr.msk.f32.mxu1 %vm1601_vm6, %v8607_v25 }
0x11c8   :  { %6360 = vmatmul.mubr.msk.f32.gmra.mxu1 %vm1601_vm6, %v8614_v44 }
0x1274   :  { %v6346_v4 = vpop.f32.mrf.mxu1 }
0x1275   :  { %v4525_v9 = vadd.f32 %v6346_v4, %v7920_v27 }
0x1276   :  { %v4519_v41 = vpop.f32.mrf.mxu1 }
0x1277   :  { %v4520_v25 = vadd.f32 %v4519_v41, %v7924_v53 }
0x1278   :  { %v6349_v58 = vpop.f32.mrf.mxu1 }
0x1279   :  { %v4535_v18 = vadd.f32 %v6349_v58, %v7913_v12 }
0x127a   :  { %v4529_v19 = vpop.f32.mrf.mxu1 }
0x127b   :  { %v4530_v63 = vadd.f32 %v4529_v19, %v7915_v8  ;;  %4588 = vrot.lane.b32.xlu1 %v4535_v18, %s6869_s5 }
0x127c   :  { %v6352_v6 = vpop.f32.mrf.mxu1 }
0x127d   :  { %4586 = vrot.lane.b32.xlu0 %v4530_v63, %s6869_s5  ;;  %v4545_v8 = vadd.f32 %v6352_v6, %v7950_v51  ;;  %v4740_v51 = vld [vmem:[%s8826_s2 + $0x1b8] sm:$0xff] }
0x127e   :  { %v4539_v23 = vpop.f32.mrf.mxu1 }
0x127f   :  { %4584 = vrot.lane.b32.xlu1 %v4525_v9, %s6869_s5  ;;  %v4540_v27 = vadd.f32 %v4539_v23, %v7955_v57  ;;  %v4739_v57 = vld [vmem:[%s8826_s2 + $0x1b0] sm:$0xff] }
0x1280   :  { %v6355_v39 = vpop.f32.mrf.mxu1 }
0x1281   :  { %v4555_v44 = vadd.f32 %v6355_v39, %v7938_v33  ;;  %4582 = vrot.lane.b32.xlu0 %v4520_v25, %s6869_s5 }
0x1282   :  { %v4549_v16 = vpop.f32.mrf.mxu1 }
0x1283   :  { %v4550_v12 = vadd.f32 %v4549_v16, %v7943_v36  ;;  %4632 = vrot.lane.b32.xlu1 %v4555_v44, %s6869_s5 }
0x1284   :  { %v6358_v31 = vpop.f32.mrf.mxu1 }
0x1285   :  { %4630 = vrot.lane.b32.xlu0 %v4550_v12, %s6869_s5  ;;  %v4565_v55 = vadd.f32 %v6358_v31, %v8011_v52  ;;  %v4986_v52 = vld [vmem:[%s8826_s2 + $0x1e8] sm:$0xff] }
0x1286   :  { %v4559_v32 = vpop.f32.mrf.mxu1 }
0x1287   :  { %4628 = vrot.lane.b32.xlu1 %v4545_v8, %s6869_s5  ;;  %v4560_v36 = vadd.f32 %v4559_v32, %v8022_v13  ;;  %v4985_v13 = vld [vmem:[%s8826_s2 + $0x1e0] sm:$0xff] }
0x1288   :  { %v6361_v22 = vpop.f32.mrf.mxu1 }
0x1289   :  { %v4575_v53 = vadd.f32 %v6361_v22, %v7992_v20  ;;  %4626 = vrot.lane.b32.xlu0 %v4540_v27, %s6869_s5  ;;  %v4738_v20 = vld [vmem:[%s8826_s2 + $0x1a8] sm:$0xff] }
0x128a   :  { %v4569_v17 = vpop.f32.mrf.mxu1 }
0x128b   :  { %v4570_v33 = vadd.f32 %v4569_v17, %v7996_v48  ;;  %4676 = vrot.lane.b32.xlu1 %v4575_v53, %s6869_s5  ;;  %v4737_v48 = vld [vmem:[%s8826_s2 + $0x1a0] sm:$0xff] }
0x128d   :  { %4674 = vrot.lane.b32.xlu0 %v4570_v33, %s6869_s5 }
0x128f   :  { %4672 = vrot.lane.b32.xlu1 %v4565_v55, %s6869_s5 }
0x1291   :  { %4670 = vrot.lane.b32.xlu0 %v4560_v36, %s6869_s5 }
0x1293   :  { %4708 = vrot.lane.b32.xlu1 %v8650_v46, %s6852_s0  ;;  %v4741_v46 = vld [vmem:[%s8826_s2 + $0x1c0] sm:$0xff] }
0x1295   :  { %4706 = vrot.lane.b32.xlu0 %v8654_v26, %s6852_s0 }
0x1297   :  { %4704 = vrot.lane.b32.xlu1 %v8659_v61, %s6852_s0 }
0x1299   :  { %4702 = vrot.lane.b32.xlu0 %v8664_v30, %s6852_s0 }
0x129b   :  { %4760 = vperm.xlu1 %6431, %v4740_v51  }
0x129d   :  { %4755 = vperm.xlu0 %6430, %v4739_v57  }
0x129f   :  { %4750 = vperm.xlu1 %6431, %v4738_v20  }
0x12a1   :  { %4745 = vperm.xlu0 %6430, %v4737_v48  }
0x12a3   :  { %5006 = vperm.xlu1 %6431, %v4986_v52  }
0x12a5   :  { %5001 = vperm.xlu0 %6430, %v4985_v13  }
0x12a7   :  { %4996 = vperm.xlu1 %6431, %v4984_v1  }
0x12a9   :  { %4991 = vperm.xlu0 %6430, %v4983_v10  }
0x12ab   :  { %4886 = vperm.xlu1 %6431, %v4741_v46  }
0x12ad   :  { %4891 = vperm.xlu0 %6430, %v4742_v45  }
0x12af   :  { %5132 = vperm.xlu1 %6431, %v4987_v62  }
0x12b1   :  { %5137 = vperm.xlu0 %6430, %v4988_v47  }
0x12ed   :  { %v4589_v43 = vpop.permute.xlu1 %4588 }
0x12ee   :  { %v4597_v26 = vadd.f32 %v4589_v43, %v8049_v40 }
0x12ef   :  { %v4587_v60 = vpop.permute.xlu0 %4586 }
0x12f0   :  { %v5520_v37 = vmul.f32 -1.442695, %v4597_v26  ;;  %v4596_v42 = vadd.f32 %v4587_v60, %v8052_v24 }
0x12f1   :  { %v4585_v59 = vpop.permute.xlu1 %4584 }
0x12f2   :  { %6772 = vpow2.f32 %v5520_v37  ;;  %v5519_v38 = vmul.f32 -1.442695, %v4596_v42  ;;  %v4595_v61 = vadd.f32 %v4585_v59, %v8043_v2 }
0x12f3   :  { %v4583_v14 = vpop.permute.xlu0 %4582 }
0x12f4   :  { %6774 = vpow2.f32 %v5519_v38  ;;  %v5518_v29 = vmul.f32 -1.442695, %v4595_v61  ;;  %v4594_v30 = vadd.f32 %v4583_v14, %v8046_v15 }
0x12f5   :  { %v4633_v7 = vpop.permute.xlu1 %4632 }
0x12f6   :  { %6776 = vpow2.f32 %v5518_v29  ;;  %v5517_v11 = vmul.f32 -1.442695, %v4594_v30  ;;  %v4641_v5 = vadd.f32 %v4633_v7, %v8060_v34 }
0x12f7   :  { %v4631_v40 = vpop.permute.xlu0 %4630 }
0x12f8   :  { %6778 = vpow2.f32 %v5517_v11  ;;  %v5524_v35 = vmul.f32 -1.442695, %v4641_v5  ;;  %v4640_v24 = vadd.f32 %v4631_v40, %v8063_v21 }
0x12f9   :  { %v4629_v4 = vpop.permute.xlu1 %4628 }
0x12fa   :  { %v5523_v41 = vmul.f32 -1.442695, %v4640_v24  ;;  %v4639_v58 = vadd.f32 %v4629_v4, %v8055_v50  ;;  %6780 = vpow2.f32 %v5524_v35 }
0x12fb   :  { %v4627_v2 = vpop.permute.xlu0 %4626 }
0x12fc   :  { %v5522_v18 = vmul.f32 -1.442695, %v4639_v58  ;;  %v4638_v19 = vadd.f32 %v4627_v2, %v8057_v0  ;;  %6782 = vpow2.f32 %v5523_v41 }
0x12fd   :  { %v4677_v12 = vpop.permute.xlu1 %4676 }
0x12fe   :  { %v5521_v15 = vmul.f32 -1.442695, %v4638_v19  ;;  %6784 = vpow2.f32 %v5522_v18 }
0x12ff   :  { %v6773_v63 = vpop.eup %6772  ;;  %v4675_v22 = vpop.permute.xlu0 %4674 }
0x1300   :  { %v4613_v6 = vadd.f32 1.0, %v6773_v63  ;;  %6786 = vpow2.f32 %v5521_v15  ;;  %v4732_v63 = vld [vmem:[%s8825_s1 + $0x368] sm:$0xff] }
0x1301   :  { %v6775_v34 = vpop.eup %6774  ;;  %v4673_v57 = vpop.permute.xlu1 %4672 }
0x1302   :  { %6788 = vrcp.f32 %v4613_v6  ;;  %v4612_v9 = vadd.f32 1.0, %v6775_v34  ;;  %v4733_v6 = vld [vmem:[%s8825_s1 + $0x370] sm:$0xff]  ;;  %v4734_v34 = vld [vmem:[%s8825_s1 + $0x378] sm:$0xff] }
0x1303   :  { %v6777_v23 = vpop.eup %6776  ;;  %v4671_v13 = vpop.permute.xlu0 %4670 }
0x1304   :  { %6790 = vrcp.f32 %v4612_v9  ;;  %v4611_v21 = vadd.f32 1.0, %v6777_v23  ;;  %v4735_v9 = vld [vmem:[%s8825_s1 + $0x380] sm:$0xff] }
0x1305   :  { %v6779_v25 = vpop.eup %6778  ;;  %v4709_v62 = vpop.permute.xlu1 %4708 }
0x1306   :  { %6792 = vrcp.f32 %v4611_v21  ;;  %v4610_v50 = vadd.f32 1.0, %v6779_v25 }
0x1307   :  { %v6781_v39 = vpop.eup %6780  ;;  %v4707_v26 = vpop.permute.xlu0 %4706 }
0x1308   :  { %6794 = vrcp.f32 %v4610_v50  ;;  %v4657_v0 = vadd.f32 1.0, %v6781_v39 }
0x1309   :  { %v6783_v44 = vpop.eup %6782 }
0x130a   :  { %v4656_v8 = vadd.f32 1.0, %v6783_v44  ;;  %6796 = vrcp.f32 %v4657_v0 }
0x130b   :  { %v6785_v16 = vpop.eup %6784  ;;  %v4703_v35 = vpop.permute.xlu0 %4702 }
0x130c   :  { %v4655_v27 = vadd.f32 1.0, %v6785_v16  ;;  %6798 = vrcp.f32 %v4656_v8 }
0x130d   :  { %v6787_v31 = vpop.eup %6786 }
0x130e   :  { %v4654_v33 = vadd.f32 1.0, %v6787_v31  ;;  %6800 = vrcp.f32 %v4655_v27 }
0x130f   :  { %v6789_v32 = vpop.eup %6788 }
0x1310   :  { %v4685_v53 = vmul.f32 %v6789_v32, %v4677_v12 }
0x1311   :  { %v6791_v17 = vpop.eup %6790 }
0x1312   :  { %v4689_v55 = vadd.f32 %v4685_v53, %v8072_v49  ;;  %v4684_v36 = vmul.f32 %v6791_v17, %v4675_v22 }
0x1313   :  { %v6793_v51 = vpop.eup %6792 }
0x1314   :  { %6802 = vtanh.f32 %v4689_v55  ;;  %v4688_v20 = vadd.f32 %v4684_v36, %v8075_v56  ;;  %v4683_v48 = vmul.f32 %v6793_v51, %v4673_v57 }
0x1315   :  { %v6795_v52 = vpop.eup %6794  ;;  %6804 = vrcp.f32 %v4654_v33 }
0x1316   :  { %6806 = vtanh.f32 %v4688_v20  ;;  %v4687_v1 = vadd.f32 %v4683_v48, %v8067_v3  ;;  %v4682_v10 = vmul.f32 %v6795_v52, %v4671_v13 }
0x1317   :  { %v6797_v49 = vpop.eup %6796 }
0x1318   :  { %6808 = vtanh.f32 %v4687_v1  ;;  %v4686_v46 = vadd.f32 %v4682_v10, %v8069_v54  ;;  %v4697_v28 = vsub.f32 1.0, %v6797_v49  ;;  %v4717_v37 = vmul.f32 %v6797_v49, %v4709_v62  ;;  %v4705_v54 = vpop.permute.xlu1 %4704  ;;  %v4756_v21 = vpop.permute.xlu0 %4755 }
0x1319   :  { %v6799_v45 = vpop.eup %6798 }
0x131a   :  { %6810 = vtanh.f32 %v4686_v46  ;;  %v4696_v42 = vsub.f32 1.0, %v6799_v45  ;;  %v4716_v61 = vmul.f32 %v6799_v45, %v4707_v26  ;;  %v4978_v26 = vld [vmem:[%s8825_s1 + $0x398] sm:$0xff] }
0x131b   :  { %v6801_v47 = vpop.eup %6800 }
0x131c   :  { %v4695_v14 = vsub.f32 1.0, %v6801_v47  ;;  %v4715_v11 = vmul.f32 %v6801_v47, %v4705_v54  ;;  %v4761_v23 = vpop.permute.xlu1 %4760  ;;  %v4746_v44 = vpop.permute.xlu0 %4745 }
0x1320   :  { %v4751_v25 = vpop.permute.xlu1 %4750 }
0x1321   :  { %v6803_v43 = vpop.eup %6802 }
0x1322   :  { %v6805_v56 = vpop.eup %6804  ;;  %v4701_v60 = vmul.f32 %v6803_v43, %v4697_v28  ;;  %v4736_v28 = vld [vmem:[%s8825_s1 + $0x388] sm:$0xff]  ;;  %v4977_v43 = vld [vmem:[%s8825_s1 + $0x390] sm:$0xff] }
0x1323   :  { %v6807_v59 = vpop.eup %6806  ;;  %v4694_v5 = vsub.f32 1.0, %v6805_v56  ;;  %v4714_v41 = vmul.f32 %v6805_v56, %v4703_v35  ;;  %v4979_v56 = vld [vmem:[%s8825_s1 + $0x3a0] sm:$0xff] }
0x1324   :  { %v4721_v38 = vadd.f32 %v4717_v37, %v4701_v60  ;;  %v4700_v3 = vmul.f32 %v6807_v59, %v4696_v42  ;;  %v4980_v60 = vld [vmem:[%s8825_s1 + $0x3a8] sm:$0xff]  ;;  %v4981_v37 = vld [vmem:[%s8825_s1 + $0x3b0] sm:$0xff]  ;;  %v5002_v42 = vpop.permute.xlu0 %5001  ;;  %v5007_v59 = vpop.permute.xlu1 %5006 }
0x1325   :  { %v6809_v29 = vpop.eup %6808  ;;  %6409 = vmatprep.mubr.msk.f32.mxu1 %vm1601_vm6, %v4981_v37 }
0x1326   :  { %4726 = vst.msk [vmem:[#allocation3 + $0x18] sm:$0xff] %vm4722_vm11, %v4721_v38  ;;  %v4720_v30 = vadd.f32 %v4716_v61, %v4700_v3  ;;  %v4699_v7 = vmul.f32 %v6809_v29, %v4695_v14 }
0x1327   :  { %v6811_v40 = vpop.eup %6810 }
0x1328   :  { %4725 = vst.msk [vmem:[#allocation3 + $0x10] sm:$0xff] %vm4722_vm11, %v4720_v30  ;;  %v4719_v24 = vadd.f32 %v4715_v11, %v4699_v7  ;;  %v4698_v4 = vmul.f32 %v6811_v40, %v4694_v5  ;;  %v4992_v38 = vpop.permute.xlu0 %4991  ;;  %v4997_v3 = vpop.permute.xlu1 %4996 }
0x132a   :  { %4724 = vst.msk [vmem:[#allocation3 + $0x8] sm:$0xff] %vm4722_vm11, %v4719_v24  ;;  %v4718_v58 = vadd.f32 %v4714_v41, %v4698_v4 }
0x132c   :  { %4723 = vst.msk [vmem:[#allocation3] sm:$0xff] %vm4722_vm11, %v4718_v58  ;;  %v4892_v61 = vpop.permute.xlu0 %4891  ;;  %v4887_v54 = vpop.permute.xlu1 %4886 }
0x132d   :  { %v4730_v2 = vld [vmem:[#allocation3 + $0x18] sm:$0xff] }
0x132e   :  { %6362 = vmatprep.subr.mxu0 %v4730_v2 }
0x132f   :  { %6363 = vmatpush3.msra.mxu0 %v4730_v2  ;;  %v4729_v18 = vld [vmem:[#allocation3 + $0x10] sm:$0xff] }
0x1330   :  { %6364 = vmatprep.subr.mxu0 %v4729_v18 }
0x1331   :  { %6365 = vmatpush3.msra.mxu0 %v4729_v18  ;;  %v4728_v19 = vld [vmem:[#allocation3 + $0x8] sm:$0xff] }
0x1332   :  { %6366 = vmatprep.subr.mxu0 %v4728_v19 }
0x1333   :  { %6367 = vmatpush3.msra.mxu0 %v4728_v19  ;;  %v4727_v15 = vld [vmem:[#allocation3] sm:$0xff] }
0x1334   :  { %6368 = vmatprep.subr.mxu0 %v4727_v15 }
0x1335   :  { %6369 = vmatpush3.msra.mxu0 %v4727_v15 }
0x1336   :  { %6371 = vmatmul.mubr.msk.f32.vlgmr.msra.gmra.mxu0 %vm1601_vm6, %v4732_v63 }
0x1337   :  { %6373 = vmatprep.mubr.msk.f32.mxu0 %vm1601_vm6, %v4733_v6 }
0x133a   :  { %6374 = vmatmul.mubr.msk.f32.gmra.mxu0 %vm1601_vm6, %v4734_v34 }
0x133b   :  { %6384 = vmatprep.mubr.msk.f32.mxu0 %vm1601_vm6, %v4735_v9 }
0x13f6   :  { %v6372_v50 = vpop.f32.mrf.mxu0 }
0x13f7   :  { %v4847_v39 = vadd.f32 %v6372_v50, %v4751_v25 }
0x13f8   :  { %v4841_v16 = vpop.f32.mrf.mxu0 }
0x13f9   :  { %v4842_v0 = vadd.f32 %v4841_v16, %v4746_v44  ;;  %v4865_v12 = vmin.f32 %v4847_v39, 0.0  ;;  %vm4861_vm15 = vcmp.gt.f32.partialorder %v4847_v39, 0.0 }
0x13fa   :  { %v6375_v31 = vpop.f32.mrf.mxu0 }
0x13fb   :  { %v4864_v8 = vmin.f32 %v4842_v0, 0.0  ;;  %v4857_v32 = vadd.f32 %v6375_v31, %v4761_v23  ;;  %v4870_v53 = vmul.f32 1.442695, %v4865_v12  ;;  %vm4860_vm0 = vcmp.gt.f32.partialorder %v4842_v0, 0.0 }
0x13fc   :  { %v4851_v27 = vpop.f32.mrf.mxu0 }
0x13fd   :  { %v4867_v22 = vmin.f32 %v4857_v32, 0.0  ;;  %v4852_v17 = vadd.f32 %v4851_v27, %v4756_v21  ;;  %v4868_v33 = vmul.f32 1.442695, %v4864_v8  ;;  %vm4863_vm12 = vcmp.gt.f32.partialorder %v4857_v32, 0.0  ;;  %v4982_v27 = vld [vmem:[%s8825_s1 + $0x3b8] sm:$0xff] }
0x13ff   :  { %v4874_v55 = vmul.f32 1.442695, %v4867_v22  ;;  %v4866_v36 = vmin.f32 %v4852_v17, 0.0  ;;  %vm4862_vm14 = vcmp.gt.f32.partialorder %v4852_v17, 0.0  ;;  %v5138_v22 = vpop.permute.xlu0 %5137 }
0x1401   :  { %6812 = vpow2.f32 %v4874_v55  ;;  %v4872_v51 = vmul.f32 1.442695, %v4866_v36 }
0x1402   :  { %6814 = vpow2.f32 %v4870_v53 }
0x1403   :  { %6816 = vpow2.f32 %v4868_v33  ;;  %v5133_v33 = vpop.permute.xlu1 %5132 }
0x1404   :  { %6818 = vpow2.f32 %v4872_v51 }
0x140e   :  { %v6813_v57 = vpop.eup %6812 }
0x140f   :  { %v6815_v20 = vpop.eup %6814  ;;  %v5532_v48 = vadd.f32 -1.0, %v6813_v57 }
0x1410   :  { %v6817_v52 = vpop.eup %6816  ;;  %v5530_v46 = vadd.f32 -1.0, %v6815_v20 }
0x1411   :  { %v6819_v13 = vpop.eup %6818  ;;  %v4883_v1 = vsel %vm4863_vm12, %v4857_v32, %v5532_v48  ;;  %v5529_v45 = vadd.f32 -1.0, %v6817_v52 }
0x1412   :  { %6376 = vmatprep.subr.mxu0 %v4883_v1  ;;  %v5531_v10 = vadd.f32 -1.0, %v6819_v13  ;;  %v4881_v62 = vsel %vm4861_vm15, %v4847_v39, %v5530_v46 }
0x1413   :  { %6377 = vmatpush3.msra.mxu0 %v4883_v1  ;;  %v4880_v47 = vsel %vm4860_vm0, %v4842_v0, %v5529_v45 }
0x1414   :  { %v4882_v49 = vsel %vm4862_vm14, %v4852_v17, %v5531_v10 }
0x1415   :  { %6378 = vmatprep.subr.mxu0 %v4882_v49 }
0x1416   :  { %6379 = vmatpush3.msra.mxu0 %v4882_v49 }
0x1417   :  { %6380 = vmatprep.subr.mxu0 %v4881_v62 }
0x1418   :  { %6381 = vmatpush3.msra.mxu0 %v4881_v62 }
0x1419   :  { %6382 = vmatprep.subr.mxu0 %v4880_v47 }
0x141a   :  { %6383 = vmatpush3.msra.mxu0 %v4880_v47 }
0x141b   :  { %6385 = vmatmul.mubr.msk.f32.vlgmr.msra.gmra.mxu0 %vm1601_vm6, %v4736_v28  ;;  %6387 = vmatprep.subr.mxu0 %v4883_v1 }
0x141c   :  { %6388 = vmatpush3.msra.mxu0 %v4883_v1  ;;  %6395 = vmatprep.mubr.msk.f32.mxu0 %vm1601_vm6, %v4977_v43 }
0x141d   :  { %6389 = vmatprep.subr.mxu0 %v4882_v49 }
0x141e   :  { %6390 = vmatpush3.msra.mxu0 %v4882_v49 }
0x141f   :  { %6391 = vmatprep.subr.mxu0 %v4881_v62 }
0x1420   :  { %6392 = vmatpush3.msra.mxu0 %v4881_v62 }
0x1421   :  { %6393 = vmatprep.subr.mxu0 %v4880_v47 }
0x1422   :  { %6394 = vmatpush3.msra.mxu0 %v4880_v47 }
0x1423   :  { %6396 = vmatmul.mubr.msk.f32.vlgmr.msra.gmra.mxu0 %vm1601_vm6, %v4978_v26 }
0x1424   :  { %6398 = vmatprep.mubr.msk.f32.mxu0 %vm1601_vm6, %v4979_v56 }
0x1427   :  { %6399 = vmatmul.mubr.msk.f32.gmra.mxu0 %vm1601_vm6, %v4980_v60 }
0x14db   :  { %v6386_v14 = vpop.f32.mrf.mxu0 }
0x14dc   :  { %v4972_v29 = vadd.f32 %v6386_v14, %v4892_v61 }
0x14dd   :  { %v4966_v30 = vpop.f32.mrf.mxu0 }
0x14de   :  { %4976 = vst [vmem:[%s8827_s3 + $0x8] sm:$0xff] %v4972_v29  ;;  %v4967_v7 = vadd.f32 %v4966_v30, %v4887_v54 }
0x14e0   :  { %4975 = vst [vmem:[%s8827_s3] sm:$0xff] %v4967_v7 }
0x14e3   :  { %v6397_v11 = vpop.f32.mrf.mxu0 }
0x14e4   :  { %v5093_v5 = vadd.f32 %v6397_v11, %v4997_v3 }
0x14e5   :  { %v5087_v40 = vpop.f32.mrf.mxu0 }
0x14e6   :  { %v5111_v35 = vmin.f32 %v5093_v5, 0.0  ;;  %v5088_v24 = vadd.f32 %v5087_v40, %v4992_v38  ;;  %vm5107_vm3 = vcmp.gt.f32.partialorder %v5093_v5, 0.0 }
0x14e7   :  { %v6400_v4 = vpop.f32.mrf.mxu0 }
0x14e8   :  { %v5110_v41 = vmin.f32 %v5088_v24, 0.0  ;;  %v5103_v58 = vadd.f32 %v6400_v4, %v5007_v59  ;;  %v5116_v2 = vmul.f32 1.442695, %v5111_v35  ;;  %vm5106_vm13 = vcmp.gt.f32.partialorder %v5088_v24, 0.0 }
0x14e9   :  { %v5097_v18 = vpop.f32.mrf.mxu0 }
0x14ea   :  { %v5113_v19 = vmin.f32 %v5103_v58, 0.0  ;;  %v5098_v15 = vadd.f32 %v5097_v18, %v5002_v42  ;;  %v5114_v63 = vmul.f32 1.442695, %v5110_v41  ;;  %6820 = vpow2.f32 %v5116_v2 }
0x14eb   :  { %vm5109_vm1 = vcmp.gt.f32.partialorder %v5103_v58, 0.0 }
0x14ec   :  { %v5120_v6 = vmul.f32 1.442695, %v5113_v19  ;;  %v5112_v34 = vmin.f32 %v5098_v15, 0.0  ;;  %vm5108_vm2 = vcmp.gt.f32.partialorder %v5098_v15, 0.0 }
0x14ee   :  { %6822 = vpow2.f32 %v5120_v6  ;;  %v5118_v9 = vmul.f32 1.442695, %v5112_v34 }
0x14ef   :  { %6824 = vpow2.f32 %v5114_v63 }
0x14f0   :  { %6826 = vpow2.f32 %v5118_v9 }
0x14f7   :  { %v6821_v23 = vpop.eup %6820 }
0x14f8   :  { %v5540_v0 = vadd.f32 -1.0, %v6821_v23 }
0x14fa   :  { %v5127_v8 = vsel %vm5107_vm3, %v5093_v5, %v5540_v0 }
0x14fb   :  { %v6823_v21 = vpop.eup %6822 }
0x14fc   :  { %v6825_v25 = vpop.eup %6824  ;;  %v5542_v50 = vadd.f32 -1.0, %v6823_v21 }
0x14fd   :  { %v6827_v39 = vpop.eup %6826  ;;  %v5539_v31 = vadd.f32 -1.0, %v6825_v25 }
0x14fe   :  { %v5129_v44 = vsel %vm5109_vm1, %v5103_v58, %v5542_v50  ;;  %v5541_v16 = vadd.f32 -1.0, %v6827_v39 }
0x14ff   :  { %6401 = vmatprep.subr.mxu1 %v5129_v44  ;;  %v5126_v32 = vsel %vm5106_vm13, %v5088_v24, %v5539_v31 }
0x1500   :  { %6402 = vmatpush3.msra.mxu1 %v5129_v44  ;;  %v5128_v12 = vsel %vm5108_vm2, %v5098_v15, %v5541_v16 }
0x1501   :  { %6403 = vmatprep.subr.mxu1 %v5128_v12 }
0x1502   :  { %6404 = vmatpush3.msra.mxu1 %v5128_v12 }
0x1503   :  { %6405 = vmatprep.subr.mxu1 %v5127_v8 }
0x1504   :  { %6406 = vmatpush3.msra.mxu1 %v5127_v8 }
0x1505   :  { %6407 = vmatprep.subr.mxu1 %v5126_v32 }
0x1506   :  { %6408 = vmatpush3.msra.mxu1 %v5126_v32 }
0x1507   :  { %6410 = vmatmul.mubr.msk.f32.vlgmr.msra.gmra.mxu1 %vm1601_vm6, %v4982_v27 }
0x15c7   :  { %v6411_v53 = vpop.f32.mrf.mxu1 }
0x15c8   :  { %v5218_v17 = vadd.f32 %v6411_v53, %v5138_v22 }
0x15c9   :  { %v5212_v55 = vpop.f32.mrf.mxu1 }
0x15ca   :  { %5222 = vst [vmem:[%s8827_s3 + $0x18] sm:$0xff] %v5218_v17  ;;  %v5213_v36 = vadd.f32 %v5212_v55, %v5133_v33 }
0x15cc   :  { %5221 = vst [vmem:[%s8827_s3 + $0x10] sm:$0xff] %v5213_v36 }

</bundles_post_ra>
